<compile_context>
chip_gen: v7x
topology: tpu7x:2x2x1
jax: 0.10.0
libtpu: 0.0.40
codegen_flags: <defaults>
</compile_context>

<pallas_src>
import functools

import numpy as np
import jax
import jax.numpy as jnp
from jax.experimental import pallas as pl
from jax.experimental.pallas import tpu as pltpu


# ---------------------------------------------------------------------------
# Helpers
# ---------------------------------------------------------------------------
def _vmem_budget_bytes(headroom=8 * 1024 * 1024):
    """Physical VMEM capacity minus headroom; safe fallback = 56 MiB (v7x)."""
    cap = 64 * 1024 * 1024
    try:
        info = pltpu.get_tpu_info()
        cap = int(getattr(info, 'vmem_capacity_bytes', cap))
    except Exception:
        pass
    return max(16 * 1024 * 1024, cap - headroom)


def _pick_block(total, row_mult, min_steps=4, max_rows=1024):
    """Pick a block count Bt dividing `total`:
    prefer Bt*row_mult a multiple of 256 (MXU row-fill), <= max_rows, and at
    least `min_steps` grid steps (pipeline overlap / v7x megacore sharding);
    relax gracefully for small problems."""
    divisors = [d for d in range(1, total + 1) if total % d == 0]
    rows = lambda d: d * row_mult
    cands = [d for d in divisors
             if rows(d) % 256 == 0 and rows(d) <= max_rows and total // d >= min_steps]
    if cands:
        return max(cands)
    cands = [d for d in divisors if rows(d) % 256 == 0 and rows(d) <= max_rows]
    if cands:
        return max(cands)
    cands = [d for d in divisors if total // d >= min_steps and rows(d) % 8 == 0]
    if cands:
        return max(cands)
    cands = [d for d in divisors if rows(d) % 8 == 0]
    if cands:
        return max(cands)
    return total


# ---------------------------------------------------------------------------
# Pallas kernel 1: fused window multi-head self-attention
# ---------------------------------------------------------------------------
def _window_attention_kernel(x_ref, wqkv_ref, bqkv_ref, bias_ref, wp_ref,
                             bp_ref, o_ref, ctx_ref, *, num_heads: int):
    """One grid step processes Bt windows for all heads.

    x_ref    : (Bt, N, C)   window tokens (f32 or bf16)
    wqkv_ref : (C, 3C)      fused QKV weight (Q columns pre-scaled), mxu dtype
    bqkv_ref : (1, 3C)      fused QKV bias (Q part pre-scaled), f32
    bias_ref : (H, N, N)    relative position bias, f32
    wp_ref   : (C, C)       output projection weight (head-contiguous rows)
    bp_ref   : (1, C)       output projection bias, f32
    o_ref    : (Bt, N, C)
    ctx_ref  : (Bt*N, C)    VMEM scratch: head-contiguous context accumulator
    """
    Bt, N, C = x_ref.shape
    hd = C // num_heads

    # Leading-dim collapse only (N mult of 8, C of 128): free reshape.
    x2 = x_ref[...].reshape(Bt * N, C)

    # One full-width QKV matmul (MXU K=C, N=3C) with f32 accumulation.
    qkv = jnp.dot(x2, wqkv_ref[...], preferred_element_type=jnp.float32)
    qkv = qkv + bqkv_ref[...]

    # Tiny per-head attention (N=8 tokens per window), batched over all Bt
    # windows in the block; heads are static lane slices of the fused qkv.
    # TODO(synk): softmax tiles are only N=8 lanes wide; a (N, Bt*H*N) lane-
    # dense re-layout would cut VPU/EUP/XLU issues further but needs XLU
    # transposes of the score tensor - skipped.
    for h in range(num_heads):
        qh = qkv[:, 0 * C + h * hd:0 * C + (h + 1) * hd].reshape(Bt, N, hd)
        kh = qkv[:, 1 * C + h * hd:1 * C + (h + 1) * hd].reshape(Bt, N, hd)
        vh = qkv[:, 2 * C + h * hd:2 * C + (h + 1) * hd].reshape(Bt, N, hd)

        s = jnp.einsum('bnd,bmd->bnm', qh, kh,
                       preferred_element_type=jnp.float32)
        s = s + bias_ref[h][None, :, :]
        s = s - jnp.max(s, axis=-1, keepdims=True)
        p = jnp.exp(s)
        p = p * pl.reciprocal(jnp.sum(p, axis=-1, keepdims=True), approx=True)

        ctx = jnp.einsum('bnm,bmd->bnd', p, vh,
                         preferred_element_type=jnp.float32)
        # Head-contiguous write into the VMEM accumulator (bounds vreg
        # pressure; matches torch's (attn@v).transpose(1,2).reshape layout).
        ctx_ref[:, h * hd:(h + 1) * hd] = ctx.reshape(Bt * N, hd)

    # One full-width output projection (MXU K=C, N=C) with f32 accumulation.
    out = jnp.dot(ctx_ref[...].astype(wp_ref.dtype), wp_ref[...],
                  preferred_element_type=jnp.float32) + bp_ref[...]
    o_ref[...] = out.reshape(Bt, N, C).astype(o_ref.dtype)


def window_attention(x_windows, w_qkv, b_qkv, w_proj, b_proj, rel_bias, *,
                     num_heads: int, block_windows=None,
                     mxu_dtype=jnp.float32):
    """x_windows: (B_, N, C) f32.  rel_bias: (num_heads, N, N)."""
    B_, N, C = x_windows.shape
    hd = C // num_heads
    scale = hd ** (-0.5)

    # Fold the 1/sqrt(hd) qk scale into the Q columns of the fused QKV weight
    # and bias at trace time.
    col_scale = jnp.concatenate(
        [jnp.full((C,), scale, jnp.float32), jnp.ones((2 * C,), jnp.float32)])
    wqkv = (w_qkv.astype(jnp.float32) * col_scale[None, :])
    bqkv = (b_qkv.astype(jnp.float32) * col_scale).reshape(1, 3 * C)
    wp = w_proj                                      # (C, C), head-contiguous rows
    bp = b_proj.reshape(1, C).astype(jnp.float32)

    # Block-of-windows tiling: Bt*N a 256-row multiple if possible, >=4 steps.
    if block_windows is None:
        block_windows = _pick_block(B_, N, min_steps=4, max_rows=1024)
    Bt = block_windows
    assert B_ % Bt == 0, "block_windows must divide the number of windows"
    n_blocks = B_ // Bt

    # bf16 MXU inputs are worthwhile on v5e/v6e/v7x alike; softmax, biases and
    # accumulation stay f32.
    x_in = x_windows.astype(mxu_dtype)
    wqkv = wqkv.astype(mxu_dtype)
    wp = wp.astype(mxu_dtype)
    rel_bias = rel_bias.astype(jnp.float32)

    kernel = functools.partial(_window_attention_kernel, num_heads=num_heads)

    flops = int(8 * B_ * N * C * C + 4 * B_ * num_heads * N * N * hd)
    resident_bytes = int(sum(int(np.prod(a.shape)) * a.dtype.itemsize
                             for a in (wqkv, bqkv, rel_bias, wp, bp)))
    bytes_accessed = int(B_ * N * C * (x_in.dtype.itemsize + 4) + resident_bytes)
    cost = pl.CostEstimate(flops=flops,
                           transcendentals=int(B_ * num_heads * N * N),
                           bytes_accessed=bytes_accessed)

    block_bytes = Bt * N * C * (x_in.dtype.itemsize + 4)   # x block + f32 out block
    scratch_bytes = Bt * N * C * 4
    vmem_limit = int(min(_vmem_budget_bytes(),
                         max(16 * 1024 * 1024,
                             4 * (resident_bytes + 2 * block_bytes + scratch_bytes))))

    # TODO(synk): resident weights could use pipeline_mode=pl.Buffered(1) to
    # drop their double-buffers; left at the default for lowering safety.
    grid_spec = pltpu.PrefetchScalarGridSpec(
        num_scalar_prefetch=0,
        grid=(n_blocks,),
        in_specs=[
            pl.BlockSpec((Bt, N, C), lambda b: (b, 0, 0)),            # x (blocked)
            pl.BlockSpec((C, 3 * C), lambda b: (0, 0)),               # fused Wqkv
            pl.BlockSpec((1, 3 * C), lambda b: (0, 0)),               # fused bqkv
            pl.BlockSpec((num_heads, N, N), lambda b: (0, 0, 0)),     # rel pos bias
            pl.BlockSpec((C, C), lambda b: (0, 0)),                   # Wproj
            pl.BlockSpec((1, C), lambda b: (0, 0)),                   # bproj
        ],
        out_specs=pl.BlockSpec((Bt, N, C), lambda b: (b, 0, 0)),
        scratch_shapes=[pltpu.VMEM((Bt * N, C), jnp.float32)],
    )

    out = pl.pallas_call(
        kernel,
        out_shape=jax.ShapeDtypeStruct((B_, N, C), jnp.float32),
        grid_spec=grid_spec,
        compiler_params=pltpu.CompilerParams(
            dimension_semantics=("parallel",),
            vmem_limit_bytes=vmem_limit),
        cost_estimate=cost,
    )(x_in, wqkv, bqkv, rel_bias, wp, bp)
    return out.astype(x_windows.dtype)


# ---------------------------------------------------------------------------
# Pallas kernel 2: fused LayerNorm -> Linear -> GELU -> Linear -> residual
# ---------------------------------------------------------------------------
def _ln_mlp_kernel(x_ref, g_ref, b_ref, w1_ref, b1_ref, w2_ref, b2_ref, o_ref):
    x = x_ref[...].astype(jnp.float32)            # (Tt, C)
    mu = jnp.mean(x, axis=-1, keepdims=True)
    xc = x - mu
    var = jnp.mean(xc * xc, axis=-1, keepdims=True)
    xn = xc * jax.lax.rsqrt(var + 1e-5) * g_ref[...] + b_ref[...]
    # Matmul inputs take the weight dtype (bf16 path); accumulate in f32.
    h = jnp.dot(xn.astype(w1_ref.dtype), w1_ref[...],
                preferred_element_type=jnp.float32) + b1_ref[...]
    # TODO(synk): torch nn.GELU() default is the erf-exact GELU; the tanh
    # approximation is used here (guaranteed Mosaic lowering), max dev ~1e-3.
    h = jax.nn.gelu(h, approximate=True)
    y = jnp.dot(h.astype(w2_ref.dtype), w2_ref[...],
                preferred_element_type=jnp.float32) + b2_ref[...]
    # Re-read x_ref for the residual instead of keeping the f32 copy of x live
    # across both matmuls (bounds vreg pressure at large Tt; ld slots are idle).
    o_ref[...] = (x_ref[...].astype(jnp.float32) + y).astype(o_ref.dtype)


def ln_mlp_residual(tokens, gamma, beta, w1, b1, w2, b2, *, block_rows=None,
                    mxu_dtype=jnp.float32):
    T, C = tokens.shape
    Ch = w1.shape[1]
    if block_rows is None:
        block_rows = _pick_block(T, 1, min_steps=4, max_rows=1024)
    Tt = block_rows
    assert T % Tt == 0

    w1c = w1.astype(mxu_dtype)
    w2c = w2.astype(mxu_dtype)

    cost = pl.CostEstimate(
        flops=int(4 * T * C * Ch),
        transcendentals=int(T * Ch),
        bytes_accessed=int(4 * (2 * T * C + 2 * C * Ch + 3 * C + Ch)))

    resident_bytes = int(C * Ch * (w1c.dtype.itemsize + w2c.dtype.itemsize)
                         + 4 * (3 * C + Ch))
    block_bytes = Tt * C * (tokens.dtype.itemsize + 4) + Tt * Ch * 4
    vmem_limit = int(min(_vmem_budget_bytes(),
                         max(16 * 1024 * 1024,
                             4 * (resident_bytes + 2 * block_bytes))))

    grid_spec = pltpu.PrefetchScalarGridSpec(
        num_scalar_prefetch=0,
        grid=(T // Tt,),
        in_specs=[
            pl.BlockSpec((Tt, C), lambda i: (i, 0)),
            pl.BlockSpec((1, C), lambda i: (0, 0)),
            pl.BlockSpec((1, C), lambda i: (0, 0)),
            pl.BlockSpec((C, Ch), lambda i: (0, 0)),
            pl.BlockSpec((1, Ch), lambda i: (0, 0)),
            pl.BlockSpec((Ch, C), lambda i: (0, 0)),
            pl.BlockSpec((1, C), lambda i: (0, 0)),
        ],
        out_specs=pl.BlockSpec((Tt, C), lambda i: (i, 0)),
    )
    return pl.pallas_call(
        _ln_mlp_kernel,
        out_shape=jax.ShapeDtypeStruct((T, C), tokens.dtype),
        grid_spec=grid_spec,
        compiler_params=pltpu.CompilerParams(
            dimension_semantics=("parallel",),
            vmem_limit_bytes=vmem_limit),
        cost_estimate=cost,
    )(tokens, gamma.reshape(1, C).astype(jnp.float32),
      beta.reshape(1, C).astype(jnp.float32), w1c,
      b1.reshape(1, Ch).astype(jnp.float32), w2c,
      b2.reshape(1, C).astype(jnp.float32))


# ---------------------------------------------------------------------------
# SpatialBlock plumbing (jnp / lax): ConvPosEnc, LayerNorm, window partition
# ---------------------------------------------------------------------------
def _conv_pos_enc_cl(x_cl, w_dhwio, b):
    # x_cl: (B, D, H, W, C) channels-last; w_dhwio: (3,3,3,Cin,Cout).
    # TODO(synk): the 3x3x3 Conv3d is left to XLA's conv (channels-last, the
    # TPU-preferred layout); no bespoke Pallas conv kernel is implemented.
    feat = jax.lax.conv_general_dilated(
        x_cl, w_dhwio, window_strides=(1, 1, 1),
        padding=((1, 1), (1, 1), (1, 1)),
        dimension_numbers=('NDHWC', 'DHWIO', 'NDHWC'))
    return x_cl + feat + b.reshape(1, 1, 1, 1, -1)


def _layer_norm(x, gamma, beta, eps=1e-5):
    mu = jnp.mean(x, axis=-1, keepdims=True)
    xc = x - mu
    var = jnp.mean(xc * xc, axis=-1, keepdims=True)
    return xc * jax.lax.rsqrt(var + eps) * gamma + beta


def get_window_size(x_size, window_size):
    return tuple(min(x, w) for x, w in zip(x_size, window_size))


def window_partition(x, ws):
    # x: (B, Dp, Hp, Wp, C) -> (B*nW, prod(ws), C)   (matches the torch code)
    # TODO(synk): folding the partition/reverse transposes into the attention
    # pallas_call (grid over (B, Dp/ws0, Hp/ws1)) would remove two full-tensor
    # HBM round trips; left in jnp for clarity.
    B, Dp, Hp, Wp, C = x.shape
    x = x.reshape(B, Dp // ws[0], ws[0], Hp // ws[1], ws[1], Wp // ws[2], ws[2], C)
    x = jnp.transpose(x, (0, 1, 3, 5, 2, 4, 6, 7))
    return x.reshape(-1, ws[0] * ws[1] * ws[2], C)


def window_reverse(windows, ws, B, Dp, Hp, Wp):
    # windows: (B*nW, ws0, ws1, ws2, C) -> (B, Dp, Hp, Wp, C)
    C = windows.shape[-1]
    x = windows.reshape(B, Dp // ws[0], Hp // ws[1], Wp // ws[2],
                        ws[0], ws[1], ws[2], C)
    x = jnp.transpose(x, (0, 1, 4, 2, 5, 3, 6, 7))
    return x.reshape(B, Dp, Hp, Wp, C)


def _relative_position_bias(table, window_size, num_heads):
    # Mirrors WindowAttention3D's relative_position_index construction.
    wd, wh, ww = window_size
    coords = np.stack(np.meshgrid(np.arange(wd), np.arange(wh), np.arange(ww),
                                  indexing='ij'))                  # (3, wd, wh, ww)
    cf = coords.reshape(3, -1)                                     # (3, N)
    rel = (cf[:, :, None] - cf[:, None, :]).transpose(1, 2, 0)     # (N, N, 3)
    rel = rel.astype(np.int64)
    rel[..., 0] += wd - 1
    rel[..., 1] += wh - 1
    rel[..., 2] += ww - 1
    rel[..., 0] *= (2 * wh - 1) * (2 * ww - 1)
    rel[..., 1] *= (2 * ww - 1)
    index = rel.sum(-1).astype(np.int32)                           # (N, N)
    N = wd * wh * ww
    bias = jnp.take(table, index.reshape(-1), axis=0)              # (N*N, H)
    return jnp.transpose(bias.reshape(N, N, num_heads), (2, 0, 1)) # (H, N, N)


def _window_attention_ref(x, w_qkv, b_qkv, w_proj, b_proj, rel_bias, *, num_heads):
    # Pure-jnp reference mirroring the PyTorch WindowAttention3D forward.
    B_, N, C = x.shape
    hd = C // num_heads
    scale = hd ** (-0.5)
    qkv = (x @ w_qkv + b_qkv).reshape(B_, N, 3, num_heads, hd)
    qkv = jnp.transpose(qkv, (2, 0, 3, 1, 4))                      # (3, B_, H, N, hd)
    q, k, v = qkv[0] * scale, qkv[1], qkv[2]
    attn = q @ jnp.swapaxes(k, -1, -2) + rel_bias[None]
    attn = jax.nn.softmax(attn, axis=-1)
    out = jnp.transpose(attn @ v, (0, 2, 1, 3)).reshape(B_, N, C)
    return out @ w_proj + b_proj


def spatial_block_forward(x, p, *, num_heads, window_size,
                          use_pallas=True, mxu_dtype=jnp.float32):
    """SpatialBlock.forward (eval mode).  x: (B, C, D, H, W) -> (B, C, D, H, W)."""
    B, C, D, H, W = x.shape
    ws = get_window_size((D, H, W), window_size)

    # Channels-last end-to-end: exactly one transpose in, one transpose out.
    x_cl = jnp.transpose(x, (0, 2, 3, 4, 1))                       # b d h w c

    # --- cpe[0] + norm1 (channels-last conv) ----------------------------------
    w0 = jnp.transpose(p['cpe0_w'], (2, 3, 4, 1, 0))               # OIDHW -> DHWIO
    shortcut = _conv_pos_enc_cl(x_cl, w0, p['cpe0_b'])
    xn = _layer_norm(shortcut, p['norm1_g'], p['norm1_b'])

    # --- pad to window multiples, partition, window attention ----------------
    pad_d, pad_h, pad_w = (-D) % ws[0], (-H) % ws[1], (-W) % ws[2]
    xp = jnp.pad(xn, ((0, 0), (0, pad_d), (0, pad_h), (0, pad_w), (0, 0)))
    _, Dp, Hp, Wp, _ = xp.shape
    x_windows = window_partition(xp, ws)                           # (B_, N, C)

    rel_bias = _relative_position_bias(p['attn_rel_table'], ws, num_heads)
    if use_pallas:
        attn_windows = window_attention(
            x_windows, p['attn_w_qkv'], p['attn_b_qkv'], p['attn_w_proj'],
            p['attn_b_proj'], rel_bias, num_heads=num_heads, mxu_dtype=mxu_dtype)
    else:
        attn_windows = _window_attention_ref(
            x_windows, p['attn_w_qkv'], p['attn_b_qkv'], p['attn_w_proj'],
            p['attn_b_proj'], rel_bias, num_heads=num_heads)

    attn_windows = attn_windows.reshape(-1, ws[0], ws[1], ws[2], C)
    xr = window_reverse(attn_windows, ws, B, Dp, Hp, Wp)
    xr = xr[:, :D, :H, :W, :]
    x1 = shortcut + xr                                             # drop_path = id

    # --- cpe[1] (channels-last conv, no layout round-trip) --------------------
    w1c = jnp.transpose(p['cpe1_w'], (2, 3, 4, 1, 0))
    x1 = _conv_pos_enc_cl(x1, w1c, p['cpe1_b'])

    # --- ffn: x + Mlp(norm2(x)) -----------------------------------------------
    tokens = x1.reshape(B * D * H * W, C)
    if use_pallas:
        tokens = ln_mlp_residual(tokens, p['norm2_g'], p['norm2_b'],
                                 p['mlp_w1'], p['mlp_b1'],
                                 p['mlp_w2'], p['mlp_b2'], mxu_dtype=mxu_dtype)
    else:
        xn2 = _layer_norm(tokens, p['norm2_g'], p['norm2_b'])
        h = jax.nn.gelu(xn2 @ p['mlp_w1'] + p['mlp_b1'], approximate=True)
        tokens = tokens + (h @ p['mlp_w2'] + p['mlp_b2'])
    out = tokens.reshape(B, D, H, W, C)
    return jnp.transpose(out, (0, 4, 1, 2, 3))                     # b c d h w


# ---------------------------------------------------------------------------
if __name__ == "__main__":
    # Small shapes consistent with the module: dim=128, 4 heads (head_dim=32,
    # the production DaViT head size), window (2,2,2) -> N=8 tokens,
    # B=2, D=H=W=4 -> 16 windows, mlp hidden = 4*dim = 512.
    B, C, D, H, W = 2, 128, 4, 4, 4
    num_heads = 4
    window_size = (2, 2, 2)
    mlp_hidden = 4 * C
    n_bias = ((2 * window_size[0] - 1) * (2 * window_size[1] - 1)
              * (2 * window_size[2] - 1))

    key = jax.random.PRNGKey(0)
    keys = jax.random.split(key, 16)

    def rnd(k, shape, s=0.02):
        return jax.random.normal(k, shape, dtype=jnp.float32) * s

    x = jax.random.normal(keys[0], (B, C, D, H, W), dtype=jnp.float32)
    params = {
        'cpe0_w': rnd(keys[1], (C, C, 3, 3, 3)),
        'cpe0_b': rnd(keys[2], (C,)),
        'norm1_g': jnp.ones((C,), jnp.float32),
        'norm1_b': jnp.zeros((C,), jnp.float32),
        'attn_w_qkv': rnd(keys[3], (C, 3 * C)),
        'attn_b_qkv': rnd(keys[4], (3 * C,)),
        'attn_w_proj': rnd(keys[5], (C, C)),
        'attn_b_proj': rnd(keys[6], (C,)),
        'attn_rel_table': rnd(keys[7], (n_bias, num_heads)),
        'cpe1_w': rnd(keys[8], (C, C, 3, 3, 3)),
        'cpe1_b': rnd(keys[9], (C,)),
        'norm2_g': jnp.ones((C,), jnp.float32),
        'norm2_b': jnp.zeros((C,), jnp.float32),
        'mlp_w1': rnd(keys[10], (C, mlp_hidden)),
        'mlp_b1': rnd(keys[11], (mlp_hidden,)),
        'mlp_w2': rnd(keys[12], (mlp_hidden, C)),
        'mlp_b2': rnd(keys[13], (C,)),
    }

    fwd = jax.jit(functools.partial(spatial_block_forward, num_heads=num_heads,
                                    window_size=window_size, use_pallas=True))
    ref_fn = jax.jit(functools.partial(spatial_block_forward, num_heads=num_heads,
                                       window_size=window_size, use_pallas=False))

    out = jax.block_until_ready(fwd(x, params))
    ref = jax.block_until_ready(ref_fn(x, params))
    assert out.shape == (B, C, D, H, W)
    err = float(jnp.max(jnp.abs(out - ref)))
    assert err < 5e-3, f"Pallas SpatialBlock mismatch vs reference: {err}"

    # bf16 MXU-input variant of both kernels (recommended on v5e/v6e/v7x);
    # f32 LN / softmax / bias / accumulation, so only a small extra tolerance.
    fwd_bf16 = jax.jit(functools.partial(
        spatial_block_forward, num_heads=num_heads, window_size=window_size,
        use_pallas=True, mxu_dtype=jnp.bfloat16))
    out_bf16 = jax.block_until_ready(fwd_bf16(x, params))
    err_bf16 = float(jnp.max(jnp.abs(out_bf16 - ref)))
    assert err_bf16 < 5e-2, f"bf16 kernel variant mismatch vs reference: {err_bf16}"

    print("KERNEL_OK")
</pallas_src>

<mosaic_0001>
module attributes {stable_mosaic.version = 11 : i64} {
  func.func @_window_attention_kernel(%arg0: i32, %arg1: memref<4x8x128xf32, #tpu.memory_space<vmem>>, %arg2: memref<128x384xf32, #tpu.memory_space<vmem>>, %arg3: memref<1x384xf32, #tpu.memory_space<vmem>>, %arg4: memref<4x8x8xf32, #tpu.memory_space<vmem>>, %arg5: memref<128x128xf32, #tpu.memory_space<vmem>>, %arg6: memref<1x128xf32, #tpu.memory_space<vmem>>, %arg7: memref<4x8x128xf32, #tpu.memory_space<vmem>>, %arg8: memref<32x128xf32, #tpu.memory_space<vmem>>) attributes {dimension_semantics = [#tpu.dimension_semantics<parallel>], iteration_bounds = array<i64: 4>, scalar_prefetch = 0 : i64, scratch_operands = 1 : i64, tpu.core_type = #tpu.core_type<tc>, window_params = [{transform_indices = @transform_0, window_bounds = array<i64: 4, 8, 128>}, {pipeline_mode = #tpu.pipeline_mode<synchronous>, transform_indices = @transform_1, window_bounds = array<i64: 128, 384>}, {pipeline_mode = #tpu.pipeline_mode<synchronous>, transform_indices = @transform_2, window_bounds = array<i64: 1, 384>}, {pipeline_mode = #tpu.pipeline_mode<synchronous>, transform_indices = @transform_3, window_bounds = array<i64: 4, 8, 8>}, {pipeline_mode = #tpu.pipeline_mode<synchronous>, transform_indices = @transform_4, window_bounds = array<i64: 128, 128>}, {pipeline_mode = #tpu.pipeline_mode<synchronous>, transform_indices = @transform_5, window_bounds = array<i64: 1, 128>}, {transform_indices = @transform_6, window_bounds = array<i64: 4, 8, 128>}]} {
    %c0 = arith.constant 0 : index
    %c0_0 = arith.constant 0 : index
    %c0_1 = arith.constant 0 : index
    %0 = vector.load %arg1[%c0, %c0_0, %c0_1] : memref<4x8x128xf32, #tpu.memory_space<vmem>>, vector<4x8x128xf32>
    %1 = vector.shape_cast %0 : vector<4x8x128xf32> to vector<32x128xf32>
    %c0_2 = arith.constant 0 : index
    %c0_3 = arith.constant 0 : index
    %2 = vector.load %arg2[%c0_2, %c0_3] : memref<128x384xf32, #tpu.memory_space<vmem>>, vector<128x384xf32>
    %cst = arith.constant dense<0.000000e+00> : vector<32x384xf32>
    %3 = tpu.matmul %1, %2, %cst {dimension_numbers = #tpu.dot_dimension_numbers<[1], [0], [0], [1], [0, 0, 1, 1], [], []>} : vector<32x128xf32>, vector<128x384xf32>, vector<32x384xf32> -> vector<32x384xf32>
    %c0_4 = arith.constant 0 : index
    %c0_5 = arith.constant 0 : index
    %4 = vector.load %arg3[%c0_4, %c0_5] : memref<1x384xf32, #tpu.memory_space<vmem>>, vector<1x384xf32>
    %5 = vector.broadcast %4 : vector<1x384xf32> to vector<32x384xf32>
    %6 = arith.addf %3, %5 : vector<32x384xf32>
    %7 = vector.extract_strided_slice %6 {offsets = [0, 0], sizes = [32, 32], strides = [1, 1]} : vector<32x384xf32> to vector<32x32xf32>
    %8 = vector.shape_cast %7 : vector<32x32xf32> to vector<4x8x32xf32>
    %9 = vector.extract_strided_slice %6 {offsets = [0, 128], sizes = [32, 32], strides = [1, 1]} : vector<32x384xf32> to vector<32x32xf32>
    %10 = vector.shape_cast %9 : vector<32x32xf32> to vector<4x8x32xf32>
    %11 = vector.extract_strided_slice %6 {offsets = [0, 256], sizes = [32, 32], strides = [1, 1]} : vector<32x384xf32> to vector<32x32xf32>
    %12 = vector.shape_cast %11 : vector<32x32xf32> to vector<4x8x32xf32>
    "tpu.trace_start"() <{level = 10 : i32, message = "bnd,bmd->bnm"}> : () -> ()
    %cst_6 = arith.constant dense<0.000000e+00> : vector<4x8x8xf32>
    %13 = tpu.matmul %8, %10, %cst_6 {dimension_numbers = #tpu.dot_dimension_numbers<[2], [2], [1], [1], [0, 0, 0, 1, 1, 1], [0], [0]>} : vector<4x8x32xf32>, vector<4x8x32xf32>, vector<4x8x8xf32> -> vector<4x8x8xf32>
    "tpu.trace_stop"() : () -> ()
    %c0_7 = arith.constant 0 : index
    %c0_8 = arith.constant 0 : index
    %c0_9 = arith.constant 0 : index
    %14 = vector.load %arg4[%c0_7, %c0_8, %c0_9] : memref<4x8x8xf32, #tpu.memory_space<vmem>>, vector<1x8x8xf32>
    %15 = vector.shape_cast %14 : vector<1x8x8xf32> to vector<8x8xf32>
    %16 = vector.shape_cast %15 : vector<8x8xf32> to vector<1x8x8xf32>
    %17 = vector.broadcast %16 : vector<1x8x8xf32> to vector<4x8x8xf32>
    %18 = arith.addf %13, %17 : vector<4x8x8xf32>
    %cst_10 = arith.constant dense<0xFF800000> : vector<4x8xf32>
    %19 = vector.multi_reduction <maximumf>, %18, %cst_10 [2] : vector<4x8x8xf32> to vector<4x8xf32>
    %20 = vector.shape_cast %19 : vector<4x8xf32> to vector<4x8x1xf32>
    %21 = vector.broadcast %20 : vector<4x8x1xf32> to vector<4x8x8xf32>
    %22 = arith.subf %18, %21 : vector<4x8x8xf32>
    %23 = math.exp %22 : vector<4x8x8xf32>
    %cst_11 = arith.constant dense<0.000000e+00> : vector<4x8xf32>
    %24 = vector.multi_reduction <add>, %23, %cst_11 [2] : vector<4x8x8xf32> to vector<4x8xf32>
    %25 = vector.shape_cast %24 : vector<4x8xf32> to vector<4x8x1xf32>
    %26 = tpu.reciprocal %25 {approx = true} : vector<4x8x1xf32> -> vector<4x8x1xf32>
    %27 = vector.broadcast %26 : vector<4x8x1xf32> to vector<4x8x8xf32>
    %28 = arith.mulf %23, %27 : vector<4x8x8xf32>
    "tpu.trace_start"() <{level = 10 : i32, message = "bnm,bmd->bnd"}> : () -> ()
    %cst_12 = arith.constant dense<0.000000e+00> : vector<4x8x32xf32>
    %29 = tpu.matmul %28, %12, %cst_12 {dimension_numbers = #tpu.dot_dimension_numbers<[2], [1], [1], [2], [0, 0, 0, 1, 1, 2], [0], [0]>} : vector<4x8x8xf32>, vector<4x8x32xf32>, vector<4x8x32xf32> -> vector<4x8x32xf32>
    "tpu.trace_stop"() : () -> ()
    %30 = vector.shape_cast %29 : vector<4x8x32xf32> to vector<32x32xf32>
    %c0_13 = arith.constant 0 : index
    %c0_14 = arith.constant 0 : index
    %31 = vector.load %arg8[%c0_13, %c0_14] : memref<32x128xf32, #tpu.memory_space<vmem>>, vector<32x32xf32>
    tpu.vector_store %arg8[%c0_13, %c0_14], %30 {strides = array<i32>} : memref<32x128xf32, #tpu.memory_space<vmem>>, vector<32x32xf32>,
    %32 = vector.extract_strided_slice %6 {offsets = [0, 32], sizes = [32, 32], strides = [1, 1]} : vector<32x384xf32> to vector<32x32xf32>
    %33 = vector.shape_cast %32 : vector<32x32xf32> to vector<4x8x32xf32>
    %34 = vector.extract_strided_slice %6 {offsets = [0, 160], sizes = [32, 32], strides = [1, 1]} : vector<32x384xf32> to vector<32x32xf32>
    %35 = vector.shape_cast %34 : vector<32x32xf32> to vector<4x8x32xf32>
    %36 = vector.extract_strided_slice %6 {offsets = [0, 288], sizes = [32, 32], strides = [1, 1]} : vector<32x384xf32> to vector<32x32xf32>
    %37 = vector.shape_cast %36 : vector<32x32xf32> to vector<4x8x32xf32>
    "tpu.trace_start"() <{level = 10 : i32, message = "bnd,bmd->bnm"}> : () -> ()
    %cst_15 = arith.constant dense<0.000000e+00> : vector<4x8x8xf32>
    %38 = tpu.matmul %33, %35, %cst_15 {dimension_numbers = #tpu.dot_dimension_numbers<[2], [2], [1], [1], [0, 0, 0, 1, 1, 1], [0], [0]>} : vector<4x8x32xf32>, vector<4x8x32xf32>, vector<4x8x8xf32> -> vector<4x8x8xf32>
    "tpu.trace_stop"() : () -> ()
    %c1 = arith.constant 1 : index
    %c0_16 = arith.constant 0 : index
    %c0_17 = arith.constant 0 : index
    %39 = vector.load %arg4[%c1, %c0_16, %c0_17] : memref<4x8x8xf32, #tpu.memory_space<vmem>>, vector<1x8x8xf32>
    %40 = vector.shape_cast %39 : vector<1x8x8xf32> to vector<8x8xf32>
    %41 = vector.shape_cast %40 : vector<8x8xf32> to vector<1x8x8xf32>
    %42 = vector.broadcast %41 : vector<1x8x8xf32> to vector<4x8x8xf32>
    %43 = arith.addf %38, %42 : vector<4x8x8xf32>
    %cst_18 = arith.constant dense<0xFF800000> : vector<4x8xf32>
    %44 = vector.multi_reduction <maximumf>, %43, %cst_18 [2] : vector<4x8x8xf32> to vector<4x8xf32>
    %45 = vector.shape_cast %44 : vector<4x8xf32> to vector<4x8x1xf32>
    %46 = vector.broadcast %45 : vector<4x8x1xf32> to vector<4x8x8xf32>
    %47 = arith.subf %43, %46 : vector<4x8x8xf32>
    %48 = math.exp %47 : vector<4x8x8xf32>
    %cst_19 = arith.constant dense<0.000000e+00> : vector<4x8xf32>
    %49 = vector.multi_reduction <add>, %48, %cst_19 [2] : vector<4x8x8xf32> to vector<4x8xf32>
    %50 = vector.shape_cast %49 : vector<4x8xf32> to vector<4x8x1xf32>
    %51 = tpu.reciprocal %50 {approx = true} : vector<4x8x1xf32> -> vector<4x8x1xf32>
    %52 = vector.broadcast %51 : vector<4x8x1xf32> to vector<4x8x8xf32>
    %53 = arith.mulf %48, %52 : vector<4x8x8xf32>
    "tpu.trace_start"() <{level = 10 : i32, message = "bnm,bmd->bnd"}> : () -> ()
    %cst_20 = arith.constant dense<0.000000e+00> : vector<4x8x32xf32>
    %54 = tpu.matmul %53, %37, %cst_20 {dimension_numbers = #tpu.dot_dimension_numbers<[2], [1], [1], [2], [0, 0, 0, 1, 1, 2], [0], [0]>} : vector<4x8x8xf32>, vector<4x8x32xf32>, vector<4x8x32xf32> -> vector<4x8x32xf32>
    "tpu.trace_stop"() : () -> ()
    %55 = vector.shape_cast %54 : vector<4x8x32xf32> to vector<32x32xf32>
    %c0_21 = arith.constant 0 : index
    %c32 = arith.constant 32 : index
    %56 = vector.load %arg8[%c0_21, %c32] : memref<32x128xf32, #tpu.memory_space<vmem>>, vector<32x32xf32>
    tpu.vector_store %arg8[%c0_21, %c32], %55 {strides = array<i32>} : memref<32x128xf32, #tpu.memory_space<vmem>>, vector<32x32xf32>,
    %57 = vector.extract_strided_slice %6 {offsets = [0, 64], sizes = [32, 32], strides = [1, 1]} : vector<32x384xf32> to vector<32x32xf32>
    %58 = vector.shape_cast %57 : vector<32x32xf32> to vector<4x8x32xf32>
    %59 = vector.extract_strided_slice %6 {offsets = [0, 192], sizes = [32, 32], strides = [1, 1]} : vector<32x384xf32> to vector<32x32xf32>
    %60 = vector.shape_cast %59 : vector<32x32xf32> to vector<4x8x32xf32>
    %61 = vector.extract_strided_slice %6 {offsets = [0, 320], sizes = [32, 32], strides = [1, 1]} : vector<32x384xf32> to vector<32x32xf32>
    %62 = vector.shape_cast %61 : vector<32x32xf32> to vector<4x8x32xf32>
    "tpu.trace_start"() <{level = 10 : i32, message = "bnd,bmd->bnm"}> : () -> ()
    %cst_22 = arith.constant dense<0.000000e+00> : vector<4x8x8xf32>
    %63 = tpu.matmul %58, %60, %cst_22 {dimension_numbers = #tpu.dot_dimension_numbers<[2], [2], [1], [1], [0, 0, 0, 1, 1, 1], [0], [0]>} : vector<4x8x32xf32>, vector<4x8x32xf32>, vector<4x8x8xf32> -> vector<4x8x8xf32>
    "tpu.trace_stop"() : () -> ()
    %c2 = arith.constant 2 : index
    %c0_23 = arith.constant 0 : index
    %c0_24 = arith.constant 0 : index
    %64 = vector.load %arg4[%c2, %c0_23, %c0_24] : memref<4x8x8xf32, #tpu.memory_space<vmem>>, vector<1x8x8xf32>
    %65 = vector.shape_cast %64 : vector<1x8x8xf32> to vector<8x8xf32>
    %66 = vector.shape_cast %65 : vector<8x8xf32> to vector<1x8x8xf32>
    %67 = vector.broadcast %66 : vector<1x8x8xf32> to vector<4x8x8xf32>
    %68 = arith.addf %63, %67 : vector<4x8x8xf32>
    %cst_25 = arith.constant dense<0xFF800000> : vector<4x8xf32>
    %69 = vector.multi_reduction <maximumf>, %68, %cst_25 [2] : vector<4x8x8xf32> to vector<4x8xf32>
    %70 = vector.shape_cast %69 : vector<4x8xf32> to vector<4x8x1xf32>
    %71 = vector.broadcast %70 : vector<4x8x1xf32> to vector<4x8x8xf32>
    %72 = arith.subf %68, %71 : vector<4x8x8xf32>
    %73 = math.exp %72 : vector<4x8x8xf32>
    %cst_26 = arith.constant dense<0.000000e+00> : vector<4x8xf32>
    %74 = vector.multi_reduction <add>, %73, %cst_26 [2] : vector<4x8x8xf32> to vector<4x8xf32>
    %75 = vector.shape_cast %74 : vector<4x8xf32> to vector<4x8x1xf32>
    %76 = tpu.reciprocal %75 {approx = true} : vector<4x8x1xf32> -> vector<4x8x1xf32>
    %77 = vector.broadcast %76 : vector<4x8x1xf32> to vector<4x8x8xf32>
    %78 = arith.mulf %73, %77 : vector<4x8x8xf32>
    "tpu.trace_start"() <{level = 10 : i32, message = "bnm,bmd->bnd"}> : () -> ()
    %cst_27 = arith.constant dense<0.000000e+00> : vector<4x8x32xf32>
    %79 = tpu.matmul %78, %62, %cst_27 {dimension_numbers = #tpu.dot_dimension_numbers<[2], [1], [1], [2], [0, 0, 0, 1, 1, 2], [0], [0]>} : vector<4x8x8xf32>, vector<4x8x32xf32>, vector<4x8x32xf32> -> vector<4x8x32xf32>
    "tpu.trace_stop"() : () -> ()
    %80 = vector.shape_cast %79 : vector<4x8x32xf32> to vector<32x32xf32>
    %c0_28 = arith.constant 0 : index
    %c64 = arith.constant 64 : index
    %81 = vector.load %arg8[%c0_28, %c64] : memref<32x128xf32, #tpu.memory_space<vmem>>, vector<32x32xf32>
    tpu.vector_store %arg8[%c0_28, %c64], %80 {strides = array<i32>} : memref<32x128xf32, #tpu.memory_space<vmem>>, vector<32x32xf32>,
    %82 = vector.extract_strided_slice %6 {offsets = [0, 96], sizes = [32, 32], strides = [1, 1]} : vector<32x384xf32> to vector<32x32xf32>
    %83 = vector.shape_cast %82 : vector<32x32xf32> to vector<4x8x32xf32>
    %84 = vector.extract_strided_slice %6 {offsets = [0, 224], sizes = [32, 32], strides = [1, 1]} : vector<32x384xf32> to vector<32x32xf32>
    %85 = vector.shape_cast %84 : vector<32x32xf32> to vector<4x8x32xf32>
    %86 = vector.extract_strided_slice %6 {offsets = [0, 352], sizes = [32, 32], strides = [1, 1]} : vector<32x384xf32> to vector<32x32xf32>
    %87 = vector.shape_cast %86 : vector<32x32xf32> to vector<4x8x32xf32>
    "tpu.trace_start"() <{level = 10 : i32, message = "bnd,bmd->bnm"}> : () -> ()
    %cst_29 = arith.constant dense<0.000000e+00> : vector<4x8x8xf32>
    %88 = tpu.matmul %83, %85, %cst_29 {dimension_numbers = #tpu.dot_dimension_numbers<[2], [2], [1], [1], [0, 0, 0, 1, 1, 1], [0], [0]>} : vector<4x8x32xf32>, vector<4x8x32xf32>, vector<4x8x8xf32> -> vector<4x8x8xf32>
    "tpu.trace_stop"() : () -> ()
    %c3 = arith.constant 3 : index
    %c0_30 = arith.constant 0 : index
    %c0_31 = arith.constant 0 : index
    %89 = vector.load %arg4[%c3, %c0_30, %c0_31] : memref<4x8x8xf32, #tpu.memory_space<vmem>>, vector<1x8x8xf32>
    %90 = vector.shape_cast %89 : vector<1x8x8xf32> to vector<8x8xf32>
    %91 = vector.shape_cast %90 : vector<8x8xf32> to vector<1x8x8xf32>
    %92 = vector.broadcast %91 : vector<1x8x8xf32> to vector<4x8x8xf32>
    %93 = arith.addf %88, %92 : vector<4x8x8xf32>
    %cst_32 = arith.constant dense<0xFF800000> : vector<4x8xf32>
    %94 = vector.multi_reduction <maximumf>, %93, %cst_32 [2] : vector<4x8x8xf32> to vector<4x8xf32>
    %95 = vector.shape_cast %94 : vector<4x8xf32> to vector<4x8x1xf32>
    %96 = vector.broadcast %95 : vector<4x8x1xf32> to vector<4x8x8xf32>
    %97 = arith.subf %93, %96 : vector<4x8x8xf32>
    %98 = math.exp %97 : vector<4x8x8xf32>
    %cst_33 = arith.constant dense<0.000000e+00> : vector<4x8xf32>
    %99 = vector.multi_reduction <add>, %98, %cst_33 [2] : vector<4x8x8xf32> to vector<4x8xf32>
    %100 = vector.shape_cast %99 : vector<4x8xf32> to vector<4x8x1xf32>
    %101 = tpu.reciprocal %100 {approx = true} : vector<4x8x1xf32> -> vector<4x8x1xf32>
    %102 = vector.broadcast %101 : vector<4x8x1xf32> to vector<4x8x8xf32>
    %103 = arith.mulf %98, %102 : vector<4x8x8xf32>
    "tpu.trace_start"() <{level = 10 : i32, message = "bnm,bmd->bnd"}> : () -> ()
    %cst_34 = arith.constant dense<0.000000e+00> : vector<4x8x32xf32>
    %104 = tpu.matmul %103, %87, %cst_34 {dimension_numbers = #tpu.dot_dimension_numbers<[2], [1], [1], [2], [0, 0, 0, 1, 1, 2], [0], [0]>} : vector<4x8x8xf32>, vector<4x8x32xf32>, vector<4x8x32xf32> -> vector<4x8x32xf32>
    "tpu.trace_stop"() : () -> ()
    %105 = vector.shape_cast %104 : vector<4x8x32xf32> to vector<32x32xf32>
    %c0_35 = arith.constant 0 : index
    %c96 = arith.constant 96 : index
    %106 = vector.load %arg8[%c0_35, %c96] : memref<32x128xf32, #tpu.memory_space<vmem>>, vector<32x32xf32>
    tpu.vector_store %arg8[%c0_35, %c96], %105 {strides = array<i32>} : memref<32x128xf32, #tpu.memory_space<vmem>>, vector<32x32xf32>,
    %c0_36 = arith.constant 0 : index
    %c0_37 = arith.constant 0 : index
    %107 = vector.load %arg8[%c0_36, %c0_37] : memref<32x128xf32, #tpu.memory_space<vmem>>, vector<32x128xf32>
    %c0_38 = arith.constant 0 : index
    %c0_39 = arith.constant 0 : index
    %108 = vector.load %arg5[%c0_38, %c0_39] : memref<128x128xf32, #tpu.memory_space<vmem>>, vector<128x128xf32>
    %cst_40 = arith.constant dense<0.000000e+00> : vector<32x128xf32>
    %109 = tpu.matmul %107, %108, %cst_40 {dimension_numbers = #tpu.dot_dimension_numbers<[1], [0], [0], [1], [0, 0, 1, 1], [], []>} : vector<32x128xf32>, vector<128x128xf32>, vector<32x128xf32> -> vector<32x128xf32>
    %c0_41 = arith.constant 0 : index
    %c0_42 = arith.constant 0 : index
    %110 = vector.load %arg6[%c0_41, %c0_42] : memref<1x128xf32, #tpu.memory_space<vmem>>, vector<1x128xf32>
    %111 = vector.broadcast %110 : vector<1x128xf32> to vector<32x128xf32>
    %112 = arith.addf %109, %111 : vector<32x128xf32>
    %113 = vector.shape_cast %112 : vector<32x128xf32> to vector<4x8x128xf32>
    %c0_43 = arith.constant 0 : index
    %c0_44 = arith.constant 0 : index
    %c0_45 = arith.constant 0 : index
    %114 = vector.load %arg7[%c0_43, %c0_44, %c0_45] : memref<4x8x128xf32, #tpu.memory_space<vmem>>, vector<4x8x128xf32>
    tpu.vector_store %arg7[%c0_43, %c0_44, %c0_45], %113 {strides = array<i32>} : memref<4x8x128xf32, #tpu.memory_space<vmem>>, vector<4x8x128xf32>,
    return
  }
  func.func @transform_0(%arg0: i32) -> (i32, i32, i32) {
    %c0_i32 = arith.constant 0 : i32
    %c0_i32_0 = arith.constant 0 : i32
    %c0_i32_1 = arith.constant 0 : i32
    return %arg0, %c0_i32, %c0_i32_0 : i32, i32, i32
  }
  func.func @transform_1(%arg0: i32) -> (i32, i32) {
    %c0_i32 = arith.constant 0 : i32
    %c0_i32_0 = arith.constant 0 : i32
    %c0_i32_1 = arith.constant 0 : i32
    return %c0_i32, %c0_i32_0 : i32, i32
  }
  func.func @transform_2(%arg0: i32) -> (i32, i32) {
    %c0_i32 = arith.constant 0 : i32
    %c0_i32_0 = arith.constant 0 : i32
    %c0_i32_1 = arith.constant 0 : i32
    return %c0_i32, %c0_i32_0 : i32, i32
  }
  func.func @transform_3(%arg0: i32) -> (i32, i32, i32) {
    %c0_i32 = arith.constant 0 : i32
    %c0_i32_0 = arith.constant 0 : i32
    %c0_i32_1 = arith.constant 0 : i32
    %c0_i32_2 = arith.constant 0 : i32
    return %c0_i32, %c0_i32_0, %c0_i32_1 : i32, i32, i32
  }
  func.func @transform_4(%arg0: i32) -> (i32, i32) {
    %c0_i32 = arith.constant 0 : i32
    %c0_i32_0 = arith.constant 0 : i32
    %c0_i32_1 = arith.constant 0 : i32
    return %c0_i32, %c0_i32_0 : i32, i32
  }
  func.func @transform_5(%arg0: i32) -> (i32, i32) {
    %c0_i32 = arith.constant 0 : i32
    %c0_i32_0 = arith.constant 0 : i32
    %c0_i32_1 = arith.constant 0 : i32
    return %c0_i32, %c0_i32_0 : i32, i32
  }
  func.func @transform_6(%arg0: i32) -> (i32, i32, i32) {
    %c0_i32 = arith.constant 0 : i32
    %c0_i32_0 = arith.constant 0 : i32
    %c0_i32_1 = arith.constant 0 : i32
    return %arg0, %c0_i32, %c0_i32_0 : i32, i32, i32
  }
}

module attributes {stable_mosaic.version = 11 : i64} {
  func.func @_ln_mlp_kernel(%arg0: i32, %arg1: memref<32x128xf32, #tpu.memory_space<vmem>>, %arg2: memref<1x128xf32, #tpu.memory_space<vmem>>, %arg3: memref<1x128xf32, #tpu.memory_space<vmem>>, %arg4: memref<128x512xf32, #tpu.memory_space<vmem>>, %arg5: memref<1x512xf32, #tpu.memory_space<vmem>>, %arg6: memref<512x128xf32, #tpu.memory_space<vmem>>, %arg7: memref<1x128xf32, #tpu.memory_space<vmem>>, %arg8: memref<32x128xf32, #tpu.memory_space<vmem>>) attributes {dimension_semantics = [#tpu.dimension_semantics<parallel>], iteration_bounds = array<i64: 4>, scalar_prefetch = 0 : i64, scratch_operands = 0 : i64, tpu.core_type = #tpu.core_type<tc>, window_params = [{transform_indices = @transform_0, window_bounds = array<i64: 32, 128>}, {pipeline_mode = #tpu.pipeline_mode<synchronous>, transform_indices = @transform_1, window_bounds = array<i64: 1, 128>}, {pipeline_mode = #tpu.pipeline_mode<synchronous>, transform_indices = @transform_2, window_bounds = array<i64: 1, 128>}, {pipeline_mode = #tpu.pipeline_mode<synchronous>, transform_indices = @transform_3, window_bounds = array<i64: 128, 512>}, {pipeline_mode = #tpu.pipeline_mode<synchronous>, transform_indices = @transform_4, window_bounds = array<i64: 1, 512>}, {pipeline_mode = #tpu.pipeline_mode<synchronous>, transform_indices = @transform_5, window_bounds = array<i64: 512, 128>}, {pipeline_mode = #tpu.pipeline_mode<synchronous>, transform_indices = @transform_6, window_bounds = array<i64: 1, 128>}, {transform_indices = @transform_7, window_bounds = array<i64: 32, 128>}]} {
    %c0 = arith.constant 0 : index
    %c0_0 = arith.constant 0 : index
    %0 = vector.load %arg1[%c0, %c0_0] : memref<32x128xf32, #tpu.memory_space<vmem>>, vector<32x128xf32>
    %cst = arith.constant dense<0.000000e+00> : vector<32xf32>
    %1 = vector.multi_reduction <add>, %0, %cst [1] : vector<32x128xf32> to vector<32xf32>
    %2 = vector.shape_cast %1 : vector<32xf32> to vector<32x1xf32>
    %cst_1 = arith.constant 1.280000e+02 : f32
    %3 = vector.broadcast %cst_1 : f32 to vector<32x1xf32>
    %4 = arith.divf %2, %3 : vector<32x1xf32>
    %5 = vector.broadcast %4 : vector<32x1xf32> to vector<32x128xf32>
    %6 = arith.subf %0, %5 : vector<32x128xf32>
    %7 = arith.mulf %6, %6 : vector<32x128xf32>
    %cst_2 = arith.constant dense<0.000000e+00> : vector<32xf32>
    %8 = vector.multi_reduction <add>, %7, %cst_2 [1] : vector<32x128xf32> to vector<32xf32>
    %9 = vector.shape_cast %8 : vector<32xf32> to vector<32x1xf32>
    %cst_3 = arith.constant 1.280000e+02 : f32
    %10 = vector.broadcast %cst_3 : f32 to vector<32x1xf32>
    %11 = arith.divf %9, %10 : vector<32x1xf32>
    %cst_4 = arith.constant 9.99999974E-6 : f32
    %12 = vector.broadcast %cst_4 : f32 to vector<32x1xf32>
    %13 = arith.addf %11, %12 : vector<32x1xf32>
    %14 = math.rsqrt %13 : vector<32x1xf32>
    %15 = vector.broadcast %14 : vector<32x1xf32> to vector<32x128xf32>
    %16 = arith.mulf %6, %15 : vector<32x128xf32>
    %c0_5 = arith.constant 0 : index
    %c0_6 = arith.constant 0 : index
    %17 = vector.load %arg2[%c0_5, %c0_6] : memref<1x128xf32, #tpu.memory_space<vmem>>, vector<1x128xf32>
    %18 = vector.broadcast %17 : vector<1x128xf32> to vector<32x128xf32>
    %19 = arith.mulf %16, %18 : vector<32x128xf32>
    %c0_7 = arith.constant 0 : index
    %c0_8 = arith.constant 0 : index
    %20 = vector.load %arg3[%c0_7, %c0_8] : memref<1x128xf32, #tpu.memory_space<vmem>>, vector<1x128xf32>
    %21 = vector.broadcast %20 : vector<1x128xf32> to vector<32x128xf32>
    %22 = arith.addf %19, %21 : vector<32x128xf32>
    %c0_9 = arith.constant 0 : index
    %c0_10 = arith.constant 0 : index
    %23 = vector.load %arg4[%c0_9, %c0_10] : memref<128x512xf32, #tpu.memory_space<vmem>>, vector<128x512xf32>
    %cst_11 = arith.constant dense<0.000000e+00> : vector<32x512xf32>
    %24 = tpu.matmul %22, %23, %cst_11 {dimension_numbers = #tpu.dot_dimension_numbers<[1], [0], [0], [1], [0, 0, 1, 1], [], []>} : vector<32x128xf32>, vector<128x512xf32>, vector<32x512xf32> -> vector<32x512xf32>
    %c0_12 = arith.constant 0 : index
    %c0_13 = arith.constant 0 : index
    %25 = vector.load %arg5[%c0_12, %c0_13] : memref<1x512xf32, #tpu.memory_space<vmem>>, vector<1x512xf32>
    %26 = vector.broadcast %25 : vector<1x512xf32> to vector<32x512xf32>
    %27 = arith.addf %24, %26 : vector<32x512xf32>
    %28 = arith.mulf %27, %27 : vector<32x512xf32>
    %29 = arith.mulf %27, %28 : vector<32x512xf32>
    %cst_14 = arith.constant 4.471500e-02 : f32
    %30 = vector.broadcast %cst_14 : f32 to vector<32x512xf32>
    %31 = arith.mulf %30, %29 : vector<32x512xf32>
    %32 = arith.addf %27, %31 : vector<32x512xf32>
    %cst_15 = arith.constant 0.797884583 : f32
    %33 = vector.broadcast %cst_15 : f32 to vector<32x512xf32>
    %34 = arith.mulf %33, %32 : vector<32x512xf32>
    %35 = math.tanh %34 : vector<32x512xf32>
    %cst_16 = arith.constant 1.000000e+00 : f32
    %36 = vector.broadcast %cst_16 : f32 to vector<32x512xf32>
    %37 = arith.addf %36, %35 : vector<32x512xf32>
    %cst_17 = arith.constant 5.000000e-01 : f32
    %38 = vector.broadcast %cst_17 : f32 to vector<32x512xf32>
    %39 = arith.mulf %38, %37 : vector<32x512xf32>
    %40 = arith.mulf %27, %39 : vector<32x512xf32>
    %c0_18 = arith.constant 0 : index
    %c0_19 = arith.constant 0 : index
    %41 = vector.load %arg6[%c0_18, %c0_19] : memref<512x128xf32, #tpu.memory_space<vmem>>, vector<512x128xf32>
    %cst_20 = arith.constant dense<0.000000e+00> : vector<32x128xf32>
    %42 = tpu.matmul %40, %41, %cst_20 {dimension_numbers = #tpu.dot_dimension_numbers<[1], [0], [0], [1], [0, 0, 1, 1], [], []>} : vector<32x512xf32>, vector<512x128xf32>, vector<32x128xf32> -> vector<32x128xf32>
    %c0_21 = arith.constant 0 : index
    %c0_22 = arith.constant 0 : index
    %43 = vector.load %arg7[%c0_21, %c0_22] : memref<1x128xf32, #tpu.memory_space<vmem>>, vector<1x128xf32>
    %44 = vector.broadcast %43 : vector<1x128xf32> to vector<32x128xf32>
    %45 = arith.addf %42, %44 : vector<32x128xf32>
    %c0_23 = arith.constant 0 : index
    %c0_24 = arith.constant 0 : index
    %46 = vector.load %arg1[%c0_23, %c0_24] : memref<32x128xf32, #tpu.memory_space<vmem>>, vector<32x128xf32>
    %47 = arith.addf %46, %45 : vector<32x128xf32>
    %c0_25 = arith.constant 0 : index
    %c0_26 = arith.constant 0 : index
    %48 = vector.load %arg8[%c0_25, %c0_26] : memref<32x128xf32, #tpu.memory_space<vmem>>, vector<32x128xf32>
    tpu.vector_store %arg8[%c0_25, %c0_26], %47 {strides = array<i32>} : memref<32x128xf32, #tpu.memory_space<vmem>>, vector<32x128xf32>,
    return
  }
  func.func @transform_0(%arg0: i32) -> (i32, i32) {
    %c0_i32 = arith.constant 0 : i32
    %c0_i32_0 = arith.constant 0 : i32
    return %arg0, %c0_i32 : i32, i32
  }
  func.func @transform_1(%arg0: i32) -> (i32, i32) {
    %c0_i32 = arith.constant 0 : i32
    %c0_i32_0 = arith.constant 0 : i32
    %c0_i32_1 = arith.constant 0 : i32
    return %c0_i32, %c0_i32_0 : i32, i32
  }
  func.func @transform_2(%arg0: i32) -> (i32, i32) {
    %c0_i32 = arith.constant 0 : i32
    %c0_i32_0 = arith.constant 0 : i32
    %c0_i32_1 = arith.constant 0 : i32
    return %c0_i32, %c0_i32_0 : i32, i32
  }
  func.func @transform_3(%arg0: i32) -> (i32, i32) {
    %c0_i32 = arith.constant 0 : i32
    %c0_i32_0 = arith.constant 0 : i32
    %c0_i32_1 = arith.constant 0 : i32
    return %c0_i32, %c0_i32_0 : i32, i32
  }
  func.func @transform_4(%arg0: i32) -> (i32, i32) {
    %c0_i32 = arith.constant 0 : i32
    %c0_i32_0 = arith.constant 0 : i32
    %c0_i32_1 = arith.constant 0 : i32
    return %c0_i32, %c0_i32_0 : i32, i32
  }
  func.func @transform_5(%arg0: i32) -> (i32, i32) {
    %c0_i32 = arith.constant 0 : i32
    %c0_i32_0 = arith.constant 0 : i32
    %c0_i32_1 = arith.constant 0 : i32
    return %c0_i32, %c0_i32_0 : i32, i32
  }
  func.func @transform_6(%arg0: i32) -> (i32, i32) {
    %c0_i32 = arith.constant 0 : i32
    %c0_i32_0 = arith.constant 0 : i32
    %c0_i32_1 = arith.constant 0 : i32
    return %c0_i32, %c0_i32_0 : i32, i32
  }
  func.func @transform_7(%arg0: i32) -> (i32, i32) {
    %c0_i32 = arith.constant 0 : i32
    %c0_i32_0 = arith.constant 0 : i32
    return %arg0, %c0_i32 : i32, i32
  }
}

</mosaic_0001>

<bundles_post_ra>
// kernel: mul.27
= control target key start
LH: loop header
LB: loop body
LE: loop exit
PB: predicated region body
PF: predicated region fallthrough
CT: control target
= control target key end

     0   :  { %3 = vsyncpa [#allocation1], 0  ;;  %s126_s0 = inlined_call_operand.hbm [shape: f32[384], index: 0, kind: input, shape index: {}]   ;;  %s127_s1 = inlined_call_operand.hbm [shape: f32[384], index: 1, kind: input, shape index: {}]   ;;  %s128_s2 = inlined_call_operand.vmem [shape: f32[384], index: 2, kind: output, shape index: {}]  }
   0x1   :  { %4 = vsyncpa [#allocation3], 0  ;;  %s82_s9 = smov [#allocation0]   ;;  %s83_s11 = smov [#allocation2]  }
   0x2   :  { %s9_s10 = sshll.u32 %s82_s9, 4  ;;  %s17_s12 = sshll.u32 %s83_s11, 4  ;;  %s10_s10 = int_to_ptr.vmem [resolvable:$true] %s9_s10  ;;  %s18_s12 = int_to_ptr.vmem [resolvable:$true] %s17_s12 }
   0x3   :  { %s34_s15 = scalar_lea.hbm %s126_s0, 64 }
   0x4   :  { %p35_p0 = scmp.ne.s32.totalorder %s126_s0, %s34_s15  ;;  %p38_p1 = scmp.lt.u32.totalorder %s34_s15, %s126_s0 }
   0x6   :  { %p40_p2 = pnand %p38_p1, %p35_p0 }
   0x8   :  { %43 = shalt.err (!%p40_p2)
}
   0x9   :  { %s44_s20 = scalar_lea.vmem %s10_s10, 64  ;;  %p49_p4 = scmp.lt.s32.totalorder %s10_s10, %s10_s10 }
   0xa   :  { %p45_p3 = scmp.ne.s32.totalorder %s10_s10, %s44_s20  ;;  %p50_p5 = scmp.lt.s32.totalorder %s44_s20, %s44_s20 }
   0xc   :  { %p51_p6 = por %p50_p5, %p49_p4 }
   0xe   :  { %p52_p7 = pnand %p51_p6, %p45_p3 }
  0x10   :  { %55 = shalt.err (!%p52_p7)
}
  0x11   :  { %12 = dma.hbm_to_vmem [thread:$0]  %s126_s0, 64, %s10_s10, [#allocation1]  }
  0x12   :  { %s56_s24 = scalar_lea.hbm %s127_s1, 64 }
  0x13   :  { %p57_p8 = scmp.ne.s32.totalorder %s127_s1, %s56_s24  ;;  %p60_p9 = scmp.lt.u32.totalorder %s56_s24, %s127_s1 }
  0x15   :  { %p62_p10 = pnand %p60_p9, %p57_p8 }
  0x17   :  { %65 = shalt.err (!%p62_p10)
}
  0x18   :  { %s66_s29 = scalar_lea.vmem %s18_s12, 64  ;;  %p71_p12 = scmp.lt.s32.totalorder %s18_s12, %s18_s12 }
  0x19   :  { %p67_p11 = scmp.ne.s32.totalorder %s18_s12, %s66_s29  ;;  %p72_p13 = scmp.lt.s32.totalorder %s66_s29, %s66_s29 }
  0x1b   :  { %p73_p0 = por %p72_p13, %p71_p12 }
  0x1d   :  { %p74_p1 = pnand %p73_p0, %p67_p11 }
  0x1f   :  { %77 = shalt.err (!%p74_p1)
}
  0x20   :  { %20 = dma.hbm_to_vmem [thread:$0]  %s127_s1, 64, %s18_s12, [#allocation3]  }
  0x21   :  { %78 = dma.done.wait [#allocation1], 64  }
  0x22   :  { %79 = vsyncadd [#allocation1], 4294967232 }
  0x23   :  { %80 = dma.done.wait [#allocation3], 64  }
  0x24   :  { %81 = vsyncadd [#allocation3], 4294967232  ;;  %v23_v0 = vld [vmem:[#allocation0] sm:$0x7]  ;;  %v24_v1 = vld [vmem:[#allocation2] sm:$0x7] }
  0x25   :  { %v27_v2 = vmul.f32 %v24_v1, %v23_v0 }
  0x27   :  { %29 = vst [vmem:[%s128_s2] sm:$0xf] %v27_v2 }
  0x28   :  { %30 = vsyncpa [#allocation1], 1 }
  0x29   :  { %31 = vsyncpa [#allocation3], 1 }

// kernel: spatial_block_forward.3
= control target key start
LH: loop header
LB: loop body
LE: loop exit
PB: predicated region body
PF: predicated region fallthrough
CT: control target
= control target key end

     0   :  { %12 = vsyncpa [#allocation3], 0  ;;  %s2201_s0 = inlined_call_operand.vmem [shape: f32[128,128], index: 0, kind: input, shape index: {}]   ;;  %s2202_s1 = inlined_call_operand.vmem [shape: f32[1,128], index: 1, kind: input, shape index: {}]   ;;  %s2203_s2 = inlined_call_operand.vmem [shape: f32[1,128], index: 2, kind: input, shape index: {}]   ;;  %s2204_s3 = inlined_call_operand.vmem [shape: f32[128,512], index: 3, kind: input, shape index: {}]   ;;  %s2205_s4 = inlined_call_operand.vmem [shape: f32[1,512], index: 4, kind: input, shape index: {}]   ;;  %s2206_s5 = inlined_call_operand.vmem [shape: f32[512,128], index: 5, kind: input, shape index: {}]   ;;  %s2207_s6 = inlined_call_operand.vmem [shape: f32[1,128], index: 6, kind: input, shape index: {}]   ;;  %s2208_s7 = inlined_call_operand.hbm [shape: f32[128,128], index: 7, kind: output, shape index: {}]  }
   0x1   :  { %14 = vsyncpa [#allocation3 + $0x1], 0  ;;  %s1510_s24 = smov 0   ;;  %s1512_s25 = smov 0  }
   0x2   :  { %s1514_s26 = smov 0   ;;  %s1516_s27 = smov 0  }
   0x3 LB: > { %s1531_s28 = sadd.s32 4294967295, %s1464_s27   ;;  %s1084_s29 = sadd.s32 4294967294, %s1464_s27   ;;  %s1464_s27 = sphi %s1516_s27, %s2214_s27   ;;  %s1460_s26 = sphi %s1514_s26, %s2213_s26   ;;  %s1456_s25 = sphi %s1512_s25, %s2212_s25   ;;  %s1452_s24 = sphi %s1510_s24, %s2211_s24  }
   0x4   : > { %s1535_s30 = sadd.s32 1, %s1464_s27   ;;  %s179_s8 = sadd.s32 1, %s1460_s26 }
   0x5   : > { %s176_s9 = ssub.s32 %s1464_s27, %s1535_s30  ;;  %p189_p0 = scmp.ne.s32.totalorder %s1460_s26, %s1456_s25 }
   0x6   : > { %p177_p1 = scmp.eq.s32.totalorder %s176_s9, 0  ;;  %p190_p2 = scmp.eq.s32.totalorder %s1531_s28, 3 }
   0x7   : > { %p195_p3 = scmp.ne.s32.totalorder %s1456_s25, %s1452_s24  ;;  %p196_p4 = scmp.eq.s32.totalorder %s1084_s29, 3 }
   0x8   : > { %s1546_s10 = scalar_select %p177_p1, %s1460_s26, %s179_s8  }
   0x9   : > { %p1548_p5 = por %p190_p2, %p189_p0  ;;  %p1552_p6 = por %p196_p4, %p195_p3 }
   0xa   : > { %p1087_p7 = scmp.ge.s32.totalorder %s1464_s27, 1  ;;  %p241_p8 = scmp.lt.s32.totalorder %s1464_s27, 5 }
   0xc   : > { %p242_p9 = pnand %p1087_p7, %p241_p8 }
   0xd   : > { %s1089_s13 = sshll.u32 (!%p242_p9), %s1531_s28, 2  ;;  %v352_v4 = vld [vmem:[%s2204_s3 + $0x8] sm:$0xff] (!%p242_p9)  ;;  %v354_v6 = vld [vmem:[%s2204_s3 + $0x18] sm:$0xff] (!%p242_p9)  ;;  %v351_v9 = vld [vmem:[%s2204_s3] sm:$0xff] (!%p242_p9)  ;;  %s270_s22 = sand.u32 (!%p242_p9), 1, %s1456_s25  }
   0xe   : > { %245 = sbr.rel (%p242_p9) target bundleno = 835 (0x343), region = 48  ;;  %p274_p10 = scmp.lt.s32.totalorder (!%p242_p9), %s1089_s13, 15  ;;  %v356_v5 = vld [vmem:[%s2204_s3 + $0x28] sm:$0xff] (!%p242_p9)  ;;  %v358_v8 = vld [vmem:[%s2204_s3 + $0x38] sm:$0xff] (!%p242_p9)  ;;  %v355_v10 = vld [vmem:[%s2204_s3 + $0x20] sm:$0xff] (!%p242_p9) }
   0xf   : > { %v1188_v7 = vpack.c.bf16 (!%p242_p9), %v356_v5, %v352_v4  ;;  %v1220_v11 = vpack.c.bf16 (!%p242_p9), %v358_v8, %v354_v6  ;;  %v1190_v12 = vpack.c.bf16 (!%p242_p9), %v355_v10, %v351_v9  ;;  %v353_v13 = vld [vmem:[%s2204_s3 + $0x10] sm:$0xff] (!%p242_p9)  ;;  %v360_v15 = vld [vmem:[%s2204_s3 + $0x48] sm:$0xff] (!%p242_p9)  ;;  %v362_v18 = vld [vmem:[%s2204_s3 + $0x58] sm:$0xff] (!%p242_p9)  ;;  %s1088_s23 = sshll.u32 (!%p242_p9), %s270_s22, 5  ;;  %s1099_s9 = sshll.u32 (!%p242_p9), %s1531_s28, 9 }
  0x10   : > { %v357_v14 = vld [vmem:[%s2204_s3 + $0x30] sm:$0xff] (!%p242_p9)  ;;  %v364_v17 = vld [vmem:[%s2204_s3 + $0x68] sm:$0xff] (!%p242_p9)  ;;  %v366_v19 = vld [vmem:[%s2204_s3 + $0x78] sm:$0xff] (!%p242_p9)  ;;  %s2140_s29 = scalar_lea.vmem (!%p242_p9), [#allocation2], %s1088_s23  ;;  %s2155_s15 = scalar_lea.hbm (!%p242_p9), %s2208_s7, %s1099_s9 }
  0x11   : > { %1189 = vmatprep.subr.bf16.mxu0 (!%p242_p9), %v1188_v7  ;;  %v1222_v16 = vpack.c.bf16 (!%p242_p9), %v357_v14, %v353_v13  ;;  %1221 = vmatprep.subr.bf16.mxu1 (!%p242_p9), %v1220_v11  ;;  %v1192_v20 = vpack.c.bf16 (!%p242_p9), %v364_v17, %v360_v15  ;;  %v1224_v21 = vpack.c.bf16 (!%p242_p9), %v366_v19, %v362_v18  ;;  %v359_v22 = vld [vmem:[%s2204_s3 + $0x40] sm:$0xff] (!%p242_p9)  ;;  %v361_v24 = vld [vmem:[%s2204_s3 + $0x50] sm:$0xff] (!%p242_p9)  ;;  %v368_v27 = vld [vmem:[%s2204_s3 + $0x88] sm:$0xff] (!%p242_p9)  ;;  %s1022_s8 = sshll.u32 (!%p242_p9), %s2140_s29, 4  ;;  %s2160_s16 = scalar_lea.sflag (!%p242_p9), [#allocation3], %s270_s22  ;;  %s2149_s8 = int_to_ptr.vmem [resolvable:$true] %s1022_s8 }
  0x12   : > { %1191 = vmatpush1.bf16.msra.mxu0 (!%p242_p9), %v1190_v12  ;;  %v363_v23 = vld [vmem:[%s2204_s3 + $0x60] sm:$0xff] (!%p242_p9)  ;;  %v365_v26 = vld [vmem:[%s2204_s3 + $0x70] sm:$0xff] (!%p242_p9)  ;;  %v372_v28 = vld [vmem:[%s2204_s3 + $0xa8] sm:$0xff] (!%p242_p9)  ;;  %s1402_s18 = scalar_lea.vmem (!%p242_p9), %s2149_s8, 512  ;;  %s1467_s28 = smov (!%p242_p9), [#allocation2]  }
  0x13   : > { %1223 = vmatpush1.bf16.msra.mxu1 (!%p242_p9), %v1222_v16  ;;  %v1194_v25 = vpack.c.bf16 (!%p242_p9), %v363_v23, %v359_v22  ;;  %1193 = vmatprep.subr.bf16.mxu0 (!%p242_p9), %v1192_v20  ;;  %v1226_v29 = vpack.c.bf16 (!%p242_p9), %v365_v26, %v361_v24  ;;  %v1196_v30 = vpack.c.bf16 (!%p242_p9), %v372_v28, %v368_v27  ;;  %v370_v31 = vld [vmem:[%s2204_s3 + $0x98] sm:$0xff] (!%p242_p9)  ;;  %v367_v33 = vld [vmem:[%s2204_s3 + $0x80] sm:$0xff] (!%p242_p9)  ;;  %v369_v36 = vld [vmem:[%s2204_s3 + $0x90] sm:$0xff] (!%p242_p9)  ;;  %p1403_p11 = scmp.ne.s32.totalorder (!%p242_p9), %s2149_s8, %s1402_s18  ;;  %s1406_s19 = sshll.u32 (!%p242_p9), %s1467_s28, 4  ;;  %s1407_s19 = int_to_ptr.vmem [resolvable:$false] %s1406_s19 }
  0x14   : > { %1225 = vmatprep.subr.bf16.mxu1 (!%p242_p9), %v1224_v21  ;;  %v374_v32 = vld [vmem:[%s2204_s3 + $0xb8] sm:$0xff] (!%p242_p9)  ;;  %v371_v35 = vld [vmem:[%s2204_s3 + $0xa0] sm:$0xff] (!%p242_p9)  ;;  %v373_v37 = vld [vmem:[%s2204_s3 + $0xb0] sm:$0xff] (!%p242_p9)  ;;  %s1408_s20 = scalar_lea.vmem (!%p242_p9), %s1407_s19, 1024  ;;  %p1409_p0 = scmp.lt.s32.totalorder (!%p242_p9), %s2149_s8, %s1407_s19 }
  0x15   : > { %s2216_s13 = smov (!%p274_p10, %s1089_s13), 15  ;;  %v1228_v34 = vpack.c.bf16 %v374_v32, %v370_v31  ;;  %v1198_v38 = vpack.c.bf16 %v371_v35, %v367_v33  ;;  %v1230_v39 = vpack.c.bf16 %v373_v37, %v369_v36  ;;  %v376_v56 = vld [vmem:[%s2204_s3 + $0xc8] sm:$0xff]  ;;  %v378_v58 = vld [vmem:[%s2204_s3 + $0xd8] sm:$0xff]  ;;  %v375_v61 = vld [vmem:[%s2204_s3 + $0xc0] sm:$0xff]  ;;  %p1404_p12 = pnand %p1403_p11, %p1548_p5 }
  0x16   : > { %s1090_s14 = sshll.u32 %s2216_s13, 3  ;;  %1195 = vmatpush1.bf16.msra.mxu0 %v1194_v25  ;;  %v380_v57 = vld [vmem:[%s2204_s3 + $0xe8] sm:$0xff]  ;;  %v382_v60 = vld [vmem:[%s2204_s3 + $0xf8] sm:$0xff]  ;;  %v379_v62 = vld [vmem:[%s2204_s3 + $0xe0] sm:$0xff]  ;;  %p1410_p1 = scmp.lt.s32.totalorder %s1408_s20, %s1402_s18 }
  0x17   : > { %s1562_s17 = scalar_lea.vmem %s2201_s0, %s1090_s14  ;;  %1227 = vmatpush1.bf16.msra.mxu1 %v1226_v29  ;;  %1197 = vmatprep.subr.bf16.mxu0 %v1196_v30  ;;  %v1200_v59 = vpack.c.bf16 %v380_v57, %v376_v56  ;;  %v1232_v63 = vpack.c.bf16 %v382_v60, %v378_v58  ;;  %v384_v4 = vld [vmem:[%s2204_s3 + $0x108] sm:$0xff]  ;;  %v386_v6 = vld [vmem:[%s2204_s3 + $0x118] sm:$0xff]  ;;  %v383_v9 = vld [vmem:[%s2204_s3 + $0x100] sm:$0xff]  ;;  %p1405_p13 = pneg %p1404_p12 }
  0x18   : > { %v280_v0 = vld [vmem:[%s1562_s17] sm:$0xff]  ;;  %v282_v1 = vld [vmem:[%s1562_s17 + $0x10] sm:$0xff]  ;;  %v1567_v2 = vld [vmem:[%s1562_s17 + $0x8] sm:$0xff]  ;;  %1229 = vmatprep.subr.bf16.mxu1 %v1228_v34  ;;  %p1411_p2 = por %p1410_p1, %p1409_p0 }
  0x19   : > { %284 = vadd.xlane.f32.xlu0 %v280_v0  ;;  %288 = vadd.xlane.f32.xlu1 %v282_v1  ;;  %v1570_v3 = vld [vmem:[%s1562_s17 + $0x18] sm:$0xff]  ;;  %v388_v5 = vld [vmem:[%s2204_s3 + $0x128] sm:$0xff]  ;;  %v387_v10 = vld [vmem:[%s2204_s3 + $0x120] sm:$0xff] }
  0x1a   : > { %1199 = vmatpush1.bf16.msra.mxu0 %v1198_v38  ;;  %v1204_v7 = vpack.c.bf16 %v388_v5, %v384_v4  ;;  %v390_v8 = vld [vmem:[%s2204_s3 + $0x138] sm:$0xff]  ;;  %v1206_v12 = vpack.c.bf16 %v387_v10, %v383_v9  ;;  %v385_v13 = vld [vmem:[%s2204_s3 + $0x110] sm:$0xff]  ;;  %v392_v16 = vld [vmem:[%s2204_s3 + $0x148] sm:$0xff]  ;;  %p1412_p3 = pnand %p1411_p2, %p1405_p13 }
  0x1b   : > { %1231 = vmatpush1.bf16.msra.mxu1 %v1230_v39  ;;  %1201 = vmatprep.subr.bf16.mxu0 %v1200_v59  ;;  %v1236_v11 = vpack.c.bf16 %v390_v8, %v386_v6  ;;  %v389_v14 = vld [vmem:[%s2204_s3 + $0x130] sm:$0xff]  ;;  %v396_v17 = vld [vmem:[%s2204_s3 + $0x168] sm:$0xff]  ;;  %v394_v18 = vld [vmem:[%s2204_s3 + $0x158] sm:$0xff] }
  0x1c   : > { %1233 = vmatprep.subr.bf16.mxu1 %v1232_v63  ;;  %v1238_v15 = vpack.c.bf16 %v389_v14, %v385_v13  ;;  %v1208_v19 = vpack.c.bf16 %v396_v17, %v392_v16  ;;  %v398_v20 = vld [vmem:[%s2204_s3 + $0x178] sm:$0xff]  ;;  %v391_v21 = vld [vmem:[%s2204_s3 + $0x140] sm:$0xff]  ;;  %v393_v25 = vld [vmem:[%s2204_s3 + $0x150] sm:$0xff] }
  0x1d   : > { %286 = vadd.xlane.f32.xlu0 %v1567_v2  ;;  %290 = vadd.xlane.f32.xlu1 %v1570_v3  ;;  %v395_v22 = vld [vmem:[%s2204_s3 + $0x160] sm:$0xff]  ;;  %v1240_v23 = vpack.c.bf16 %v398_v20, %v394_v18  ;;  %v397_v26 = vld [vmem:[%s2204_s3 + $0x170] sm:$0xff]  ;;  %v400_v28 = vld [vmem:[%s2204_s3 + $0x188] sm:$0xff] }
  0x1e   : > { %v1210_v24 = vpack.c.bf16 %v395_v22, %v391_v21  ;;  %v1242_v27 = vpack.c.bf16 %v397_v26, %v393_v25  ;;  %v404_v29 = vld [vmem:[%s2204_s3 + $0x1a8] sm:$0xff]  ;;  %v402_v30 = vld [vmem:[%s2204_s3 + $0x198] sm:$0xff]  ;;  %v399_v33 = vld [vmem:[%s2204_s3 + $0x180] sm:$0xff] }
  0x1f   : > { %v1212_v31 = vpack.c.bf16 %v404_v29, %v400_v28  ;;  %v406_v32 = vld [vmem:[%s2204_s3 + $0x1b8] sm:$0xff]  ;;  %v403_v34 = vld [vmem:[%s2204_s3 + $0x1a0] sm:$0xff]  ;;  %v401_v37 = vld [vmem:[%s2204_s3 + $0x190] sm:$0xff] }
  0x20   : > { %v1244_v35 = vpack.c.bf16 %v406_v32, %v402_v30  ;;  %v1214_v36 = vpack.c.bf16 %v403_v34, %v399_v33  ;;  %v405_v38 = vld [vmem:[%s2204_s3 + $0x1b0] sm:$0xff]  ;;  %v408_v39 = vld [vmem:[%s2204_s3 + $0x1c8] sm:$0xff]  ;;  %v1091_v6 = vld [vmem:[%s2202_s1] ss:$0 sm:$0xff] }
  0x21   : > { %v1092_v8 = vld [vmem:[%s2203_s2] ss:$0 sm:$0xff]  ;;  %v776_v20 = vld [vmem:[%s2206_s5 + $0x88] sm:$0xff]  ;;  %v778_v32 = vld [vmem:[%s2206_s5 + $0x98] sm:$0xff] }
  0x22   : > { %v807_v21 = vld [vmem:[%s2206_s5 + $0x180] sm:$0xff]  ;;  %v760_v25 = vld [vmem:[%s2206_s5 + $0x8] sm:$0xff]  ;;  %v809_v33 = vld [vmem:[%s2206_s5 + $0x190] sm:$0xff] }
  0x23   : > { %v791_v28 = vld [vmem:[%s2206_s5 + $0x100] sm:$0xff]  ;;  %v792_v29 = vld [vmem:[%s2206_s5 + $0x108] sm:$0xff] }
  0x24   : > { %v1286_v30 = vpack.c.bf16 %v792_v29, %v791_v28  ;;  %v788_v28 = vld [vmem:[%s2206_s5 + $0xe8] sm:$0xff]  ;;  %v819_v29 = vld [vmem:[%s2206_s5 + $0x1e0] sm:$0xff] }
  0xa6   : > { %v285_v40 = vpop.xlane.xlu0 %284  ;;  %v289_v41 = vpop.xlane.xlu1 %288 }
  0xa7   : > { %v293_v42 = vmul.f32 0.0078125, %v285_v40  ;;  %v295_v43 = vmul.f32 0.0078125, %v289_v41  ;;  %v1466_v40 = vmov 0.0   ;;  %v1246_v41 = vpack.c.bf16 %v405_v38, %v401_v37  ;;  %v762_v37 = vld [vmem:[%s2206_s5 + $0x18] sm:$0xff] }
  0xa8   : > { %501 = vmatprep.mubr.f32.mxu0 %v1466_v40  ;;  %590 = vmatprep.mubr.f32.mxu1 %v1466_v40 }
  0xa9   : > { %v1646_v44 = vsub.f32 %v280_v0, %v293_v42  ;;  %v1648_v45 = vsub.f32 %v282_v1, %v295_v43  ;;  %v1202_v0 = vpack.c.bf16 %v379_v62, %v375_v61  ;;  %v377_v1 = vld [vmem:[%s2204_s3 + $0xd0] sm:$0xff]  ;;  %v412_v42 = vld [vmem:[%s2204_s3 + $0x1e8] sm:$0xff]  ;;  %v410_v43 = vld [vmem:[%s2204_s3 + $0x1d8] sm:$0xff] }
  0xaa   : > { %v287_v46 = vpop.xlane.xlu0 %286  ;;  %v291_v47 = vpop.xlane.xlu1 %290 }
  0xab   : > { %v294_v48 = vmul.f32 0.0078125, %v287_v46  ;;  %v301_v49 = vmul.f32 %v1646_v44, %v1646_v44  ;;  %v296_v50 = vmul.f32 0.0078125, %v291_v47  ;;  %v303_v53 = vmul.f32 %v1648_v45, %v1648_v45  ;;  %1203 = vmatpush1.bf16.msra.mxu0 %v1202_v0  ;;  %v414_v46 = vld [vmem:[%s2204_s3 + $0x1f8] sm:$0xff] }
  0xac   : > { %1205 = vmatprep.subr.bf16.mxu0 %v1204_v7  ;;  %v1216_v47 = vpack.c.bf16 %v412_v42, %v408_v39 }
  0xad   : > { %v1653_v51 = vsub.f32 %v1567_v2, %v294_v48  ;;  %305 = vadd.xlane.f32.xlu0 %v301_v49  ;;  %v1656_v52 = vsub.f32 %v1570_v3, %v296_v50  ;;  %v381_v2 = vld [vmem:[%s2204_s3 + $0xf0] sm:$0xff]  ;;  %v1248_v48 = vpack.c.bf16 %v414_v46, %v410_v43  ;;  %v407_v49 = vld [vmem:[%s2204_s3 + $0x1c0] sm:$0xff]  ;;  %v780_v46 = vld [vmem:[%s2206_s5 + $0xa8] sm:$0xff] }
  0xae   : > { %v1234_v3 = vpack.c.bf16 %v381_v2, %v377_v1  ;;  %v411_v50 = vld [vmem:[%s2204_s3 + $0x1e0] sm:$0xff] }
  0xaf   : > { %v302_v54 = vmul.f32 %v1653_v51, %v1653_v51  ;;  %v304_v55 = vmul.f32 %v1656_v52, %v1656_v52  ;;  %1207 = vmatpush1.bf16.msra.mxu0 %v1206_v12  ;;  %v779_v43 = vld [vmem:[%s2206_s5 + $0xa0] sm:$0xff] }
  0xb0   : > { %1235 = vmatpush1.bf16.msra.mxu1 %v1234_v3  ;;  %1209 = vmatprep.subr.bf16.mxu0 %v1208_v19 }
  0xb1   : > { %309 = vadd.xlane.f32.xlu0 %v303_v53  ;;  %307 = vadd.xlane.f32.xlu1 %v302_v54  ;;  %v409_v53 = vld [vmem:[%s2204_s3 + $0x1d0] sm:$0xff]  ;;  %v1218_v54 = vpack.c.bf16 %v411_v50, %v407_v49  ;;  %v812_v49 = vld [vmem:[%s2206_s5 + $0x1a8] sm:$0xff] }
  0xb2   : > { %1237 = vmatprep.subr.bf16.mxu1 %v1236_v11 }
  0xb3   : > { %1211 = vmatpush1.bf16.msra.mxu0 %v1210_v24  ;;  %v759_v24 = vld [vmem:[%s2206_s5] sm:$0xff] }
  0xb4   : > { %1239 = vmatpush1.bf16.msra.mxu1 %v1238_v15  ;;  %1213 = vmatprep.subr.bf16.mxu0 %v1212_v31  ;;  %v777_v31 = vld [vmem:[%s2206_s5 + $0x90] sm:$0xff] }
  0xb5   : > { %311 = vadd.xlane.f32.xlu1 %v304_v55  ;;  %1241 = vmatprep.subr.bf16.mxu1 %v1240_v23  ;;  %v413_v55 = vld [vmem:[%s2204_s3 + $0x1f0] sm:$0xff]  ;;  %v808_v23 = vld [vmem:[%s2206_s5 + $0x188] sm:$0xff]  ;;  %v1256_v34 = vpack.c.bf16 %v778_v32, %v777_v31  ;;  %v771_v32 = vld [vmem:[%s2206_s5 + $0x60] sm:$0xff] }
  0xb6   : > { %v1250_v56 = vpack.c.bf16 %v413_v55, %v409_v53  ;;  %v1284_v26 = vpack.c.bf16 %v808_v23, %v807_v21  ;;  %v763_v53 = vld [vmem:[%s2206_s5 + $0x20] sm:$0xff]  ;;  %v770_v21 = vld [vmem:[%s2206_s5 + $0x58] sm:$0xff]  ;;  %v820_v31 = vld [vmem:[%s2206_s5 + $0x1e8] sm:$0xff] }
  0xb7   : > { %1215 = vmatpush1.bf16.msra.mxu0 %v1214_v36  ;;  %v761_v36 = vld [vmem:[%s2206_s5 + $0x10] sm:$0xff]  ;;  %v795_v55 = vld [vmem:[%s2206_s5 + $0x120] sm:$0xff] }
  0xb8   : > { %1243 = vmatpush1.bf16.msra.mxu1 %v1242_v27  ;;  %1217 = vmatprep.subr.bf16.mxu0 %v1216_v47  ;;  %v1254_v27 = vpack.c.bf16 %v760_v25, %v759_v24  ;;  %v1258_v39 = vpack.c.bf16 %v762_v37, %v761_v36  ;;  %v811_v47 = vld [vmem:[%s2206_s5 + $0x1a0] sm:$0xff]  ;;  %v801_v24 = vld [vmem:[%s2206_s5 + $0x150] sm:$0xff]  ;;  %v802_v25 = vld [vmem:[%s2206_s5 + $0x158] sm:$0xff] }
  0xb9   : > { %1245 = vmatprep.subr.bf16.mxu1 %v1244_v35  ;;  %v810_v35 = vld [vmem:[%s2206_s5 + $0x198] sm:$0xff]  ;;  %v1292_v50 = vpack.c.bf16 %v812_v49, %v811_v47  ;;  %v803_v36 = vld [vmem:[%s2206_s5 + $0x160] sm:$0xff]  ;;  %v804_v37 = vld [vmem:[%s2206_s5 + $0x168] sm:$0xff] }
  0xba   : > { %v1288_v38 = vpack.c.bf16 %v810_v35, %v809_v33  ;;  %v772_v33 = vld [vmem:[%s2206_s5 + $0x68] sm:$0xff]  ;;  %v774_v47 = vld [vmem:[%s2206_s5 + $0x78] sm:$0xff] }
  0xbb   : > { %1219 = vmatpush1.bf16.msra.mxu0 %v1218_v54  ;;  %v764_v54 = vld [vmem:[%s2206_s5 + $0x28] sm:$0xff]  ;;  %v1278_v35 = vpack.c.bf16 %v772_v33, %v771_v32 }
  0xbc   : > { %1247 = vmatpush1.bf16.msra.mxu1 %v1246_v41  ;;  %v794_v41 = vld [vmem:[%s2206_s5 + $0x118] sm:$0xff] }
  0xbd   : > { %1249 = vmatprep.subr.bf16.mxu1 %v1248_v48  ;;  %v1260_v48 = vpack.c.bf16 %v780_v46, %v779_v43  ;;  %v822_v43 = vld [vmem:[%s2206_s5 + $0x1f8] sm:$0xff]  ;;  %v773_v46 = vld [vmem:[%s2206_s5 + $0x70] sm:$0xff] }
  0xbe   : > { %v1282_v49 = vpack.c.bf16 %v774_v47, %v773_v46 }
  0xc0   : > { %1251 = vmatpush1.bf16.msra.mxu1 %v1250_v56  ;;  %v1262_v56 = vpack.c.bf16 %v764_v54, %v763_v53  ;;  %v806_v53 = vld [vmem:[%s2206_s5 + $0x178] sm:$0xff] }
  0xc1   : > { %1285 = vmatprep.subr.bf16.mxu1 %v1284_v26  ;;  %v1306_v26 = vpack.c.bf16 %v802_v25, %v801_v24 }
 0x13a   : > { %v306_v57 = vpop.xlane.xlu0 %305 }
 0x13b   : > { %v313_v58 = vmul.f32 0.0078125, %v306_v57  ;;  %v796_v57 = vld [vmem:[%s2206_s5 + $0x128] sm:$0xff] }
 0x13d   : > { %v317_v59 = vadd.f32 1e-05, %v313_v58  ;;  %v1294_v58 = vpack.c.bf16 %v796_v57, %v795_v55  ;;  %v417_v55 = vlaneseq }
 0x13e   : > { %v308_v60 = vpop.xlane.xlu1 %307  ;;  %v310_v61 = vpop.xlane.xlu0 %309 }
 0x13f   : > { %1358 = vrsqrt.f32 %v317_v59  ;;  %v314_v62 = vmul.f32 0.0078125, %v308_v60  ;;  %v315_v63 = vmul.f32 0.0078125, %v310_v61  ;;  %v781_v59 = vld [vmem:[%s2206_s5 + $0xb0] sm:$0xff]  ;;  %v782_v60 = vld [vmem:[%s2206_s5 + $0xb8] sm:$0xff] }
 0x140   : > { %v813_v61 = vld [vmem:[%s2206_s5 + $0x1b0] sm:$0xff] }
 0x141   : > { %v318_v0 = vadd.f32 1e-05, %v314_v62  ;;  %v319_v1 = vadd.f32 1e-05, %v315_v63  ;;  %v1264_v62 = vpack.c.bf16 %v782_v60, %v781_v59  ;;  %v814_v63 = vld [vmem:[%s2206_s5 + $0x1b8] sm:$0xff] }
 0x142   : > { %v312_v2 = vpop.xlane.xlu1 %311  ;;  %v415_v59 = vld [vmem:[%s2205_s4] sm:$0xf] }
 0x143   : > { %1360 = vrsqrt.f32 %v318_v0  ;;  %v316_v3 = vmul.f32 0.0078125, %v312_v2  ;;  %v765_v0 = vld [vmem:[%s2206_s5 + $0x30] sm:$0xff]  ;;  %v1296_v2 = vpack.c.bf16 %v814_v63, %v813_v61 }
 0x144   : > { %1362 = vrsqrt.f32 %v319_v1  ;;  %v766_v1 = vld [vmem:[%s2206_s5 + $0x38] sm:$0xff] }
 0x145   : > { %v320_v4 = vadd.f32 1e-05, %v316_v3  ;;  %v1266_v3 = vpack.c.bf16 %v766_v1, %v765_v0 }
 0x147   : > { %1364 = vrsqrt.f32 %v320_v4  ;;  %v797_v4 = vld [vmem:[%s2206_s5 + $0x130] sm:$0xff] }
 0x149   : > { %v1359_v5 = vpop.eup %1358 }
 0x14a   : > { %v325_v7 = vmul.f32 %v1359_v5, %v1646_v44  ;;  %v798_v5 = vld [vmem:[%s2206_s5 + $0x138] sm:$0xff] }
 0x14c   : > { %v336_v9 = vmul.f32 %v1091_v6, %v325_v7  ;;  %v783_v7 = vld [vmem:[%s2206_s5 + $0xc0] sm:$0xff] }
 0x14d   : > { %v1361_v10 = vpop.eup %1360 }
 0x14e   : > { %v1363_v11 = vpop.eup %1362  ;;  %v347_v12 = vadd.f32 %v1092_v8, %v336_v9  ;;  %v326_v13 = vmul.f32 %v1361_v10, %v1653_v51  ;;  %v815_v9 = vld [vmem:[%s2206_s5 + $0x1c0] sm:$0xff] }
 0x14f   : > { %v327_v14 = vmul.f32 %v1363_v11, %v1648_v45  ;;  %v816_v11 = vld [vmem:[%s2206_s5 + $0x1c8] sm:$0xff] }
 0x150   : > { %502 = vmatmul.mubr.f32.vlgmr.msra.gmra.mrb[0].mxu0 %v347_v12  ;;  %591 = vmatmul.mubr.f32.vlgmr.msra.gmra.mrb[0].mxu1 %v347_v12  ;;  %v337_v15 = vmul.f32 %v1091_v6, %v326_v13  ;;  %v767_v12 = vld [vmem:[%s2206_s5 + $0x40] sm:$0xff]  ;;  %v768_v13 = vld [vmem:[%s2206_s5 + $0x48] sm:$0xff] }
 0x151   : > { %v1365_v16 = vpop.eup %1364  ;;  %507 = vmatprep.mubr.f32.mxu0 %v1466_v40  ;;  %596 = vmatprep.mubr.f32.mxu1 %v1466_v40  ;;  %v338_v17 = vmul.f32 %v1091_v6, %v327_v14  ;;  %v1300_v14 = vpack.c.bf16 %v816_v11, %v815_v9 }
 0x152   : > { %v348_v44 = vadd.f32 %v1092_v8, %v337_v15  ;;  %v328_v18 = vmul.f32 %v1365_v16, %v1656_v52  ;;  %v775_v52 = vld [vmem:[%s2206_s5 + $0x80] sm:$0xff]  ;;  %1287 = vmatpush3.bf16.msra.mxu1 %v1286_v30  ;;  %v1270_v15 = vpack.c.bf16 %v768_v13, %v767_v12 }
 0x153   : > { %v349_v51 = vadd.f32 %v1092_v8, %v338_v17  ;;  %v1252_v22 = vpack.c.bf16 %v776_v20, %v775_v52  ;;  %1289 = vmatprep.subr.bf16.mxu1 %v1288_v38  ;;  %v799_v16 = vld [vmem:[%s2206_s5 + $0x140] sm:$0xff]  ;;  %v818_v52 = vld [vmem:[%s2206_s5 + $0x1d8] sm:$0xff]  ;;  %v769_v20 = vld [vmem:[%s2206_s5 + $0x50] sm:$0xff]  ;;  %v1310_v38 = vpack.c.bf16 %v804_v37, %v803_v36 }
 0x154   : > { %508 = vmatmul.mubr.f32.gmra.mrb[2].mxu0 %v348_v44  ;;  %597 = vmatmul.mubr.f32.gmra.mrb[2].mxu1 %v348_v44  ;;  %v339_v45 = vmul.f32 %v1091_v6, %v328_v18  ;;  %v1298_v6 = vpack.c.bf16 %v798_v5, %v797_v4  ;;  %v800_v44 = vld [vmem:[%s2206_s5 + $0x148] sm:$0xff]  ;;  %v785_v18 = vld [vmem:[%s2206_s5 + $0xd0] sm:$0xff]  ;;  %v1274_v23 = vpack.c.bf16 %v770_v21, %v769_v20 }
 0x155   : > { %513 = vmatprep.mubr.f32.mxu0 %v1466_v40  ;;  %602 = vmatprep.mubr.f32.mxu1 %v1466_v40  ;;  %v1302_v17 = vpack.c.bf16 %v800_v44, %v799_v16 }
 0x156   : > { %v350_v19 = vadd.f32 %v1092_v8, %v339_v45  ;;  %1253 = vmatprep.subr.bf16.mxu0 %v1252_v22  ;;  %v784_v8 = vld [vmem:[%s2206_s5 + $0xc8] sm:$0xff]  ;;  %v817_v45 = vld [vmem:[%s2206_s5 + $0x1d0] sm:$0xff] }
 0x157   : > { %1255 = vmatpush3.bf16.msra.mxu0 %v1254_v27  ;;  %v1268_v10 = vpack.c.bf16 %v784_v8, %v783_v7  ;;  %v1304_v22 = vpack.c.bf16 %v818_v52, %v817_v45  ;;  %v787_v27 = vld [vmem:[%s2206_s5 + $0xe0] sm:$0xff] }
 0x158   : > { %514 = vmatmul.mubr.f32.gmra.mrb[4].mxu0 %v349_v51  ;;  %603 = vmatmul.mubr.f32.gmra.mrb[4].mxu1 %v349_v51  ;;  %v786_v51 = vld [vmem:[%s2206_s5 + $0xd8] sm:$0xff]  ;;  %v1276_v30 = vpack.c.bf16 %v788_v28, %v787_v27 }
 0x159   : > { %519 = vmatprep.mubr.f32.mxu0 %v1466_v40  ;;  %608 = vmatprep.mubr.f32.mxu1 %v1466_v40  ;;  %v793_v40 = vld [vmem:[%s2206_s5 + $0x110] sm:$0xff] }
 0x15a   : > { %1257 = vmatprep.subr.bf16.mxu0 %v1256_v34  ;;  %v1290_v42 = vpack.c.bf16 %v794_v41, %v793_v40  ;;  %v1308_v34 = vpack.c.bf16 %v820_v31, %v819_v29  ;;  %v790_v40 = vld [vmem:[%s2206_s5 + $0xf8] sm:$0xff]  ;;  %v821_v41 = vld [vmem:[%s2206_s5 + $0x1f0] sm:$0xff] }
 0x15b   : > { %1259 = vmatpush3.bf16.msra.mxu0 %v1258_v39  ;;  %v789_v39 = vld [vmem:[%s2206_s5 + $0xf0] sm:$0xff] }
 0x15c   : > { %520 = vmatmul.mubr.f32.gmra.mrb[6].mxu0 %v350_v19  ;;  %609 = vmatmul.mubr.f32.gmra.mrb[6].mxu1 %v350_v19  ;;  %v1272_v19 = vpack.c.bf16 %v786_v51, %v785_v18 }
 0x15d   : > { %1291 = vmatpush3.bf16.msra.mxu1 %v1290_v42  ;;  %1261 = vmatprep.subr.bf16.mxu0 %v1260_v48  ;;  %v1280_v42 = vpack.c.bf16 %v790_v40, %v789_v39  ;;  %v1312_v48 = vpack.c.bf16 %v822_v43, %v821_v41 }
 0x15e   : > { %1293 = vmatprep.subr.bf16.mxu1 %v1292_v50  ;;  %v805_v50 = vld [vmem:[%s2206_s5 + $0x170] sm:$0xff] }
 0x15f   : > { %1263 = vmatpush3.bf16.msra.mxu0 %v1262_v56  ;;  %v1314_v54 = vpack.c.bf16 %v806_v53, %v805_v50  ;;  %v418_v56 = vshrl.u32 %v417_v55, 7 }
 0x160   : > { %1265 = vmatprep.subr.bf16.mxu0 %v1264_v62 }
 0x161   : > { %1295 = vmatpush3.bf16.msra.mxu1 %v1294_v58  ;;  %v419_v57 = vsub.s32 0, %v418_v56  ;;  %v427_v58 = vsub.s32 2, %v418_v56  ;;  %v423_v60 = vsub.s32 1, %v418_v56  ;;  %v431_v61 = vsub.s32 3, %v418_v56 }
 0x162   : > { %1297 = vmatprep.subr.bf16.mxu1 %v1296_v2 }
 0x163   : > { %1267 = vmatpush3.bf16.msra.mxu0 %v1266_v3  ;;  %v1997_v62 = vrot.slane %v415_v59, %v419_v57  ;;  %v1999_v63 = vrot.slane %v415_v59, %v427_v58  ;;  %v2001_v0 = vrot.slane %v415_v59, %v423_v60  ;;  %v2003_v1 = vrot.slane %v415_v59, %v431_v61 }
 0x164   : > { %1269 = vmatprep.subr.bf16.mxu0 %v1268_v10 }
 0x165   : > { %1299 = vmatpush3.bf16.msra.mxu1 %v1298_v6 }
 0x166   : > { %1301 = vmatprep.subr.bf16.mxu1 %v1300_v14 }
 0x167   : > { %1271 = vmatpush3.bf16.msra.mxu0 %v1270_v15 }
 0x168   : > { %1273 = vmatprep.subr.bf16.mxu0 %v1272_v19 }
 0x169   : > { %1303 = vmatpush3.bf16.msra.mxu1 %v1302_v17 }
 0x16a   : > { %1305 = vmatprep.subr.bf16.mxu1 %v1304_v22 }
 0x16b   : > { %1275 = vmatpush3.bf16.msra.mxu0 %v1274_v23 }
 0x16c   : > { %1277 = vmatprep.subr.bf16.mxu0 %v1276_v30 }
 0x16d   : > { %1307 = vmatpush3.bf16.msra.mxu1 %v1306_v26 }
 0x16e   : > { %1309 = vmatprep.subr.bf16.mxu1 %v1308_v34 }
 0x16f   : > { %1279 = vmatpush3.bf16.msra.mxu0 %v1278_v35 }
 0x170   : > { %1281 = vmatprep.subr.bf16.mxu0 %v1280_v42 }
 0x171   : > { %1311 = vmatpush3.bf16.msra.mxu1 %v1310_v38 }
 0x172   : > { %1313 = vmatprep.subr.bf16.mxu1 %v1312_v48 }
 0x173   : > { %1283 = vmatpush3.bf16.msra.mxu0 %v1282_v49 }
 0x175   : > { %1315 = vmatpush3.bf16.msra.mxu1 %v1314_v54 }
 0x223   : > { %v503_v2 = vpop.f32.mrb[0].mxu0  ;;  %v592_v3 = vpop.f32.mrb[0].mxu1 }
 0x224   : > { %v2006_v4 = vadd.f32 %v503_v2, %v1997_v62  ;;  %v2009_v5 = vadd.f32 %v592_v3, %v1999_v63  ;;  %v505_v6 = vpop.f32.mrb[1].mxu0  ;;  %v594_v7 = vpop.f32.mrb[1].mxu1 }
 0x225   : > { %v2012_v8 = vadd.f32 %v505_v6, %v2001_v0  ;;  %v2015_v9 = vadd.f32 %v594_v7, %v2003_v1 }
 0x226   : > { %v615_v10 = vmul.f32 %v2006_v4, %v2006_v4  ;;  %v617_v11 = vmul.f32 %v2009_v5, %v2009_v5 }
 0x227   : > { %v616_v12 = vmul.f32 %v2012_v8, %v2012_v8  ;;  %v618_v13 = vmul.f32 %v2015_v9, %v2015_v9  ;;  %v509_v14 = vpop.f32.mrb[2].mxu0  ;;  %v598_v15 = vpop.f32.mrb[2].mxu1 }
 0x228   : > { %v631_v16 = vmul.f32 %v615_v10, %v2006_v4  ;;  %v633_v44 = vmul.f32 %v617_v11, %v2009_v5  ;;  %v2028_v17 = vadd.f32 %v509_v14, %v1997_v62  ;;  %v2031_v18 = vadd.f32 %v598_v15, %v1999_v63  ;;  %v511_v51 = vpop.f32.mrb[3].mxu0  ;;  %v600_v45 = vpop.f32.mrb[3].mxu1 }
 0x229   : > { %v632_v19 = vmul.f32 %v616_v12, %v2012_v8  ;;  %v634_v52 = vmul.f32 %v618_v13, %v2015_v9  ;;  %v2036_v20 = vadd.f32 %v511_v51, %v2001_v0  ;;  %v2039_v21 = vadd.f32 %v600_v45, %v2003_v1 }
 0x22a   : > { %v647_v22 = vmul.f32 0.044715, %v631_v16  ;;  %v649_v23 = vmul.f32 0.044715, %v633_v44  ;;  %v619_v24 = vmul.f32 %v2028_v17, %v2028_v17  ;;  %v621_v27 = vmul.f32 %v2031_v18, %v2031_v18 }
 0x22b   : > { %v648_v25 = vmul.f32 0.044715, %v632_v19  ;;  %v650_v26 = vmul.f32 0.044715, %v634_v52  ;;  %v620_v28 = vmul.f32 %v2036_v20, %v2036_v20  ;;  %v515_v29 = vpop.f32.mrb[4].mxu0  ;;  %v604_v30 = vpop.f32.mrb[4].mxu1  ;;  %v622_v33 = vmul.f32 %v2039_v21, %v2039_v21 }
 0x22c   : > { %v663_v31 = vadd.f32 %v647_v22, %v2006_v4  ;;  %v635_v32 = vmul.f32 %v619_v24, %v2028_v17  ;;  %v517_v34 = vpop.f32.mrb[5].mxu0  ;;  %v606_v35 = vpop.f32.mrb[5].mxu1  ;;  %v665_v36 = vadd.f32 %v649_v23, %v2009_v5  ;;  %v2055_v39 = vadd.f32 %v515_v29, %v1997_v62 }
 0x22d   : > { %v664_v37 = vadd.f32 %v648_v25, %v2012_v8  ;;  %v666_v38 = vadd.f32 %v650_v26, %v2015_v9  ;;  %v637_v41 = vmul.f32 %v621_v27, %v2031_v18  ;;  %v636_v42 = vmul.f32 %v620_v28, %v2036_v20 }
 0x22e   : > { %v679_v40 = vmul.f32 0.7978846, %v663_v31  ;;  %v2060_v43 = vadd.f32 %v604_v30, %v1999_v63  ;;  %v651_v46 = vmul.f32 0.044715, %v635_v32  ;;  %v638_v47 = vmul.f32 %v622_v33, %v2039_v21 }
 0x22f   : > { %v521_v48 = vpop.f32.mrb[6].mxu0  ;;  %v610_v49 = vpop.f32.mrb[6].mxu1  ;;  %v623_v50 = vmul.f32 %v2055_v39, %v2055_v39  ;;  %v681_v56 = vmul.f32 0.7978846, %v665_v36  ;;  %v680_v57 = vmul.f32 0.7978846, %v664_v37  ;;  %v2068_v59 = vadd.f32 %v517_v34, %v2001_v0 }
 0x230   : > { %v625_v53 = vmul.f32 %v2060_v43, %v2060_v43  ;;  %v523_v54 = vpop.f32.mrb[7].mxu0  ;;  %v612_v55 = vpop.f32.mrb[7].mxu1  ;;  %v682_v58 = vmul.f32 0.7978846, %v666_v38  ;;  %1366 = vtanh.f32 %v679_v40  ;;  %v653_v60 = vmul.f32 0.044715, %v637_v41 }
 0x231   : > { %v652_v61 = vmul.f32 0.044715, %v636_v42  ;;  %v2071_v2 = vadd.f32 %v606_v35, %v2003_v1  ;;  %v667_v3 = vadd.f32 %v651_v46, %v2028_v17  ;;  %v654_v6 = vmul.f32 0.044715, %v638_v47 }
 0x232   : > { %v624_v7 = vmul.f32 %v2068_v59, %v2068_v59  ;;  %v2077_v10 = vadd.f32 %v521_v48, %v1997_v62  ;;  %v639_v11 = vmul.f32 %v623_v50, %v2055_v39  ;;  %v641_v12 = vmul.f32 %v625_v53, %v2060_v43 }
 0x233   : > { %v626_v13 = vmul.f32 %v2071_v2, %v2071_v2  ;;  %v2084_v14 = vadd.f32 %v610_v49, %v1999_v63  ;;  %v2090_v44 = vadd.f32 %v523_v54, %v2001_v0  ;;  %v2093_v62 = vadd.f32 %v612_v55, %v2003_v1 }
 0x234   : > { %v640_v15 = vmul.f32 %v624_v7, %v2068_v59  ;;  %v627_v16 = vmul.f32 %v2077_v10, %v2077_v10  ;;  %1368 = vtanh.f32 %v681_v56  ;;  %v668_v51 = vadd.f32 %v652_v61, %v2036_v20 }
 0x235   : > { %v642_v45 = vmul.f32 %v626_v13, %v2071_v2  ;;  %v629_v63 = vmul.f32 %v2084_v14, %v2084_v14  ;;  %v670_v19 = vadd.f32 %v654_v6, %v2039_v21  ;;  %v628_v22 = vmul.f32 %v2090_v44, %v2090_v44 }
 0x236   : > { %v656_v52 = vmul.f32 0.044715, %v640_v15  ;;  %v630_v0 = vmul.f32 %v2093_v62, %v2093_v62  ;;  %v669_v1 = vadd.f32 %v653_v60, %v2031_v18  ;;  %v655_v23 = vmul.f32 0.044715, %v639_v11 }
 0x237   : > { %v658_v24 = vmul.f32 0.044715, %v642_v45  ;;  %v643_v25 = vmul.f32 %v627_v16, %v2077_v10  ;;  %v657_v26 = vmul.f32 0.044715, %v641_v12  ;;  %v645_v27 = vmul.f32 %v629_v63, %v2084_v14 }
 0x238   : > { %v644_v28 = vmul.f32 %v628_v22, %v2090_v44  ;;  %v646_v29 = vmul.f32 %v630_v0, %v2093_v62  ;;  %v684_v30 = vmul.f32 0.7978846, %v668_v51  ;;  %v672_v31 = vadd.f32 %v656_v52, %v2068_v59 }
 0x239   : > { %1370 = vtanh.f32 %v680_v57  ;;  %v686_v32 = vmul.f32 0.7978846, %v670_v19  ;;  %v674_v33 = vadd.f32 %v658_v24, %v2071_v2  ;;  %v683_v36 = vmul.f32 0.7978846, %v667_v3 }
 0x23a   : > { %v660_v34 = vmul.f32 0.044715, %v644_v28  ;;  %v1367_v35 = vpop.eup %1366  ;;  %v671_v37 = vadd.f32 %v655_v23, %v2055_v39  ;;  %v659_v38 = vmul.f32 0.044715, %v643_v25  ;;  %v662_v40 = vmul.f32 0.044715, %v646_v29 }
 0x23b   : > { %v685_v41 = vmul.f32 0.7978846, %v669_v1  ;;  %v673_v42 = vadd.f32 %v657_v26, %v2060_v43  ;;  %v661_v46 = vmul.f32 0.044715, %v645_v27  ;;  %1372 = vtanh.f32 %v682_v58 }
 0x23c   : > { %v688_v47 = vmul.f32 0.7978846, %v672_v31  ;;  %v676_v48 = vadd.f32 %v660_v34, %v2090_v44  ;;  %1374 = vtanh.f32 %v684_v30  ;;  %v690_v49 = vmul.f32 0.7978846, %v674_v33 }
 0x23d   : > { %v678_v50 = vadd.f32 %v662_v40, %v2093_v62  ;;  %1376 = vtanh.f32 %v686_v32  ;;  %v687_v54 = vmul.f32 0.7978846, %v671_v37  ;;  %v675_v55 = vadd.f32 %v659_v38, %v2077_v10 }
 0x23e   : > { %v1369_v53 = vpop.eup %1368  ;;  %1378 = vtanh.f32 %v683_v36  ;;  %v689_v56 = vmul.f32 0.7978846, %v673_v42  ;;  %v677_v57 = vadd.f32 %v661_v46, %v2084_v14  ;;  %v711_v60 = vadd.f32 1.0, %v1367_v35 }
 0x23f   : > { %1380 = vtanh.f32 %v685_v41  ;;  %v692_v61 = vmul.f32 0.7978846, %v676_v48  ;;  %v694_v58 = vmul.f32 0.7978846, %v678_v50  ;;  %v691_v6 = vmul.f32 0.7978846, %v675_v55 }
 0x240   : > { %1382 = vtanh.f32 %v688_v47  ;;  %v713_v7 = vadd.f32 1.0, %v1369_v53  ;;  %v693_v11 = vmul.f32 0.7978846, %v677_v57  ;;  %v727_v13 = vmul.f32 0.5, %v711_v60 }
 0x241   : > { %1384 = vtanh.f32 %v690_v49 }
 0x242   : > { %1386 = vtanh.f32 %v687_v54  ;;  %v729_v19 = vmul.f32 0.5, %v713_v7  ;;  %v743_v1 = vmul.f32 %v727_v13, %v2006_v4 }
 0x243   : > { %v1371_v3 = vpop.eup %1370  ;;  %1388 = vtanh.f32 %v689_v56 }
 0x244   : > { %v712_v12 = vadd.f32 1.0, %v1371_v3  ;;  %1390 = vtanh.f32 %v692_v61 }
 0x245   : > { %v1373_v15 = vpop.eup %1372  ;;  %1392 = vtanh.f32 %v694_v58 }
 0x246   : > { %v728_v16 = vmul.f32 0.5, %v712_v12  ;;  %v1375_v51 = vpop.eup %1374  ;;  %v714_v45 = vadd.f32 1.0, %v1373_v15  ;;  %1394 = vtanh.f32 %v691_v6 }
 0x247   : > { %v1377_v63 = vpop.eup %1376  ;;  %v716_v22 = vadd.f32 1.0, %v1375_v51  ;;  %1396 = vtanh.f32 %v693_v11 }
 0x248   : > { %v744_v52 = vmul.f32 %v728_v16, %v2012_v8  ;;  %v1379_v0 = vpop.eup %1378  ;;  %v730_v23 = vmul.f32 0.5, %v714_v45  ;;  %v718_v24 = vadd.f32 1.0, %v1377_v63  ;;  %v745_v8 = vmul.f32 %v729_v19, %v2009_v5 }
 0x249   : > { %v1381_v25 = vpop.eup %1380  ;;  %v732_v26 = vmul.f32 0.5, %v716_v22  ;;  %v715_v27 = vadd.f32 1.0, %v1379_v0  ;;  %v1398_v22 = vld [vmem:[%s1562_s17] sm:$0xff] }
 0x24a   : > { %894 = vmatprep.mubr.f32.mxu0 %v744_v52  ;;  %v1383_v28 = vpop.eup %1382  ;;  %v746_v29 = vmul.f32 %v730_v23, %v2015_v9  ;;  %v734_v30 = vmul.f32 0.5, %v718_v24  ;;  %v717_v31 = vadd.f32 1.0, %v1381_v25 }
 0x24b   : > { %895 = vmatmul.mubr.f32.vlgmr.msra.gmra.mrb[8].mxu0 %v743_v1  ;;  %v1385_v32 = vpop.eup %1384  ;;  %v748_v33 = vmul.f32 %v732_v26, %v2036_v20  ;;  %v731_v34 = vmul.f32 0.5, %v715_v27  ;;  %v720_v35 = vadd.f32 1.0, %v1383_v28 }
 0x24c   : > { %v1387_v4 = vpop.eup %1386  ;;  %979 = vmatprep.mubr.f32.mxu1 %v746_v29  ;;  %v750_v36 = vmul.f32 %v734_v30, %v2039_v21  ;;  %v733_v37 = vmul.f32 0.5, %v717_v31  ;;  %v722_v38 = vadd.f32 1.0, %v1385_v32  ;;  %v1399_v30 = vld [vmem:[%s1562_s17 + $0x8] sm:$0xff] }
 0x24d   : > { %v1389_v40 = vpop.eup %1388  ;;  %980 = vmatmul.mubr.f32.vlgmr.msra.gmra.mrb[8].mxu1 %v745_v8  ;;  %899 = vmatprep.mubr.f32.mxu0 %v748_v33  ;;  %v747_v9 = vmul.f32 %v731_v34, %v2028_v17  ;;  %v736_v41 = vmul.f32 0.5, %v720_v35  ;;  %v719_v42 = vadd.f32 1.0, %v1387_v4 }
 0x24e   : > { %v1391_v46 = vpop.eup %1390  ;;  %984 = vmatprep.mubr.f32.mxu1 %v750_v36  ;;  %v738_v5 = vmul.f32 0.5, %v722_v38  ;;  %v721_v47 = vadd.f32 1.0, %v1389_v40  ;;  %v749_v48 = vmul.f32 %v733_v37, %v2031_v18  ;;  %v1400_v38 = vld [vmem:[%s1562_s17 + $0x10] sm:$0xff] }
 0x24f   : > { %v1393_v20 = vpop.eup %1392  ;;  %900 = vmatmul.mubr.f32.gmra.mrb[10].mxu0 %v747_v9  ;;  %v752_v49 = vmul.f32 %v736_v41, %v2068_v59  ;;  %v735_v21 = vmul.f32 0.5, %v719_v42  ;;  %v724_v50 = vadd.f32 1.0, %v1391_v46  ;;  %v1401_v46 = vld [vmem:[%s1562_s17 + $0x18] sm:$0xff] }
 0x250   : > { %v1395_v53 = vpop.eup %1394  ;;  %v754_v54 = vmul.f32 %v738_v5, %v2071_v2  ;;  %v737_v55 = vmul.f32 0.5, %v721_v47  ;;  %v726_v56 = vadd.f32 1.0, %v1393_v20 }
 0x251   : > { %v1397_v17 = vpop.eup %1396  ;;  %985 = vmatmul.mubr.f32.gmra.mrb[10].mxu1 %v749_v48  ;;  %904 = vmatprep.mubr.f32.mxu0 %v752_v49  ;;  %v751_v57 = vmul.f32 %v735_v21, %v2055_v39  ;;  %v740_v60 = vmul.f32 0.5, %v724_v50  ;;  %v723_v61 = vadd.f32 1.0, %v1395_v53 }
 0x252   : > { %989 = vmatprep.mubr.f32.mxu1 %v754_v54  ;;  %v742_v58 = vmul.f32 0.5, %v726_v56  ;;  %v725_v3 = vadd.f32 1.0, %v1397_v17  ;;  %v753_v18 = vmul.f32 %v737_v55, %v2060_v43  ;;  %v1093_v43 = vld [vmem:[%s2207_s6] ss:$0 sm:$0xff] }
 0x253   : > { %905 = vmatmul.mubr.f32.gmra.mrb[12].mxu0 %v751_v57  ;;  %v756_v59 = vmul.f32 %v740_v60, %v2090_v44  ;;  %v739_v6 = vmul.f32 0.5, %v723_v61 }
 0x254   : > { %v758_v2 = vmul.f32 %v742_v58, %v2093_v62  ;;  %v741_v7 = vmul.f32 0.5, %v725_v3 }
 0x255   : > { %990 = vmatmul.mubr.f32.gmra.mrb[12].mxu1 %v753_v18  ;;  %909 = vmatprep.mubr.f32.mxu0 %v756_v59  ;;  %v755_v39 = vmul.f32 %v739_v6, %v2077_v10 }
 0x256   : > { %994 = vmatprep.mubr.f32.mxu1 %v758_v2  ;;  %v757_v11 = vmul.f32 %v741_v7, %v2084_v14 }
 0x257   : > { %910 = vmatmul.mubr.f32.gmra.mrb[14].mxu0 %v755_v39 }
 0x259   : > { %995 = vmatmul.mubr.f32.gmra.mrb[14].mxu1 %v757_v11 }
 0x31e   : > { %v1132_v12 = vpop.f32.mrb[8].mxu0 }
 0x31f   : > { %v1133_v44 = vpop.f32.mrb[9].mxu0 }
 0x320   : > { %v1134_v13 = vadd.f32 %v1133_v44, %v1132_v12  ;;  %v1176_v62 = vpop.f32.mrb[8].mxu1 }
 0x321   : > { %v1177_v16 = vpop.f32.mrb[9].mxu1 }
 0x322   : > { %v897_v15 = vadd.f32 %v1134_v13, %v1093_v43  ;;  %v1178_v10 = vadd.f32 %v1177_v16, %v1176_v62  ;;  %v1135_v51 = vpop.f32.mrb[10].mxu0 }
 0x323   : > { %v1136_v45 = vpop.f32.mrb[11].mxu0 }
 0x324   : > { %v982_v63 = vadd.f32 %v1178_v10, %v897_v15  ;;  %v1179_v14 = vpop.f32.mrb[10].mxu1  ;;  %v1137_v19 = vadd.f32 %v1136_v45, %v1135_v51 }
 0x325   : > { %v1180_v52 = vpop.f32.mrb[11].mxu1 }
 0x326   : > { %v1000_v0 = vadd.f32 %v1398_v22, %v982_v63  ;;  %v902_v1 = vadd.f32 %v1137_v19, %v1093_v43  ;;  %v1181_v23 = vadd.f32 %v1180_v52, %v1179_v14  ;;  %v1138_v24 = vpop.f32.mrb[12].mxu0 }
 0x327   : > { %v1139_v25 = vpop.f32.mrb[13].mxu0 }
 0x328   : > { %1004 = vst [vmem:[%s2140_s29] sm:$0xff] %v1000_v0  ;;  %v987_v26 = vadd.f32 %v1181_v23, %v902_v1  ;;  %v1182_v27 = vpop.f32.mrb[12].mxu1  ;;  %v1140_v28 = vadd.f32 %v1139_v25, %v1138_v24 }
 0x329   : > { %v1183_v29 = vpop.f32.mrb[13].mxu1 }
 0x32a   : > { %v1001_v31 = vadd.f32 %v1399_v30, %v987_v26  ;;  %v907_v32 = vadd.f32 %v1140_v28, %v1093_v43  ;;  %v1184_v8 = vadd.f32 %v1183_v29, %v1182_v27  ;;  %v1141_v33 = vpop.f32.mrb[14].mxu0 }
 0x32b   : > { %v1142_v34 = vpop.f32.mrb[15].mxu0 }
 0x32c   : > { %1005 = vst [vmem:[%s2140_s29 + $0x8] sm:$0xff] %v1001_v31  ;;  %v992_v35 = vadd.f32 %v1184_v8, %v907_v32  ;;  %v1185_v4 = vpop.f32.mrb[14].mxu1  ;;  %v1143_v36 = vadd.f32 %v1142_v34, %v1141_v33 }
 0x32d   : > { %v1186_v37 = vpop.f32.mrb[15].mxu1 }
 0x32e   : > { %v1002_v40 = vadd.f32 %v1400_v38, %v992_v35  ;;  %v912_v9 = vadd.f32 %v1143_v36, %v1093_v43  ;;  %v1187_v41 = vadd.f32 %v1186_v37, %v1185_v4 }
 0x330   : > { %1006 = vst [vmem:[%s2140_s29 + $0x10] sm:$0xff] %v1002_v40  ;;  %v997_v42 = vadd.f32 %v1187_v41, %v912_v9 }
 0x332   : > { %v1003_v5 = vadd.f32 %v1401_v46, %v997_v42 }
 0x334   : > { %1007 = vst [vmem:[%s2140_s29 + $0x18] sm:$0xff] %v1003_v5 }
 0x335   : > { %1415 = shalt.err (!%p1412_p3)
}
 0x336   : > { %s1416_s17 = scalar_lea.hbm %s2155_s15, 512  ;;  %s1420_s23 = scalar_lea.hbm %s2208_s7, 2048 }
 0x337   : > { %p1417_p4 = scmp.ne.s32.totalorder %s2155_s15, %s1416_s17  ;;  %p1421_p9 = scmp.lt.u32.totalorder %s2155_s15, %s2208_s7 }
 0x338   : > { %p1422_p10 = scmp.lt.u32.totalorder %s1420_s23, %s1416_s17  ;;  %p1424_p12 = scmp.lt.u32.totalorder %s1416_s17, %s2155_s15 }
 0x339   : > { %p1418_p7 = pnand %p1417_p4, %p1548_p5 }
 0x33a   : > { %p1423_p11 = por %p1422_p10, %p1421_p9 }
 0x33b   : > { %p1419_p8 = pneg %p1418_p7 }
 0x33c   : > { %p1425_p13 = por %p1424_p12, %p1423_p11 }
 0x33e   : > { %p1426_p0 = pnand %p1425_p13, %p1419_p8 }
 0x340   : > { %1429 = shalt.err (!%p1426_p0)
}
 0x341   : > { %s1468_s13 = smov 128   ;;  %s1469_s14 = smov 8  }
 0x342   : > { %1316 = dma.vmem_to_hbm [thread:$0]  (%p1548_p5), %s2149_s8, 512, %s2155_s15, %s2160_s16, %s1468_s13, %s1468_s13, %s1469_s14  }
 0x343 PF: > { %p1322_p1 = scmp.ge.s32.totalorder %s1464_s27, 2  ;;  %s1037_s18 = sand.u32 1, %s1452_s24  }
 0x344   : > { %s1038_s28 = scalar_lea.sflag [#allocation3], %s1037_s18 }
 0x345   : > { %p1319_p2 = pnand %p1322_p1, %p1552_p6 }
 0x347   : > { %1447 = dma.done.wait (!%p1319_p2), %s1038_s28, 512  }
 0x348   : > { %1449 = vsyncadd (!%p1319_p2), %s1038_s28, 4294966784  ;;  %p17_p3 = scmp.ge.s32.totalorder %s1535_s30, 6   ;;  %s2211_s24 = smov %s1456_s25 }
 0x349   : > { %s2212_s25 = smov %s1460_s26  ;;  %s2213_s26 = smov %s1546_s10 }
 0x34a   : > { %s2214_s27 = smov %s1535_s30  ;;  %19 = sbr.rel (!%p17_p3) target bundleno = 3 (0x3), region = 83 }
 0x351   :  { %1043 = vsyncpa [#allocation3], 1 }
 0x352   :  { %1045 = vsyncpa [#allocation3 + $0x1], 1 }

// kernel: spatial_block_forward.2
= control target key start
LH: loop header
LB: loop body
LE: loop exit
PB: predicated region body
PF: predicated region fallthrough
CT: control target
= control target key end

     0   :  { %s3994_s21 = smov 0   ;;  %s4590_s0 = inlined_call_operand.vmem [shape: f32[16,8,128], index: 0, kind: input, shape index: {}]   ;;  %s4591_s1 = inlined_call_operand.vmem [shape: f32[128,384], index: 1, kind: input, shape index: {}]   ;;  %s4592_s2 = inlined_call_operand.vmem [shape: f32[1,384], index: 2, kind: input, shape index: {}]   ;;  %s4593_s3 = inlined_call_operand.vmem [shape: f32[4,8,8], index: 3, kind: input, shape index: {}]   ;;  %s4594_s4 = inlined_call_operand.vmem [shape: f32[128,128], index: 4, kind: input, shape index: {}]   ;;  %s4595_s5 = inlined_call_operand.vmem [shape: f32[1,128], index: 5, kind: input, shape index: {}]   ;;  %s4596_s6 = inlined_call_operand.vmem [shape: f32[16,8,128], index: 6, kind: output, shape index: {}]  }
   0x1 LB: > { %s3370_s22 = sadd.s32 4294967295, %s3952_s21   ;;  %p3374_p0 = scmp.ge.s32.totalorder %s3952_s21, 1  ;;  %s3952_s21 = sphi %s3994_s21, %s16_s21  }
   0x2   : > { %p213_p1 = scmp.lt.s32.totalorder %s3952_s21, 5 }
   0x4   : > { %p214_p2 = pnand %p3374_p0, %p213_p1 }
   0x5   : > { %v260_v0 = vld [vmem:[%s4591_s1 + $0x8] sm:$0xff] (!%p214_p2)  ;;  %v263_v1 = vld [vmem:[%s4591_s1 + $0x20] sm:$0xff] (!%p214_p2)  ;;  %s3375_s29 = sshll.u32 (!%p214_p2), %s3370_s22, 2  ;;  %v262_v4 = vld [vmem:[%s4591_s1 + $0x18] sm:$0xff] (!%p214_p2)  ;;  %v3954_v7 = vmov (!%p214_p2), 0.0   ;;  %vm3955_vm0 = vmmov (!%p214_p2), 0   ;;  %v309_v53 = vlaneseq (!%p214_p2) }
   0x6   : > { %217 = sbr.rel (%p214_p2) target bundleno = 3161 (0xc59), region = 44  ;;  %v259_v2 = vld [vmem:[%s4591_s1] sm:$0xff] (!%p214_p2)  ;;  %v3773_v3 = vpack.c.bf16 (!%p214_p2), %v263_v1, %v260_v0  ;;  %v266_v5 = vld [vmem:[%s4591_s1 + $0x38] sm:$0xff] (!%p214_p2)  ;;  %v269_v6 = vld [vmem:[%s4591_s1 + $0x50] sm:$0xff] (!%p214_p2)  ;;  %388 = vmatprep.mubr.f32.mxu1 (!%p214_p2), %v3954_v7  ;;  %p244_p3 = scmp.lt.s32.totalorder (!%p214_p2), %s3375_s29, 15  ;;  %vm499_vm1 = vcmask (!%p214_p2), 261120  }
   0x7   : > { %v3775_v8 = vpack.c.bf16 (!%p214_p2), %v262_v4, %v259_v2  ;;  %v3777_v9 = vpack.c.bf16 (!%p214_p2), %v269_v6, %v266_v5  ;;  %v265_v10 = vld [vmem:[%s4591_s1 + $0x30] sm:$0xff] (!%p214_p2)  ;;  %v268_v11 = vld [vmem:[%s4591_s1 + $0x48] sm:$0xff] (!%p214_p2)  ;;  %v275_v13 = vld [vmem:[%s4591_s1 + $0x80] sm:$0xff] (!%p214_p2)  ;;  %v4128_v54 = vshrl.u32 (!%p214_p2), %v309_v53, 7  ;;  %vm804_vm2 = vcmask (!%p214_p2), 64512   ;;  %s3956_s20 = smov (!%p214_p2), 96  }
   0x8   : > { %v272_v12 = vld [vmem:[%s4591_s1 + $0x68] sm:$0xff] (!%p214_p2)  ;;  %3774 = vmatprep.subr.bf16.mxu1 (!%p214_p2), %v3773_v3  ;;  %v3779_v14 = vpack.c.bf16 (!%p214_p2), %v268_v11, %v265_v10  ;;  %v271_v16 = vld [vmem:[%s4591_s1 + $0x60] sm:$0xff] (!%p214_p2)  ;;  %v274_v17 = vld [vmem:[%s4591_s1 + $0x78] sm:$0xff] (!%p214_p2)  ;;  %s3957_s24 = smov (!%p214_p2), 64   ;;  %s3958_s28 = smov (!%p214_p2), 32   ;;  %vm1827_vm3 = vcmask (!%p214_p2), 523520  }
   0x9   : > { %3776 = vmatpush1.bf16.msra.mxu1 (!%p214_p2), %v3775_v8  ;;  %v3781_v15 = vpack.c.bf16 (!%p214_p2), %v275_v13, %v272_v12  ;;  %v278_v18 = vld [vmem:[%s4591_s1 + $0x98] sm:$0xff] (!%p214_p2)  ;;  %v281_v19 = vld [vmem:[%s4591_s1 + $0xb0] sm:$0xff] (!%p214_p2)  ;;  %v3783_v20 = vpack.c.bf16 (!%p214_p2), %v274_v17, %v271_v16  ;;  %v280_v23 = vld [vmem:[%s4591_s1 + $0xa8] sm:$0xff] (!%p214_p2)  ;;  %v315_v55 = vsub.s32 (!%p214_p2), 1, %v4128_v54  ;;  %v311_v57 = vsub.s32 (!%p214_p2), 0, %v4128_v54 }
   0xa   : > { %3778 = vmatprep.subr.bf16.mxu1 (!%p214_p2), %v3777_v9  ;;  %v3785_v21 = vpack.c.bf16 (!%p214_p2), %v281_v19, %v278_v18  ;;  %v277_v22 = vld [vmem:[%s4591_s1 + $0x90] sm:$0xff] (!%p214_p2)  ;;  %v284_v24 = vld [vmem:[%s4591_s1 + $0xc8] sm:$0xff] (!%p214_p2)  ;;  %v287_v25 = vld [vmem:[%s4591_s1 + $0xe0] sm:$0xff] (!%p214_p2)  ;;  %vm2510_vm4 = vcmask (!%p214_p2), 785920   ;;  %vm3193_vm5 = vcmask (!%p214_p2), 1048320  }
   0xb   : > { %v3787_v27 = vpack.c.bf16 (!%p214_p2), %v280_v23, %v277_v22  ;;  %v3789_v28 = vpack.c.bf16 (!%p214_p2), %v287_v25, %v284_v24  ;;  %v283_v29 = vld [vmem:[%s4591_s1 + $0xc0] sm:$0xff] (!%p214_p2)  ;;  %v286_v30 = vld [vmem:[%s4591_s1 + $0xd8] sm:$0xff] (!%p214_p2)  ;;  %v293_v32 = vld [vmem:[%s4591_s1 + $0x110] sm:$0xff] (!%p214_p2) }
   0xc   : > { %v290_v31 = vld [vmem:[%s4591_s1 + $0xf8] sm:$0xff] (!%p214_p2)  ;;  %v3791_v33 = vpack.c.bf16 (!%p214_p2), %v286_v30, %v283_v29  ;;  %v289_v35 = vld [vmem:[%s4591_s1 + $0xf0] sm:$0xff] (!%p214_p2)  ;;  %v292_v36 = vld [vmem:[%s4591_s1 + $0x108] sm:$0xff] (!%p214_p2) }
   0xd   : > { %s4598_s29 = smov (!%p244_p3, %s3375_s29), 15  ;;  %3780 = vmatpush1.bf16.msra.mxu1 %v3779_v14  ;;  %v3793_v34 = vpack.c.bf16 %v293_v32, %v290_v31  ;;  %v296_v37 = vld [vmem:[%s4591_s1 + $0x128] sm:$0xff]  ;;  %v299_v38 = vld [vmem:[%s4591_s1 + $0x140] sm:$0xff]  ;;  %v3795_v39 = vpack.c.bf16 %v292_v36, %v289_v35  ;;  %v298_v42 = vld [vmem:[%s4591_s1 + $0x138] sm:$0xff] }
   0xe   : > { %s3376_s25 = sshll.u32 %s4598_s29, 3  ;;  %3782 = vmatprep.subr.bf16.mxu1 %v3781_v15  ;;  %v3797_v40 = vpack.c.bf16 %v299_v38, %v296_v37  ;;  %v295_v41 = vld [vmem:[%s4591_s1 + $0x120] sm:$0xff]  ;;  %v302_v43 = vld [vmem:[%s4591_s1 + $0x158] sm:$0xff]  ;;  %v305_v44 = vld [vmem:[%s4591_s1 + $0x170] sm:$0xff] }
   0xf   : > { %s4053_s9 = scalar_lea.vmem %s4590_s0, %s3376_s25  ;;  %v3799_v45 = vpack.c.bf16 %v298_v42, %v295_v41  ;;  %v3801_v46 = vpack.c.bf16 %v305_v44, %v302_v43  ;;  %v301_v47 = vld [vmem:[%s4591_s1 + $0x150] sm:$0xff]  ;;  %v304_v48 = vld [vmem:[%s4591_s1 + $0x168] sm:$0xff]  ;;  %v4134_v56 = vld [vmem:[%s4592_s2] sm:$0x7]  ;;  %s253_s26 = scalar_lea.vmem %s4596_s6, %s3376_s25 }
  0x10   : > { %v255_v26 = vld [vmem:[%s4053_s9] sm:$0xff]  ;;  %v3803_v49 = vpack.c.bf16 %v304_v48, %v301_v47  ;;  %v4113_v50 = vld [vmem:[%s4053_s9 + $0x8] sm:$0xff]  ;;  %v4118_v51 = vld [vmem:[%s4053_s9 + $0x10] sm:$0xff]  ;;  %v316_v58 = vrot.slane %v4134_v56, %v315_v55  ;;  %v312_v60 = vrot.slane %v4134_v56, %v311_v57 }
  0x11   : > { %3569 = vmatprep.mubr.f32.mxu0 %v255_v26  ;;  %3784 = vmatpush1.bf16.msra.mxu1 %v3783_v20  ;;  %v4123_v52 = vld [vmem:[%s4053_s9 + $0x18] sm:$0xff]  ;;  %v261_v13 = vld [vmem:[%s4591_s1 + $0x10] sm:$0xff]  ;;  %v264_v14 = vld [vmem:[%s4591_s1 + $0x28] sm:$0xff] }
  0x12   : > { %3786 = vmatprep.subr.bf16.mxu1 %v3785_v21  ;;  %v267_v15 = vld [vmem:[%s4591_s1 + $0x40] sm:$0xff]  ;;  %v3805_v16 = vpack.c.bf16 %v264_v14, %v261_v13  ;;  %v270_v17 = vld [vmem:[%s4591_s1 + $0x58] sm:$0xff]  ;;  %v273_v19 = vld [vmem:[%s4591_s1 + $0x70] sm:$0xff] }
  0x13   : > { %v3809_v18 = vpack.c.bf16 %v270_v17, %v267_v15  ;;  %v276_v20 = vld [vmem:[%s4591_s1 + $0x88] sm:$0xff]  ;;  %v279_v22 = vld [vmem:[%s4591_s1 + $0xa0] sm:$0xff]  ;;  %v282_v23 = vld [vmem:[%s4591_s1 + $0xb8] sm:$0xff] }
  0x14   : > { %3806 = vmatprep.subr.bf16.mxu0 %v3805_v16  ;;  %v3813_v21 = vpack.c.bf16 %v276_v20, %v273_v19  ;;  %v3817_v24 = vpack.c.bf16 %v282_v23, %v279_v22  ;;  %v285_v25 = vld [vmem:[%s4591_s1 + $0xd0] sm:$0xff]  ;;  %v294_v29 = vld [vmem:[%s4591_s1 + $0x118] sm:$0xff]  ;;  %v300_v32 = vld [vmem:[%s4591_s1 + $0x148] sm:$0xff] }
  0x15   : > { %3788 = vmatpush1.bf16.msra.mxu1 %v3787_v27  ;;  %3808 = vmatpush3.bf16.msra.mxu0 %v3805_v16  ;;  %v297_v31 = vld [vmem:[%s4591_s1 + $0x130] sm:$0xff]  ;;  %v306_v35 = vld [vmem:[%s4591_s1 + $0x178] sm:$0xff]  ;;  %v498_v37 = vld [vmem:[%s4593_s3] sm:$0xff]  ;;  %v319_v16 = vsub.s32 2, %v4128_v54 }
  0x16   : > { %3790 = vmatprep.subr.bf16.mxu1 %v3789_v28  ;;  %3810 = vmatprep.subr.bf16.mxu0 %v3809_v18  ;;  %v291_v28 = vld [vmem:[%s4591_s1 + $0x100] sm:$0xff] }
  0x17   : > { %v3825_v30 = vpack.c.bf16 %v294_v29, %v291_v28  ;;  %v320_v17 = vrot.slane %v4134_v56, %v319_v16 }
  0x19   : > { %3792 = vmatpush1.bf16.msra.mxu1 %v3791_v33  ;;  %3812 = vmatpush3.bf16.msra.mxu0 %v3809_v18  ;;  %v3829_v33 = vpack.c.bf16 %v300_v32, %v297_v31 }
  0x1a   : > { %3794 = vmatprep.subr.bf16.mxu1 %v3793_v34  ;;  %3814 = vmatprep.subr.bf16.mxu0 %v3813_v21  ;;  %v303_v34 = vld [vmem:[%s4591_s1 + $0x160] sm:$0xff] }
  0x1b   : > { %v3833_v36 = vpack.c.bf16 %v306_v35, %v303_v34 }
  0x1d   : > { %3796 = vmatpush1.bf16.msra.mxu1 %v3795_v39  ;;  %3816 = vmatpush3.bf16.msra.mxu0 %v3813_v21 }
  0x1e   : > { %3798 = vmatprep.subr.bf16.mxu1 %v3797_v40  ;;  %3818 = vmatprep.subr.bf16.mxu0 %v3817_v24 }
  0x21   : > { %3800 = vmatpush1.bf16.msra.mxu1 %v3799_v45  ;;  %3820 = vmatpush3.bf16.msra.mxu0 %v3817_v24 }
  0x22   : > { %3802 = vmatprep.subr.bf16.mxu1 %v3801_v46 }
  0x25   : > { %3804 = vmatpush1.bf16.msra.mxu1 %v3803_v49 }
  0x26   : > { %3575 = vmatprep.subr.mxu1 %v3954_v7 }
  0x28   : > { %389 = vmatmul.mubr.f32.vlgmr.msra.gmra.mrb[0].mxu1 %v255_v26  ;;  %v288_v26 = vld [vmem:[%s4591_s1 + $0xe8] sm:$0xff] }
  0x29   : > { %394 = vmatprep.mubr.f32.mxu1 %v3954_v7  ;;  %v3821_v27 = vpack.c.bf16 %v288_v26, %v285_v25 }
  0x2b   : > { %3822 = vmatprep.subr.bf16.mxu0 %v3821_v27 }
  0x2c   : > { %395 = vmatmul.mubr.f32.gmra.mrb[2].mxu1 %v4113_v50  ;;  %3824 = vmatpush3.bf16.msra.mxu0 %v3821_v27 }
  0x2d   : > { %400 = vmatprep.mubr.f32.mxu1 %v3954_v7  ;;  %3826 = vmatprep.subr.bf16.mxu0 %v3825_v30 }
  0x30   : > { %401 = vmatmul.mubr.f32.gmra.mrb[4].mxu1 %v4118_v51  ;;  %3828 = vmatpush3.bf16.msra.mxu0 %v3825_v30 }
  0x31   : > { %406 = vmatprep.mubr.f32.mxu1 %v3954_v7  ;;  %3830 = vmatprep.subr.bf16.mxu0 %v3829_v33 }
  0x34   : > { %407 = vmatmul.mubr.f32.gmra.mrb[6].mxu1 %v4123_v52  ;;  %3832 = vmatpush3.bf16.msra.mxu0 %v3829_v33 }
  0x35   : > { %3577 = vmatprep.mubr.msk.f32.mxu1 %vm3955_vm0, %v3954_v7  ;;  %3834 = vmatprep.subr.bf16.mxu0 %v3833_v36 }
  0x38   : > { %3836 = vmatpush3.bf16.msra.mxu0 %v3833_v36 }
  0x39   : > { %3605 = vmatprep.subr.mxu0 %v3954_v7 }
  0x3b   : > { %3570 = vmatmul.mubr.f32.vlgmr.msra.gmra.mrb[0].mxu0 %v4113_v50 }
  0x3c   : > { %3572 = vmatprep.mubr.f32.mxu0 %v4118_v51 }
  0x3f   : > { %3573 = vmatmul.mubr.f32.gmra.mrb[2].mxu0 %v4123_v52 }
  0x40   : > { %3607 = vmatprep.mubr.msk.f32.mxu0 %vm3955_vm0, %v3954_v7 }
  0xfb   : > { %v390_v59 = vpop.f32.mrb[0].mxu1 }
  0xfc   : > { %v392_v61 = vpop.f32.mrb[1].mxu1  ;;  %v4143_v0 = vadd.f32 %v390_v59, %v312_v60 }
  0xfd   : > { %v4139_v62 = vadd.f32 %v392_v61, %v316_v58 }
  0xff   : > { %v396_v63 = vpop.f32.mrb[2].mxu1  ;;  %3576 = vmatpush3.xpose.msk.msra.mxu1 %vm499_vm1, %v4139_v62 }
 0x100   : > { %v398_v1 = vpop.f32.mrb[3].mxu1  ;;  %3580 = vmatprep.subr.mxu1 %v3954_v7  ;;  %v4154_v4 = vadd.f32 %v396_v63, %v312_v60 }
 0x101   : > { %v4146_v2 = vadd.f32 %v398_v1, %v316_v58 }
 0x102   : > { %3578 = vmatmul.mubr.msk.f32.vlgmr.msra.gmra.mrb[8].mxu1 %vm499_vm1, %v4143_v0 }
 0x103   : > { %v402_v3 = vpop.f32.mrb[4].mxu1  ;;  %3581 = vmatpush3.xpose.msk.msra.mxu1 %vm499_vm1, %v4146_v2  ;;  %3582 = vmatprep.mubr.msk.f32.mxu1 %vm3955_vm0, %v3954_v7 }
 0x104   : > { %v404_v5 = vpop.f32.mrb[5].mxu1  ;;  %3585 = vmatprep.subr.mxu1 %v3954_v7  ;;  %v4159_v8 = vadd.f32 %v402_v3, %v312_v60 }
 0x105   : > { %v4157_v6 = vadd.f32 %v404_v5, %v316_v58 }
 0x106   : > { %3583 = vmatmul.mubr.msk.f32.vlgmr.msra.gmra.mrb[10].mxu1 %vm499_vm1, %v4154_v4 }
 0x107   : > { %v408_v9 = vpop.f32.mrb[6].mxu1  ;;  %3586 = vmatpush3.xpose.msk.msra.mxu1 %vm499_vm1, %v4157_v6  ;;  %3587 = vmatprep.mubr.msk.f32.mxu1 %vm3955_vm0, %v3954_v7 }
 0x108   : > { %v410_v10 = vpop.f32.mrb[7].mxu1  ;;  %3590 = vmatprep.subr.mxu1 %v3954_v7  ;;  %v4170_v12 = vadd.f32 %v408_v9, %v312_v60 }
 0x109   : > { %v4168_v11 = vadd.f32 %v410_v10, %v316_v58 }
 0x10a   : > { %3588 = vmatmul.mubr.msk.f32.vlgmr.msra.gmra.mrb[12].mxu1 %vm499_vm1, %v4159_v8 }
 0x10b   : > { %3591 = vmatpush3.xpose.msk.msra.mxu1 %vm499_vm1, %v4168_v11  ;;  %3592 = vmatprep.mubr.msk.f32.mxu1 %vm3955_vm0, %v3954_v7 }
 0x10c   : > { %3595 = vmatprep.subr.mxu1 %v3954_v7 }
 0x10e   : > { %3593 = vmatmul.mubr.msk.f32.vlgmr.msra.gmra.mrb[14].mxu1 %vm499_vm1, %v4170_v12  ;;  %v3571_v18 = vpop.f32.mrb[0].mxu0 }
 0x10f   : > { %3597 = vmatprep.mubr.msk.f32.mxu1 %vm3955_vm0, %v3954_v7  ;;  %v479_v19 = vpop.f32.mrb[1].mxu0  ;;  %v4259_v54 = vadd.f32 %v3571_v18, %v320_v17 }
 0x110   : > { %v4251_v20 = vadd.f32 %v479_v19, %v320_v17 }
 0x112   : > { %v3574_v21 = vpop.f32.mrb[2].mxu0  ;;  %3596 = vmatpush3.msra.mxu1 %v4251_v20 }
 0x113   : > { %v489_v22 = vpop.f32.mrb[3].mxu0  ;;  %3600 = vmatprep.subr.mxu1 %v3954_v7  ;;  %v4267_v56 = vadd.f32 %v3574_v21, %v320_v17 }
 0x114   : > { %v4255_v23 = vadd.f32 %v489_v22, %v320_v17 }
 0x116   : > { %3606 = vmatpush3.msra.mxu0 %v4255_v23 }
 0x117   : > { %3615 = vmatprep.subr.mxu0 %v3954_v7 }
 0x1d5   : > { %v572_v38 = vpop.f32.mrb[8].mxu1 }
 0x1d6   : > { %v573_v39 = vadd.f32 %v572_v38, %v498_v37  ;;  %v3579_v40 = vpop.f32.mrb[9].mxu1 }
 0x1d8   : > { %v805_v41 = vsel %vm804_vm2, %v573_v39, -inf }
 0x1d9   : > { %806 = vmax.xlane.f32.xlu0 %v805_v41  ;;  %v648_v42 = vpop.f32.mrb[10].mxu1 }
 0x1da   : > { %v649_v43 = vadd.f32 %v648_v42, %v498_v37  ;;  %v3584_v44 = vpop.f32.mrb[11].mxu1 }
 0x1dc   : > { %v808_v45 = vsel %vm804_vm2, %v649_v43, -inf }
 0x1dd   : > { %809 = vmax.xlane.f32.xlu0 %v808_v45  ;;  %v724_v46 = vpop.f32.mrb[12].mxu1 }
 0x1de   : > { %v725_v47 = vadd.f32 %v724_v46, %v498_v37  ;;  %v3589_v48 = vpop.f32.mrb[13].mxu1 }
 0x1e0   : > { %v811_v49 = vsel %vm804_vm2, %v725_v47, -inf }
 0x1e1   : > { %812 = vmax.xlane.f32.xlu1 %v811_v49  ;;  %v800_v50 = vpop.f32.mrb[14].mxu1 }
 0x1e2   : > { %v801_v51 = vadd.f32 %v800_v50, %v498_v37  ;;  %v3594_v52 = vpop.f32.mrb[15].mxu1 }
 0x1e4   : > { %v814_v53 = vsel %vm804_vm2, %v801_v51, -inf }
 0x1e5   : > { %815 = vmax.xlane.f32.xlu1 %v814_v53 }
 0x266   : > { %v807_v55 = vpop.xlane.xlu0 %806 }
 0x267   : > { %v817_v57 = vsub.f32 %v573_v39, %v807_v55 }
 0x269   : > { %v821_v58 = vmul.f32 1.442695, %v817_v57  ;;  %v3391_v57 = vld [vmem:[%s4593_s3 + $0x8] sm:$0xff] }
 0x26a   : > { %v810_v59 = vpop.xlane.xlu0 %809 }
 0x26b   : > { %3882 = vpow2.f32 %v821_v58  ;;  %v818_v60 = vsub.f32 %v649_v43, %v810_v59 }
 0x26d   : > { %v823_v61 = vmul.f32 1.442695, %v818_v60 }
 0x26e   : > { %v813_v63 = vpop.xlane.xlu1 %812 }
 0x26f   : > { %3884 = vpow2.f32 %v823_v61  ;;  %v819_v1 = vsub.f32 %v725_v47, %v813_v63 }
 0x271   : > { %v825_v3 = vmul.f32 1.442695, %v819_v1 }
 0x272   : > { %v816_v24 = vpop.xlane.xlu1 %815 }
 0x273   : > { %3886 = vpow2.f32 %v825_v3  ;;  %v820_v25 = vsub.f32 %v801_v51, %v816_v24 }
 0x275   : > { %v3883_v5 = vpop.eup %3882  ;;  %v827_v26 = vmul.f32 1.442695, %v820_v25 }
 0x276   : > { %v829_v9 = vsel %vm804_vm2, %v3883_v5, 0.0 }
 0x277   : > { %830 = vadd.xlane.f32.xlu0 %v829_v9  ;;  %3888 = vpow2.f32 %v827_v26 }
 0x279   : > { %v3885_v10 = vpop.eup %3884 }
 0x27a   : > { %v832_v13 = vsel %vm804_vm2, %v3885_v10, 0.0 }
 0x27b   : > { %833 = vadd.xlane.f32.xlu1 %v832_v13 }
 0x27d   : > { %v3887_v14 = vpop.eup %3886 }
 0x27e   : > { %v835_v15 = vsel %vm804_vm2, %v3887_v14, 0.0 }
 0x27f   : > { %836 = vadd.xlane.f32.xlu0 %v835_v15 }
 0x281   : > { %v3889_v27 = vpop.eup %3888 }
 0x282   : > { %v838_v28 = vsel %vm804_vm2, %v3889_v27, 0.0 }
 0x28c   : > { %1227 = vrot.lane.b32.xlu1 %v4146_v2, %s3956_s20 }
 0x290   : > { %1147 = vrot.lane.b32.xlu1 %v4143_v0, %s3956_s20 }
 0x294   : > { %1225 = vrot.lane.b32.xlu1 %v4154_v4, %s3956_s20 }
 0x295   : > { %1149 = vrot.lane.b32.xlu0 %v4139_v62, %s3956_s20 }
 0x299   : > { %1305 = vrot.lane.b32.xlu0 %v4157_v6, %s3956_s20 }
 0x29d   : > { %1303 = vrot.lane.b32.xlu0 %v4159_v8, %s3956_s20 }
 0x2b8   : > { %839 = vadd.xlane.f32.xlu1 %v838_v28 }
 0x2c9   : > { %1383 = vrot.lane.b32.xlu1 %v4168_v11, %s3956_s20 }
 0x2cd   : > { %1381 = vrot.lane.b32.xlu1 %v4170_v12, %s3956_s20 }
 0x304   : > { %v831_v29 = vpop.xlane.xlu0 %830 }
 0x305   : > { %3890 = vrcp.f32 %v831_v29 }
 0x308   : > { %v834_v30 = vpop.xlane.xlu1 %833 }
 0x309   : > { %3892 = vrcp.f32 %v834_v30 }
 0x30c   : > { %v837_v31 = vpop.xlane.xlu0 %836  ;;  %v1228_v38 = vpop.permute.xlu1 %1227 }
 0x30d   : > { %3894 = vrcp.f32 %v837_v31 }
 0x30f   : > { %v3891_v32 = vpop.eup %3890 }
 0x310   : > { %v845_v33 = vmul.f32 %v3891_v32, %v3883_v5  ;;  %v1150_v36 = vpop.permute.xlu0 %1149  ;;  %v1148_v41 = vpop.permute.xlu1 %1147 }
 0x312   : > { %3598 = vmatmul.mubr.msk.f32.vlgmr.msra.gmra.mrb[16].mxu1 %vm804_vm2, %v845_v33 }
 0x313   : > { %v3893_v34 = vpop.eup %3892  ;;  %3601 = vmatpush3.msra.mxu1 %v4259_v54  ;;  %3602 = vmatprep.mubr.msk.f32.mxu1 %vm3955_vm0, %v3954_v7 }
 0x314   : > { %v846_v35 = vmul.f32 %v3893_v34, %v3885_v10  ;;  %3610 = vmatprep.subr.mxu1 %v3954_v7  ;;  %v1306_v40 = vpop.permute.xlu0 %1305  ;;  %v1226_v43 = vpop.permute.xlu1 %1225 }
 0x316   : > { %3603 = vmatmul.mubr.msk.f32.vlgmr.msra.gmra.mrb[18].mxu1 %vm804_vm2, %v846_v35 }
 0x317   : > { %v3895_v37 = vpop.eup %3894  ;;  %3611 = vmatpush3.msra.mxu1 %v4267_v56  ;;  %3612 = vmatprep.mubr.msk.f32.mxu1 %vm3955_vm0, %v3954_v7 }
 0x318   : > { %v847_v39 = vmul.f32 %v3895_v37, %v3887_v14  ;;  %3620 = vmatprep.subr.mxu1 %v3954_v7  ;;  %v1304_v42 = vpop.permute.xlu0 %1303 }
 0x31a   : > { %3608 = vmatmul.mubr.msk.f32.vlgmr.msra.gmra.mrb[4].mxu0 %vm804_vm2, %v847_v39 }
 0x31b   : > { %3616 = vmatpush3.xpose.msk.msra.mxu0 %vm499_vm1, %v1150_v36  ;;  %3617 = vmatprep.mubr.msk.f32.mxu0 %vm3955_vm0, %v3954_v7 }
 0x31c   : > { %3625 = vmatprep.subr.mxu0 %v3954_v7 }
 0x31e   : > { %3618 = vmatmul.mubr.msk.f32.vlgmr.msra.gmra.mrb[6].mxu0 %vm499_vm1, %v1148_v41 }
 0x31f   : > { %3626 = vmatpush3.xpose.msk.msra.mxu0 %vm499_vm1, %v1306_v40  ;;  %3627 = vmatprep.mubr.msk.f32.mxu0 %vm3955_vm0, %v3954_v7 }
 0x320   : > { %3635 = vmatprep.subr.mxu0 %v3954_v7 }
 0x322   : > { %3628 = vmatmul.mubr.msk.f32.vlgmr.msra.gmra.mrb[8].mxu0 %vm499_vm1, %v1304_v42 }
 0x323   : > { %3637 = vmatprep.mubr.msk.f32.mxu0 %vm3955_vm0, %v3954_v7 }
 0x345   : > { %v840_v44 = vpop.xlane.xlu1 %839 }
 0x346   : > { %3896 = vrcp.f32 %v840_v44 }
 0x349   : > { %v1384_v47 = vpop.permute.xlu1 %1383 }
 0x34d   : > { %v1382_v48 = vpop.permute.xlu1 %1381 }
 0x350   : > { %v3897_v45 = vpop.eup %3896 }
 0x351   : > { %v848_v46 = vmul.f32 %v3897_v45, %v3889_v27 }
 0x353   : > { %3613 = vmatmul.mubr.msk.f32.vlgmr.msra.gmra.mrb[20].mxu1 %vm804_vm2, %v848_v46 }
 0x354   : > { %3621 = vmatpush3.xpose.msk.msra.mxu1 %vm499_vm1, %v1228_v38  ;;  %3622 = vmatprep.mubr.msk.f32.mxu1 %vm3955_vm0, %v3954_v7 }
 0x355   : > { %3630 = vmatprep.subr.mxu1 %v3954_v7 }
 0x357   : > { %3623 = vmatmul.mubr.msk.f32.vlgmr.msra.gmra.mrb[22].mxu1 %vm499_vm1, %v1226_v43 }
 0x358   : > { %3631 = vmatpush3.xpose.msk.msra.mxu1 %vm499_vm1, %v1384_v47  ;;  %3632 = vmatprep.mubr.msk.f32.mxu1 %vm3955_vm0, %v3954_v7 }
 0x359   : > { %3640 = vmatprep.subr.mxu1 %v3954_v7 }
 0x35b   : > { %3633 = vmatmul.mubr.msk.f32.vlgmr.msra.gmra.mrb[24].mxu1 %vm499_vm1, %v1382_v48 }
 0x35c   : > { %3642 = vmatprep.mubr.msk.f32.mxu1 %vm3955_vm0, %v3954_v7 }
 0x3e5   : > { %v918_v49 = vpop.f32.mrb[16].mxu1 }
 0x3e6   : > { %1141 = vst.msk [vmem:[#allocation2] sm:$0xff] %vm499_vm1, %v918_v49  ;;  %v3599_v50 = vpop.f32.mrb[17].mxu1 }
 0x3e9   : > { %v991_v51 = vpop.f32.mrb[18].mxu1 }
 0x3ea   : > { %1142 = vst.msk [vmem:[#allocation2 + $0x8] sm:$0xff] %vm499_vm1, %v991_v51  ;;  %v3604_v52 = vpop.f32.mrb[19].mxu1 }
 0x3ed   : > { %v1064_v53 = vpop.f32.mrb[4].mxu0 }
 0x3ee   : > { %1143 = vst.msk [vmem:[#allocation2 + $0x10] sm:$0xff] %vm499_vm1, %v1064_v53  ;;  %v3609_v55 = vpop.f32.mrb[5].mxu0 }
 0x3f1   : > { %v1221_v58 = vpop.f32.mrb[6].mxu0 }
 0x3f2   : > { %v1222_v59 = vadd.f32 %v3391_v57, %v1221_v58  ;;  %v3619_v60 = vpop.f32.mrb[7].mxu0 }
 0x3f4   : > { %v1459_v61 = vsel %vm804_vm2, %v1222_v59, -inf }
 0x3f5   : > { %1460 = vmax.xlane.f32.xlu0 %v1459_v61  ;;  %v1377_v63 = vpop.f32.mrb[8].mxu0 }
 0x3f6   : > { %v1378_v1 = vadd.f32 %v3391_v57, %v1377_v63  ;;  %v3629_v3 = vpop.f32.mrb[9].mxu0 }
 0x3f8   : > { %v1465_v5 = vsel %vm804_vm2, %v1378_v1, -inf }
 0x3f9   : > { %1466 = vmax.xlane.f32.xlu0 %v1465_v5 }
 0x426   : > { %v1137_v9 = vpop.f32.mrb[20].mxu1 }
 0x427   : > { %1144 = vst.msk [vmem:[#allocation2 + $0x18] sm:$0xff] %vm499_vm1, %v1137_v9  ;;  %v3614_v10 = vpop.f32.mrb[21].mxu1 }
 0x42a   : > { %v1299_v13 = vpop.f32.mrb[22].mxu1 }
 0x42b   : > { %v1300_v14 = vadd.f32 %v3391_v57, %v1299_v13  ;;  %v3624_v15 = vpop.f32.mrb[23].mxu1 }
 0x42d   : > { %v1462_v16 = vsel %vm804_vm2, %v1300_v14, -inf }
 0x42e   : > { %1463 = vmax.xlane.f32.xlu1 %v1462_v16  ;;  %v1455_v17 = vpop.f32.mrb[24].mxu1 }
 0x42f   : > { %v1456_v18 = vadd.f32 %v3391_v57, %v1455_v17  ;;  %v3634_v19 = vpop.f32.mrb[25].mxu1 }
 0x431   : > { %v1468_v21 = vsel %vm804_vm2, %v1456_v18, -inf }
 0x432   : > { %1469 = vmax.xlane.f32.xlu0 %v1468_v21  ;;  %v3404_v21 = vld [vmem:[%s4593_s3 + $0x10] sm:$0xff] }
 0x43f   : > { %1581 = vrot.lane.b32.xlu1 %v4259_v54, %s3956_s20 }
 0x443   : > { %1658 = vrot.lane.b32.xlu1 %v4255_v23, %s3956_s20 }
 0x447   : > { %1735 = vrot.lane.b32.xlu1 %v4267_v56, %s3956_s20 }
 0x448   : > { %1504 = vrot.lane.b32.xlu0 %v4251_v20, %s3956_s20 }
 0x44b   : > { %1914 = vrot.lane.b32.xlu1 %v4146_v2, %s3957_s24 }
 0x44c   : > { %1836 = vrot.lane.b32.xlu0 %v4139_v62, %s3957_s24 }
 0x482   : > { %v1461_v22 = vpop.xlane.xlu0 %1460 }
 0x483   : > { %v1471_v24 = vsub.f32 %v1222_v59, %v1461_v22 }
 0x485   : > { %v1475_v25 = vmul.f32 1.442695, %v1471_v24 }
 0x486   : > { %v1467_v26 = vpop.xlane.xlu0 %1466 }
 0x487   : > { %3898 = vpow2.f32 %v1475_v25  ;;  %v1473_v27 = vsub.f32 %v1378_v1, %v1467_v26 }
 0x489   : > { %v1479_v28 = vmul.f32 1.442695, %v1473_v27 }
 0x48b   : > { %3900 = vpow2.f32 %v1479_v28 }
 0x491   : > { %v3899_v29 = vpop.eup %3898 }
 0x492   : > { %v1483_v30 = vsel %vm804_vm2, %v3899_v29, 0.0 }
 0x493   : > { %1484 = vadd.xlane.f32.xlu0 %v1483_v30 }
 0x495   : > { %v3901_v31 = vpop.eup %3900 }
 0x496   : > { %v1489_v32 = vsel %vm804_vm2, %v3901_v31, 0.0 }
 0x497   : > { %1490 = vadd.xlane.f32.xlu0 %v1489_v32 }
 0x4ad   : > { %1834 = vrot.lane.b32.xlu0 %v4143_v0, %s3957_s24 }
 0x4b1   : > { %1992 = vrot.lane.b32.xlu0 %v4157_v6, %s3957_s24 }
 0x4b5   : > { %1990 = vrot.lane.b32.xlu0 %v4159_v8, %s3957_s24 }
 0x4b9   : > { %2190 = vrot.lane.b32.xlu0 %v4251_v20, %s3957_s24 }
 0x4bb   : > { %v1464_v33 = vpop.xlane.xlu1 %1463 }
 0x4bc   : > { %v1472_v34 = vsub.f32 %v1300_v14, %v1464_v33 }
 0x4be   : > { %v1477_v35 = vmul.f32 1.442695, %v1472_v34 }
 0x4bf   : > { %v1582_v36 = vpop.permute.xlu1 %1581  ;;  %v1470_v37 = vpop.xlane.xlu0 %1469 }
 0x4c0   : > { %3902 = vpow2.f32 %v1477_v35  ;;  %3641 = vmatpush3.msra.mxu1 %v1582_v36  ;;  %v1474_v41 = vsub.f32 %v1456_v18, %v1470_v37 }
 0x4c1   : > { %3650 = vmatprep.subr.mxu1 %v3954_v7 }
 0x4c2   : > { %v1481_v42 = vmul.f32 1.442695, %v1474_v41 }
 0x4c3   : > { %v1505_v38 = vpop.permute.xlu0 %1504  ;;  %v1659_v51 = vpop.permute.xlu1 %1658 }
 0x4c4   : > { %3636 = vmatpush3.msra.mxu0 %v1505_v38  ;;  %3904 = vpow2.f32 %v1481_v42 }
 0x4c5   : > { %3645 = vmatprep.subr.mxu0 %v3954_v7 }
 0x4c7   : > { %v1837_v45 = vpop.permute.xlu0 %1836  ;;  %v1736_v59 = vpop.permute.xlu1 %1735 }
 0x4ca   : > { %v3903_v39 = vpop.eup %3902 }
 0x4cb   : > { %v1486_v40 = vsel %vm804_vm2, %v3903_v39, 0.0  ;;  %v1915_v60 = vpop.permute.xlu1 %1914 }
 0x4cc   : > { %1487 = vadd.xlane.f32.xlu1 %v1486_v40 }
 0x4ce   : > { %v3905_v43 = vpop.eup %3904 }
 0x4cf   : > { %v1492_v44 = vsel %vm804_vm2, %v3905_v43, 0.0 }
 0x4dd   : > { %1912 = vrot.lane.b32.xlu1 %v4154_v4, %s3957_s24 }
 0x501   : > { %1493 = vadd.xlane.f32.xlu1 %v1492_v44 }
 0x512   : > { %2070 = vrot.lane.b32.xlu1 %v4168_v11, %s3957_s24 }
 0x516   : > { %2068 = vrot.lane.b32.xlu1 %v4170_v12, %s3957_s24 }
 0x51a   : > { %2266 = vrot.lane.b32.xlu1 %v4259_v54, %s3957_s24 }
 0x51e   : > { %2342 = vrot.lane.b32.xlu1 %v4255_v23, %s3957_s24 }
 0x520   : > { %v1485_v46 = vpop.xlane.xlu0 %1484 }
 0x521   : > { %3906 = vrcp.f32 %v1485_v46 }
 0x522   : > { %2418 = vrot.lane.b32.xlu1 %v4267_v56, %s3957_s24 }
 0x524   : > { %v1491_v47 = vpop.xlane.xlu0 %1490 }
 0x525   : > { %3908 = vrcp.f32 %v1491_v47 }
 0x528   : > { %v1835_v49 = vpop.permute.xlu0 %1834 }
 0x52b   : > { %v3907_v48 = vpop.eup %3906 }
 0x52c   : > { %v1499_v50 = vmul.f32 %v3907_v48, %v3899_v29  ;;  %v1993_v55 = vpop.permute.xlu0 %1992 }
 0x52e   : > { %3638 = vmatmul.mubr.msk.f32.vlgmr.msra.gmra.mrb[10].mxu0 %vm804_vm2, %v1499_v50 }
 0x52f   : > { %v3909_v52 = vpop.eup %3908  ;;  %3646 = vmatpush3.msra.mxu0 %v1659_v51  ;;  %3647 = vmatprep.mubr.msk.f32.mxu0 %vm3955_vm0, %v3954_v7 }
 0x530   : > { %v1501_v53 = vmul.f32 %v3909_v52, %v3901_v31  ;;  %3655 = vmatprep.subr.mxu0 %v3954_v7  ;;  %v1991_v57 = vpop.permute.xlu0 %1990 }
 0x532   : > { %3648 = vmatmul.mubr.msk.f32.vlgmr.msra.gmra.mrb[12].mxu0 %vm804_vm2, %v1501_v53 }
 0x533   : > { %3657 = vmatprep.mubr.msk.f32.mxu0 %vm3955_vm0, %v3954_v7 }
 0x534   : > { %v2191_v58 = vpop.permute.xlu0 %2190 }
 0x536   : > { %3656 = vmatpush3.xpose.msk.msra.mxu0 %vm499_vm1, %v1837_v45 }
 0x537   : > { %3665 = vmatprep.subr.mxu0 %v3954_v7 }
 0x539   : > { %3658 = vmatmul.mubr.msk.f32.vlgmr.msra.gmra.mrb[14].mxu0 %vm499_vm1, %v1835_v49 }
 0x53a   : > { %3666 = vmatpush3.xpose.msk.msra.mxu0 %vm499_vm1, %v1993_v55  ;;  %3667 = vmatprep.mubr.msk.f32.mxu0 %vm3955_vm0, %v3954_v7 }
 0x53b   : > { %3675 = vmatprep.subr.mxu0 %v3954_v7 }
 0x53d   : > { %3668 = vmatmul.mubr.msk.f32.vlgmr.msra.gmra.mrb[16].mxu0 %vm499_vm1, %v1991_v57 }
 0x53e   : > { %3676 = vmatpush3.msra.mxu0 %v2191_v58  ;;  %3677 = vmatprep.mubr.msk.f32.mxu0 %vm3955_vm0, %v3954_v7 }
 0x53f   : > { %3685 = vmatprep.subr.mxu0 %v3954_v7 }
 0x559   : > { %v1488_v61 = vpop.xlane.xlu1 %1487 }
 0x55a   : > { %3910 = vrcp.f32 %v1488_v61 }
 0x55d   : > { %v1913_v3 = vpop.permute.xlu1 %1912 }
 0x564   : > { %v3911_v63 = vpop.eup %3910 }
 0x565   : > { %v1500_v1 = vmul.f32 %v3911_v63, %v3903_v39 }
 0x567   : > { %3643 = vmatmul.mubr.msk.f32.vlgmr.msra.gmra.mrb[26].mxu1 %vm804_vm2, %v1500_v1 }
 0x568   : > { %3651 = vmatpush3.msra.mxu1 %v1736_v59  ;;  %3652 = vmatprep.mubr.msk.f32.mxu1 %vm3955_vm0, %v3954_v7 }
 0x569   : > { %3660 = vmatprep.subr.mxu1 %v3954_v7 }
 0x58e   : > { %v1494_v5 = vpop.xlane.xlu1 %1493 }
 0x58f   : > { %3912 = vrcp.f32 %v1494_v5 }
 0x592   : > { %v2071_v9 = vpop.permute.xlu1 %2070 }
 0x596   : > { %v2069_v14 = vpop.permute.xlu1 %2068 }
 0x599   : > { %v3913_v10 = vpop.eup %3912 }
 0x59a   : > { %v1502_v13 = vmul.f32 %v3913_v10, %v3905_v43  ;;  %v2267_v15 = vpop.permute.xlu1 %2266 }
 0x59c   : > { %3653 = vmatmul.mubr.msk.f32.vlgmr.msra.gmra.mrb[28].mxu1 %vm804_vm2, %v1502_v13 }
 0x59d   : > { %3661 = vmatpush3.xpose.msk.msra.mxu1 %vm499_vm1, %v1915_v60  ;;  %3662 = vmatprep.mubr.msk.f32.mxu1 %vm3955_vm0, %v3954_v7 }
 0x59e   : > { %3670 = vmatprep.subr.mxu1 %v3954_v7 }
 0x5a0   : > { %3663 = vmatmul.mubr.msk.f32.vlgmr.msra.gmra.mrb[30].mxu1 %vm499_vm1, %v1913_v3 }
 0x5a1   : > { %3671 = vmatpush3.xpose.msk.msra.mxu1 %vm499_vm1, %v2071_v9  ;;  %3672 = vmatprep.mubr.msk.f32.mxu1 %vm3955_vm0, %v3954_v7 }
 0x5a2   : > { %3680 = vmatprep.subr.mxu1 %v3954_v7 }
 0x5a4   : > { %3673 = vmatmul.mubr.msk.f32.vlgmr.msra.gmra.mrb[32].mxu1 %vm499_vm1, %v2069_v14 }
 0x5a5   : > { %3681 = vmatpush3.msra.mxu1 %v2267_v15  ;;  %3682 = vmatprep.mubr.msk.f32.mxu1 %vm3955_vm0, %v3954_v7 }
 0x5a6   : > { %3690 = vmatprep.subr.mxu1 %v3954_v7 }
 0x601   : > { %v4399_v16 = vpop.f32.mrb[10].mxu0 }
 0x602   : > { %v3639_v17 = vpop.f32.mrb[11].mxu0 }
 0x605   : > { %v4401_v18 = vpop.f32.mrb[12].mxu0 }
 0x606   : > { %v3649_v19 = vpop.f32.mrb[13].mxu0 }
 0x60c   : > { %v1908_v22 = vpop.f32.mrb[14].mxu0 }
 0x60d   : > { %v1909_v24 = vadd.f32 %v3404_v21, %v1908_v22  ;;  %v3659_v25 = vpop.f32.mrb[15].mxu0 }
 0x60f   : > { %v2146_v26 = vsel %vm804_vm2, %v1909_v24, -inf }
 0x610   : > { %2147 = vmax.xlane.f32.xlu0 %v2146_v26  ;;  %v2064_v27 = vpop.f32.mrb[16].mxu0 }
 0x611   : > { %v2065_v28 = vadd.f32 %v3404_v21, %v2064_v27  ;;  %v3669_v29 = vpop.f32.mrb[17].mxu0 }
 0x613   : > { %v2152_v30 = vsel %vm804_vm2, %v2065_v28, -inf }
 0x614   : > { %2153 = vmax.xlane.f32.xlu0 %v2152_v30 }
 0x63a   : > { %v4408_v31 = vpop.f32.mrb[26].mxu1 }
 0x63b   : > { %v3644_v32 = vpop.f32.mrb[27].mxu1 }
 0x66f   : > { %v4410_v33 = vpop.f32.mrb[28].mxu1 }
 0x670   : > { %v3654_v34 = vpop.f32.mrb[29].mxu1 }
 0x671   : > { %v3417_v34 = vld [vmem:[%s4593_s3 + $0x18] sm:$0xff] }
 0x673   : > { %v1986_v35 = vpop.f32.mrb[30].mxu1 }
 0x674   : > { %v1987_v36 = vadd.f32 %v3404_v21, %v1986_v35  ;;  %v3664_v37 = vpop.f32.mrb[31].mxu1 }
 0x676   : > { %v2149_v38 = vsel %vm804_vm2, %v1987_v36, -inf }
 0x677   : > { %2150 = vmax.xlane.f32.xlu1 %v2149_v38  ;;  %v2142_v39 = vpop.f32.mrb[32].mxu1 }
 0x678   : > { %v2143_v40 = vadd.f32 %v3404_v21, %v2142_v39  ;;  %v3674_v41 = vpop.f32.mrb[33].mxu1 }
 0x67a   : > { %v2155_v42 = vsel %vm804_vm2, %v2143_v40, -inf }
 0x67b   : > { %2156 = vmax.xlane.f32.xlu0 %v2155_v42 }
 0x688   : > { %2597 = vrot.lane.b32.xlu1 %v4146_v2, %s3958_s28 }
 0x68c   : > { %2595 = vrot.lane.b32.xlu1 %v4154_v4, %s3958_s28 }
 0x691   : > { %2519 = vrot.lane.b32.xlu0 %v4139_v62, %s3958_s28  ;;  %v2343_v62 = vpop.permute.xlu1 %2342 }
 0x695   : > { %v2419_v51 = vpop.permute.xlu1 %2418 }
 0x69d   : > { %v2148_v43 = vpop.xlane.xlu0 %2147 }
 0x69e   : > { %v2158_v44 = vsub.f32 %v1909_v24, %v2148_v43 }
 0x6a0   : > { %v2162_v45 = vmul.f32 1.442695, %v2158_v44 }
 0x6a1   : > { %v2154_v48 = vpop.xlane.xlu0 %2153 }
 0x6a2   : > { %3914 = vpow2.f32 %v2162_v45  ;;  %v2160_v49 = vsub.f32 %v2065_v28, %v2154_v48 }
 0x6a4   : > { %v2166_v2 = vmul.f32 1.442695, %v2160_v49 }
 0x6a6   : > { %3916 = vpow2.f32 %v2166_v2 }
 0x6ac   : > { %v3915_v46 = vpop.eup %3914 }
 0x6ad   : > { %v2170_v47 = vsel %vm804_vm2, %v3915_v46, 0.0 }
 0x6b0   : > { %2171 = vadd.xlane.f32.xlu0 %v2170_v47  ;;  %v3917_v50 = vpop.eup %3916 }
 0x6b1   : > { %v2176_v4 = vsel %vm804_vm2, %v3917_v50, 0.0 }
 0x6c6   : > { %2517 = vrot.lane.b32.xlu0 %v4143_v0, %s3958_s28 }
 0x6e5   : > { %2177 = vadd.xlane.f32.xlu0 %v2176_v4 }
 0x6fb   : > { %2675 = vrot.lane.b32.xlu0 %v4157_v6, %s3958_s28 }
 0x6ff   : > { %2673 = vrot.lane.b32.xlu0 %v4159_v8, %s3958_s28 }
 0x704   : > { %v2151_v52 = vpop.xlane.xlu1 %2150 }
 0x705   : > { %v2159_v53 = vsub.f32 %v1987_v36, %v2151_v52 }
 0x707   : > { %v2164_v55 = vmul.f32 1.442695, %v2159_v53 }
 0x708   : > { %v2157_v58 = vpop.xlane.xlu0 %2156  ;;  %v2598_v14 = vpop.permute.xlu1 %2597 }
 0x709   : > { %3918 = vpow2.f32 %v2164_v55  ;;  %v2161_v59 = vsub.f32 %v2143_v40, %v2157_v58 }
 0x70b   : > { %v2168_v60 = vmul.f32 1.442695, %v2161_v59 }
 0x70c   : > { %v2520_v61 = vpop.permute.xlu0 %2519  ;;  %v2596_v15 = vpop.permute.xlu1 %2595 }
 0x70d   : > { %3920 = vpow2.f32 %v2168_v60 }
 0x713   : > { %v3919_v0 = vpop.eup %3918 }
 0x714   : > { %v2173_v57 = vsel %vm804_vm2, %v3919_v0, 0.0 }
 0x715   : > { %2174 = vadd.xlane.f32.xlu1 %v2173_v57 }
 0x717   : > { %v3921_v8 = vpop.eup %3920 }
 0x718   : > { %v2179_v3 = vsel %vm804_vm2, %v3921_v8, 0.0 }
 0x726   : > { %2753 = vrot.lane.b32.xlu1 %v4168_v11, %s3958_s28 }
 0x73d   : > { %v2172_v6 = vpop.xlane.xlu0 %2171 }
 0x73e   : > { %3922 = vrcp.f32 %v2172_v6 }
 0x741   : > { %v2518_v11 = vpop.permute.xlu0 %2517 }
 0x748   : > { %v3923_v63 = vpop.eup %3922 }
 0x749   : > { %v2186_v1 = vmul.f32 %v3923_v63, %v3915_v46 }
 0x74a   : > { %2180 = vadd.xlane.f32.xlu1 %v2179_v3 }
 0x74b   : > { %3678 = vmatmul.mubr.msk.f32.vlgmr.msra.gmra.mrb[18].mxu0 %vm804_vm2, %v2186_v1 }
 0x74c   : > { %3686 = vmatpush3.msra.mxu0 %v2343_v62  ;;  %3687 = vmatprep.mubr.msk.f32.mxu0 %vm3955_vm0, %v3954_v7 }
 0x74d   : > { %3695 = vmatprep.subr.mxu0 %v3954_v7 }
 0x75b   : > { %2751 = vrot.lane.b32.xlu1 %v4170_v12, %s3958_s28 }
 0x772   : > { %v2178_v5 = vpop.xlane.xlu0 %2177 }
 0x773   : > { %3924 = vrcp.f32 %v2178_v5 }
 0x776   : > { %v2676_v13 = vpop.permute.xlu0 %2675 }
 0x77a   : > { %v2674_v12 = vpop.permute.xlu0 %2673 }
 0x77d   : > { %v3925_v9 = vpop.eup %3924 }
 0x77e   : > { %v2188_v10 = vmul.f32 %v3925_v9, %v3917_v50 }
 0x780   : > { %3688 = vmatmul.mubr.msk.f32.vlgmr.msra.gmra.mrb[20].mxu0 %vm804_vm2, %v2188_v10 }
 0x781   : > { %3696 = vmatpush3.xpose.msk.msra.mxu0 %vm499_vm1, %v2520_v61  ;;  %3697 = vmatprep.mubr.msk.f32.mxu0 %vm3955_vm0, %v3954_v7 }
 0x782   : > { %3705 = vmatprep.subr.mxu0 %v3954_v7 }
 0x784   : > { %3698 = vmatmul.mubr.msk.f32.vlgmr.msra.gmra.mrb[22].mxu0 %vm499_vm1, %v2518_v11 }
 0x785   : > { %3706 = vmatpush3.xpose.msk.msra.mxu0 %vm499_vm1, %v2676_v13  ;;  %3707 = vmatprep.mubr.msk.f32.mxu0 %vm3955_vm0, %v3954_v7 }
 0x786   : > { %3715 = vmatprep.subr.mxu0 %v3954_v7 }
 0x788   : > { %3708 = vmatmul.mubr.msk.f32.vlgmr.msra.gmra.mrb[24].mxu0 %vm499_vm1, %v2674_v12 }
 0x789   : > { %3717 = vmatprep.mubr.msk.f32.mxu0 %vm3955_vm0, %v3954_v7 }
 0x7a2   : > { %v2175_v17 = vpop.xlane.xlu1 %2174 }
 0x7a3   : > { %3926 = vrcp.f32 %v2175_v17 }
 0x7a6   : > { %v2754_v22 = vpop.permute.xlu1 %2753 }
 0x7ad   : > { %v3927_v19 = vpop.eup %3926 }
 0x7ae   : > { %v2187_v21 = vmul.f32 %v3927_v19, %v3919_v0 }
 0x7b0   : > { %3683 = vmatmul.mubr.msk.f32.vlgmr.msra.gmra.mrb[34].mxu1 %vm804_vm2, %v2187_v21 }
 0x7b1   : > { %3691 = vmatpush3.msra.mxu1 %v2419_v51  ;;  %3692 = vmatprep.mubr.msk.f32.mxu1 %vm3955_vm0, %v3954_v7 }
 0x7b2   : > { %3700 = vmatprep.subr.mxu1 %v3954_v7 }
 0x7d7   : > { %v2181_v24 = vpop.xlane.xlu1 %2180 }
 0x7d8   : > { %3928 = vrcp.f32 %v2181_v24 }
 0x7db   : > { %v2752_v27 = vpop.permute.xlu1 %2751 }
 0x7e2   : > { %v3929_v25 = vpop.eup %3928 }
 0x7e3   : > { %v2189_v26 = vmul.f32 %v3929_v25, %v3921_v8 }
 0x7e5   : > { %3693 = vmatmul.mubr.msk.f32.vlgmr.msra.gmra.mrb[36].mxu1 %vm804_vm2, %v2189_v26 }
 0x7e6   : > { %3701 = vmatpush3.xpose.msk.msra.mxu1 %vm499_vm1, %v2598_v14  ;;  %3702 = vmatprep.mubr.msk.f32.mxu1 %vm3955_vm0, %v3954_v7 }
 0x7e7   : > { %3710 = vmatprep.subr.mxu1 %v3954_v7 }
 0x7e9   : > { %3703 = vmatmul.mubr.msk.f32.vlgmr.msra.gmra.mrb[38].mxu1 %vm499_vm1, %v2596_v15 }
 0x7ea   : > { %3711 = vmatpush3.xpose.msk.msra.mxu1 %vm499_vm1, %v2754_v22  ;;  %3712 = vmatprep.mubr.msk.f32.mxu1 %vm3955_vm0, %v3954_v7 }
 0x7eb   : > { %3720 = vmatprep.subr.mxu1 %v3954_v7 }
 0x7ed   : > { %3713 = vmatmul.mubr.msk.f32.vlgmr.msra.gmra.mrb[40].mxu1 %vm499_vm1, %v2752_v27 }
 0x7ee   : > { %3722 = vmatprep.mubr.msk.f32.mxu1 %vm3955_vm0, %v3954_v7 }
 0x81e   : > { %v2262_v28 = vpop.f32.mrb[18].mxu0 }
 0x81f   : > { %v3679_v29 = vpop.f32.mrb[19].mxu0 }
 0x853   : > { %v2414_v30 = vpop.f32.mrb[20].mxu0 }
 0x854   : > { %v3689_v32 = vpop.f32.mrb[21].mxu0 }
 0x857   : > { %v2591_v35 = vpop.f32.mrb[22].mxu0 }
 0x858   : > { %v2592_v36 = vadd.f32 %v3417_v34, %v2591_v35  ;;  %v3699_v37 = vpop.f32.mrb[23].mxu0 }
 0x859   : > { %v3202_v37 = vld [vmem:[%s4594_s4] sm:$0xff] }
 0x85a   : > { %v2829_v38 = vsel %vm804_vm2, %v2592_v36, -inf }
 0x85b   : > { %2830 = vmax.xlane.f32.xlu0 %v2829_v38  ;;  %v2747_v39 = vpop.f32.mrb[24].mxu0  ;;  %v3203_v38 = vld [vmem:[%s4594_s4 + $0x8] sm:$0xff] }
 0x85c   : > { %v2748_v40 = vadd.f32 %v3417_v34, %v2747_v39  ;;  %v3709_v41 = vpop.f32.mrb[25].mxu0  ;;  %v3204_v39 = vld [vmem:[%s4594_s4 + $0x10] sm:$0xff] }
 0x85d   : > { %v3205_v41 = vld [vmem:[%s4594_s4 + $0x18] sm:$0xff] }
 0x85e   : > { %v2835_v42 = vsel %vm804_vm2, %v2748_v40, -inf }
 0x85f   : > { %2836 = vmax.xlane.f32.xlu0 %v2835_v42  ;;  %v3841_v42 = vpack.c.bf16 %v3205_v41, %v3204_v39 }
 0x883   : > { %v4473_v43 = vpop.f32.mrb[34].mxu1 }
 0x884   : > { %v3684_v44 = vpop.f32.mrb[35].mxu1 }
 0x885   : > { %v3207_v44 = vld [vmem:[%s4594_s4 + $0x28] sm:$0xff] }
 0x8b8   : > { %v4475_v45 = vpop.f32.mrb[36].mxu1 }
 0x8b9   : > { %v3694_v46 = vpop.f32.mrb[37].mxu1 }
 0x8ba   : > { %v3208_v46 = vld [vmem:[%s4594_s4 + $0x30] sm:$0xff] }
 0x8bc   : > { %v2669_v47 = vpop.f32.mrb[38].mxu1 }
 0x8bd   : > { %v2670_v48 = vadd.f32 %v3417_v34, %v2669_v47  ;;  %v3704_v49 = vpop.f32.mrb[39].mxu1  ;;  %v3209_v47 = vld [vmem:[%s4594_s4 + $0x38] sm:$0xff] }
 0x8be   : > { %v3210_v49 = vld [vmem:[%s4594_s4 + $0x40] sm:$0xff] }
 0x8bf   : > { %v2832_v2 = vsel %vm804_vm2, %v2670_v48, -inf }
 0x8c0   : > { %2833 = vmax.xlane.f32.xlu1 %v2832_v2  ;;  %v2825_v50 = vpop.f32.mrb[40].mxu1  ;;  %v3211_v2 = vld [vmem:[%s4594_s4 + $0x48] sm:$0xff] }
 0x8c1   : > { %v2826_v4 = vadd.f32 %v3417_v34, %v2825_v50  ;;  %v3714_v62 = vpop.f32.mrb[41].mxu1  ;;  %v3853_v50 = vpack.c.bf16 %v3211_v2, %v3210_v49 }
 0x8c2   : > { %v3213_v62 = vld [vmem:[%s4594_s4 + $0x58] sm:$0xff] }
 0x8c3   : > { %v2838_v51 = vsel %vm804_vm2, %v2826_v4, -inf }
 0x8c4   : > { %2839 = vmax.xlane.f32.xlu0 %v2838_v51 }
 0x8e8   : > { %v2831_v52 = vpop.xlane.xlu0 %2830 }
 0x8e9   : > { %v2841_v53 = vsub.f32 %v2592_v36, %v2831_v52  ;;  %v3214_v52 = vld [vmem:[%s4594_s4 + $0x60] sm:$0xff] }
 0x8eb   : > { %v2845_v55 = vmul.f32 1.442695, %v2841_v53  ;;  %v3215_v53 = vld [vmem:[%s4594_s4 + $0x68] sm:$0xff] }
 0x8ec   : > { %v2837_v0 = vpop.xlane.xlu0 %2836 }
 0x8ed   : > { %3930 = vpow2.f32 %v2845_v55  ;;  %v2843_v57 = vsub.f32 %v2748_v40, %v2837_v0  ;;  %v3837_v40 = vpack.c.bf16 %v3203_v38, %v3202_v37  ;;  %v3861_v55 = vpack.c.bf16 %v3215_v53, %v3214_v52  ;;  %v3216_v0 = vld [vmem:[%s4594_s4 + $0x70] sm:$0xff] }
 0x8ef   : > { %v2849_v58 = vmul.f32 1.442695, %v2843_v57  ;;  %v3217_v57 = vld [vmem:[%s4594_s4 + $0x78] sm:$0xff] }
 0x8f1   : > { %3932 = vpow2.f32 %v2849_v58  ;;  %v3865_v58 = vpack.c.bf16 %v3217_v57, %v3216_v0 }
 0x8f7   : > { %v3931_v59 = vpop.eup %3930 }
 0x8f8   : > { %v2853_v60 = vsel %vm804_vm2, %v3931_v59, 0.0 }
 0x8f9   : > { %2854 = vadd.xlane.f32.xlu0 %v2853_v60 }
 0x8fb   : > { %v3933_v61 = vpop.eup %3932 }
 0x8fc   : > { %v2859_v6 = vsel %vm804_vm2, %v3933_v61, 0.0 }
 0x8fd   : > { %2860 = vadd.xlane.f32.xlu0 %v2859_v6 }
 0x913   : > { %2873 = vrot.lane.b32.xlu0 %v4251_v20, %s3958_s28 }
 0x917   : > { %1815 = vrot.lane.b32.xlu0 %v4399_v16, %s3958_s28 }
 0x91b   : > { %2498 = vrot.lane.b32.xlu0 %v2262_v28, %s3957_s24 }
 0x91f   : > { %1819 = vrot.lane.b32.xlu0 %v4401_v18, %s3958_s28 }
 0x923   : > { %2502 = vrot.lane.b32.xlu0 %v2414_v30, %s3957_s24 }
 0x94d   : > { %v2834_v8 = vpop.xlane.xlu1 %2833 }
 0x94e   : > { %v2842_v63 = vsub.f32 %v2670_v48, %v2834_v8  ;;  %v3849_v48 = vpack.c.bf16 %v3209_v47, %v3208_v46 }
 0x950   : > { %v2847_v1 = vmul.f32 1.442695, %v2842_v63 }
 0x951   : > { %v2840_v20 = vpop.xlane.xlu0 %2839 }
 0x952   : > { %3934 = vpow2.f32 %v2847_v1  ;;  %v2844_v16 = vsub.f32 %v2826_v4, %v2840_v20  ;;  %v3212_v4 = vld [vmem:[%s4594_s4 + $0x50] sm:$0xff] }
 0x953   : > { %v3857_v51 = vpack.c.bf16 %v3213_v62, %v3212_v4 }
 0x954   : > { %v2851_v5 = vmul.f32 1.442695, %v2844_v16 }
 0x95c   : > { %v3935_v3 = vpop.eup %3934 }
 0x95d   : > { %v2856_v11 = vsel %vm804_vm2, %v3935_v3, 0.0 }
 0x95e   : > { %2857 = vadd.xlane.f32.xlu1 %v2856_v11 }
 0x96f   : > { %2949 = vrot.lane.b32.xlu1 %v4259_v54, %s3958_s28 }
 0x973   : > { %3025 = vrot.lane.b32.xlu1 %v4255_v23, %s3958_s28 }
 0x986   : > { %v2855_v18 = vpop.xlane.xlu0 %2854 }
 0x987   : > { %3936 = vrcp.f32 %v2855_v18 }
 0x988   : > { %3938 = vpow2.f32 %v2851_v5 }
 0x98a   : > { %v2861_v9 = vpop.xlane.xlu0 %2860 }
 0x98b   : > { %3940 = vrcp.f32 %v2861_v9 }
 0x98e   : > { %v2874_v10 = vpop.permute.xlu0 %2873 }
 0x98f   : > { %3716 = vmatpush3.msra.mxu0 %v2874_v10  ;;  %v3430_v10 = vld [vmem:[%s4595_s5] ss:$0 sm:$0xff] }
 0x990   : > { %3725 = vmatprep.subr.mxu0 %v3954_v7 }
 0x991   : > { %v3937_v13 = vpop.eup %3936 }
 0x992   : > { %v2869_v12 = vmul.f32 %v3937_v13, %v3931_v59  ;;  %v1816_v14 = vpop.permute.xlu0 %1815  ;;  %v3939_v15 = vpop.eup %3938 }
 0x993   : > { %1828 = vst.msk [vmem:[#allocation2] sm:$0xff] %vm1827_vm3, %v1816_v14  ;;  %v2862_v54 = vsel %vm804_vm2, %v3939_v15, 0.0 }
 0x994   : > { %3718 = vmatmul.mubr.msk.f32.vlgmr.msra.gmra.mrb[26].mxu0 %vm804_vm2, %v2869_v12 }
 0x995   : > { %3727 = vmatprep.mubr.msk.f32.mxu0 %vm3955_vm0, %v3954_v7  ;;  %v3941_v24 = vpop.eup %3940 }
 0x996   : > { %v2499_v23 = vpop.permute.xlu0 %2498 }
 0x997   : > { %2511 = vst.msk [vmem:[#allocation2] sm:$0xff] %vm2510_vm4, %v2499_v23  ;;  %2863 = vadd.xlane.f32.xlu1 %v2862_v54 }
 0x99a   : > { %v1820_v17 = vpop.permute.xlu0 %1819 }
 0x99b   : > { %1830 = vst.msk [vmem:[#allocation2 + $0x10] sm:$0xff] %vm1827_vm3, %v1820_v17 }
 0x99e   : > { %v2503_v19 = vpop.permute.xlu0 %2502 }
 0x99f   : > { %2513 = vst.msk [vmem:[#allocation2 + $0x10] sm:$0xff] %vm2510_vm4, %v2503_v19 }
 0x9a8   : > { %3101 = vrot.lane.b32.xlu1 %v4267_v56, %s3958_s28  ;;  %v2871_v56 = vmul.f32 %v3941_v24, %v3933_v61 }
 0x9ac   : > { %1817 = vrot.lane.b32.xlu1 %v4408_v31, %s3958_s28 }
 0x9b0   : > { %2500 = vrot.lane.b32.xlu1 %v4473_v43, %s3957_s24  ;;  %v3206_v43 = vld [vmem:[%s4594_s4 + $0x20] sm:$0xff] }
 0x9b4   : > { %1821 = vrot.lane.b32.xlu1 %v4410_v33, %s3958_s28 }
 0x9b8   : > { %2504 = vrot.lane.b32.xlu1 %v4475_v45, %s3957_s24  ;;  %v3845_v45 = vpack.c.bf16 %v3207_v44, %v3206_v43 }
 0x9eb   : > { %v2858_v21 = vpop.xlane.xlu1 %2857 }
 0x9ec   : > { %3942 = vrcp.f32 %v2858_v21 }
 0x9ef   : > { %v2950_v22 = vpop.permute.xlu1 %2949 }
 0x9f0   : > { %3721 = vmatpush3.msra.mxu1 %v2950_v22 }
 0x9f1   : > { %3730 = vmatprep.subr.mxu1 %v3954_v7 }
 0x9f3   : > { %v3026_v25 = vpop.permute.xlu1 %3025 }
 0x9f4   : > { %3726 = vmatpush3.msra.mxu0 %v3026_v25 }
 0x9f5   : > { %3728 = vmatmul.mubr.msk.f32.vlgmr.msra.gmra.mrb[28].mxu0 %vm804_vm2, %v2871_v56  ;;  %3838 = vmatprep.subr.bf16.mxu0 %v3837_v40 }
 0x9f6   : > { %v3943_v31 = vpop.eup %3942  ;;  %3840 = vmatpush3.bf16.msra.mxu0 %v3837_v40 }
 0x9f7   : > { %v2870_v26 = vmul.f32 %v3943_v31, %v3935_v3  ;;  %3842 = vmatprep.subr.bf16.mxu0 %v3841_v42 }
 0x9f9   : > { %3723 = vmatmul.mubr.msk.f32.vlgmr.msra.gmra.mrb[42].mxu1 %vm804_vm2, %v2870_v26 }
 0x9fa   : > { %3732 = vmatprep.mubr.msk.f32.mxu1 %vm3955_vm0, %v3954_v7  ;;  %3844 = vmatpush3.bf16.msra.mxu0 %v3841_v42 }
 0x9fb   : > { %3846 = vmatprep.subr.bf16.mxu0 %v3845_v45 }
 0x9fe   : > { %3848 = vmatpush3.bf16.msra.mxu0 %v3845_v45 }
 0x9ff   : > { %3850 = vmatprep.subr.bf16.mxu0 %v3849_v48 }
 0xa02   : > { %3852 = vmatpush3.bf16.msra.mxu0 %v3849_v48 }
 0xa03   : > { %3854 = vmatprep.subr.bf16.mxu0 %v3853_v50 }
 0xa06   : > { %3856 = vmatpush3.bf16.msra.mxu0 %v3853_v50 }
 0xa07   : > { %3858 = vmatprep.subr.bf16.mxu0 %v3857_v51 }
 0xa0a   : > { %3860 = vmatpush3.bf16.msra.mxu0 %v3857_v51 }
 0xa0b   : > { %3862 = vmatprep.subr.bf16.mxu0 %v3861_v55 }
 0xa0e   : > { %3864 = vmatpush3.bf16.msra.mxu0 %v3861_v55 }
 0xa0f   : > { %3866 = vmatprep.subr.bf16.mxu0 %v3865_v58 }
 0xa12   : > { %3868 = vmatpush3.bf16.msra.mxu0 %v3865_v58 }
 0xa24   : > { %v2864_v33 = vpop.xlane.xlu1 %2863 }
 0xa25   : > { %3944 = vrcp.f32 %v2864_v33 }
 0xa28   : > { %v3102_v27 = vpop.permute.xlu1 %3101 }
 0xa29   : > { %3731 = vmatpush3.msra.mxu1 %v3102_v27 }
 0xa2c   : > { %v1818_v28 = vpop.permute.xlu1 %1817 }
 0xa2d   : > { %1829 = vst.msk [vmem:[#allocation2 + $0x8] sm:$0xff] %vm1827_vm3, %v1818_v28 }
 0xa2f   : > { %v3945_v29 = vpop.eup %3944 }
 0xa30   : > { %v2872_v30 = vmul.f32 %v3945_v29, %v3939_v15  ;;  %v2501_v32 = vpop.permute.xlu1 %2500 }
 0xa31   : > { %2512 = vst.msk [vmem:[#allocation2 + $0x8] sm:$0xff] %vm2510_vm4, %v2501_v32 }
 0xa32   : > { %3733 = vmatmul.mubr.msk.f32.vlgmr.msra.gmra.mrb[44].mxu1 %vm804_vm2, %v2872_v30 }
 0xa34   : > { %v1822_v34 = vpop.permute.xlu1 %1821 }
 0xa35   : > { %1831 = vst.msk [vmem:[#allocation2 + $0x18] sm:$0xff] %vm1827_vm3, %v1822_v34 }
 0xa38   : > { %v2505_v35 = vpop.permute.xlu1 %2504 }
 0xa39   : > { %2514 = vst.msk [vmem:[#allocation2 + $0x18] sm:$0xff] %vm2510_vm4, %v2505_v35 }
 0xa67   : > { %v2945_v7 = vpop.f32.mrb[26].mxu0 }
 0xa68   : > { %3181 = vrot.lane.b32.xlu0 %v2945_v7, %s3956_s20  ;;  %v3719_v36 = vpop.f32.mrb[27].mxu0 }
 0xac8   : > { %v3097_v59 = vpop.f32.mrb[28].mxu0 }
 0xac9   : > { %3185 = vrot.lane.b32.xlu0 %v3097_v59, %s3956_s20  ;;  %v3729_v60 = vpop.f32.mrb[29].mxu0 }
 0xacc   : > { %v3021_v61 = vpop.f32.mrb[42].mxu1 }
 0xacd   : > { %3183 = vrot.lane.b32.xlu1 %v3021_v61, %s3956_s20  ;;  %v3724_v6 = vpop.f32.mrb[43].mxu1 }
 0xada   : > { %v3182_v8 = vpop.permute.xlu0 %3181 }
 0xadb   : > { %3194 = vst.msk [vmem:[#allocation2] sm:$0xff] %vm3193_vm5, %v3182_v8 }
 0xae2   : > { %v3198_v63 = vld [vmem:[#allocation2] sm:$0xff] }
 0xae3   : > { %3767 = vmatprep.mubr.f32.mxu0 %v3198_v63 }
 0xb05   : > { %v3173_v1 = vpop.f32.mrb[44].mxu1 }
 0xb06   : > { %3187 = vrot.lane.b32.xlu1 %v3173_v1, %s3956_s20  ;;  %v3734_v3 = vpop.f32.mrb[45].mxu1 }
 0xb3b   : > { %v3186_v11 = vpop.permute.xlu0 %3185 }
 0xb3c   : > { %3196 = vst.msk [vmem:[#allocation2 + $0x10] sm:$0xff] %vm3193_vm5, %v3186_v11 }
 0xb3f   : > { %v3184_v20 = vpop.permute.xlu1 %3183 }
 0xb40   : > { %3195 = vst.msk [vmem:[#allocation2 + $0x8] sm:$0xff] %vm3193_vm5, %v3184_v20 }
 0xb43   : > { %v3200_v5 = vld [vmem:[#allocation2 + $0x10] sm:$0xff] }
 0xb47   : > { %v3199_v16 = vld [vmem:[#allocation2 + $0x8] sm:$0xff] }
 0xb48   : > { %3768 = vmatmul.mubr.f32.vlgmr.msra.gmra.mrb[30].mxu0 %v3199_v16 }
 0xb49   : > { %3770 = vmatprep.mubr.f32.mxu0 %v3200_v5 }
 0xb78   : > { %v3188_v18 = vpop.permute.xlu1 %3187 }
 0xb79   : > { %3197 = vst.msk [vmem:[#allocation2 + $0x18] sm:$0xff] %vm3193_vm5, %v3188_v18 }
 0xb80   : > { %v3201_v9 = vld [vmem:[#allocation2 + $0x18] sm:$0xff] }
 0xb81   : > { %3771 = vmatmul.mubr.f32.gmra.mrb[32].mxu0 %v3201_v9 }
 0xc1b   : > { %v3769_v13 = vpop.f32.mrb[30].mxu0 }
 0xc1c   : > { %v3297_v12 = vadd.f32 %v3769_v13, %v3430_v10  ;;  %v3291_v14 = vpop.f32.mrb[31].mxu0 }
 0xc1d   : > { %v3292_v15 = vadd.f32 %v3430_v10, %v3291_v14 }
 0xc1e   : > { %3311 = vst [vmem:[%s253_s26 + $0x8] sm:$0xff] %v3297_v12 }
 0xc1f   : > { %3310 = vst [vmem:[%s253_s26] sm:$0xff] %v3292_v15 }
 0xc54   : > { %v3772_v23 = vpop.f32.mrb[32].mxu0 }
 0xc55   : > { %v3307_v54 = vadd.f32 %v3772_v23, %v3430_v10  ;;  %v3301_v17 = vpop.f32.mrb[33].mxu0 }
 0xc56   : > { %v3302_v19 = vadd.f32 %v3430_v10, %v3301_v17 }
 0xc57   : > { %3313 = vst [vmem:[%s253_s26 + $0x18] sm:$0xff] %v3307_v54 }
 0xc58   : > { %3312 = vst [vmem:[%s253_s26 + $0x10] sm:$0xff] %v3302_v19 }
 0xc59 PF: > { %s16_s21 = sadd.s32 1, %s3952_s21  }
 0xc5a   : > { %p13_p4 = scmp.ge.s32.totalorder %s16_s21, 6  }
 0xc5c   :  { %15 = sbr.rel (!%p13_p4) target bundleno = 1 (0x1), region = 77 }

</bundles_post_ra>
